<compile_context>
chip_gen: v5e
topology: v5e:2x2
jax: 0.10.0
libtpu: 0.0.40
codegen_flags: <defaults>
</compile_context>

<pallas_src>
import functools

import jax
import jax.numpy as jnp
from jax.experimental import pallas as pl
from jax.experimental.pallas import tpu as pltpu


def _round_up(a, m):
    return ((a + m - 1) // m) * m


def encoder_kernel(x_ref, w1_ref, b1_ref, w2_ref, b2_ref, w3_ref, b3_ref, o_ref):
    # Layer 1: (TB, n_x)bf16 @ (n_x, 800)bf16 -> f32 acc, +bias, ReLU
    h1 = jnp.dot(x_ref[...], w1_ref[...], preferred_element_type=jnp.float32)
    h1 = jnp.maximum(h1 + b1_ref[...], 0.0)
    # Layer 2: (TB, 800)bf16 @ (800, 800)bf16 -> f32 acc, +bias, ReLU
    h2 = jnp.dot(h1.astype(jnp.bfloat16), w2_ref[...],
                 preferred_element_type=jnp.float32)
    h2 = jnp.maximum(h2 + b2_ref[...], 0.0)
    # Layer 3: (TB, 800)bf16 @ (800, out_pad)bf16 -> f32 acc, +bias
    out = jnp.dot(h2.astype(jnp.bfloat16), w3_ref[...],
                  preferred_element_type=jnp.float32)
    o_ref[...] = (out + b3_ref[...]).astype(o_ref.dtype)


@functools.partial(jax.jit, static_argnames=("n_x", "tb"))
def deterministic_encoder(x, params, n_x, tb=256):
    """x: any shape whose trailing dims flatten to n_x (like PyTorch view(-1, n_x))."""
    x2d = x.reshape(-1, n_x)
    B = x2d.shape[0]
    w1, b1, w2, b2, w3, b3 = params
    h = w1.shape[1]
    out_dim = w3.shape[1]

    # --- lane-pad the output head to a multiple of 128 (unmasked stores) ---
    out_pad = _round_up(out_dim, 128)
    if out_pad != out_dim:
        w3 = jnp.pad(w3, ((0, 0), (0, out_pad - out_dim)))
        b3 = jnp.pad(b3, ((0, 0), (0, out_pad - out_dim)))

    # --- batch tiling (pad rows to a multiple of the batch tile) ---
    TB = min(tb, _round_up(B, 8))
    B_pad = _round_up(B, TB)
    x2d = x2d.astype(jnp.bfloat16)
    if B_pad != B:
        x2d = jnp.pad(x2d, ((0, B_pad - B), (0, 0)))

    # bf16 operands for the MXU; f32 biases (added after f32 accumulation).
    w1b = w1.astype(jnp.bfloat16)
    w2b = w2.astype(jnp.bfloat16)
    w3b = w3.astype(jnp.bfloat16)
    b1f = b1.astype(jnp.float32)
    b2f = b2.astype(jnp.float32)
    b3f = b3.astype(jnp.float32)

    const = lambda i: (0, 0)       # weights/biases: VMEM-resident across tiles
    tiled = lambda i: (i, 0)       # x / out: tiled over batch

    out = pl.pallas_call(
        encoder_kernel,
        out_shape=jax.ShapeDtypeStruct((B_pad, out_pad), jnp.float32),
        grid=(B_pad // TB,),
        in_specs=[
            pl.BlockSpec((TB, n_x), tiled),
            pl.BlockSpec((n_x, h), const),
            pl.BlockSpec((1, h), const),
            pl.BlockSpec((h, h), const),
            pl.BlockSpec((1, h), const),
            pl.BlockSpec((h, out_pad), const),
            pl.BlockSpec((1, out_pad), const),
        ],
        out_specs=pl.BlockSpec((TB, out_pad), tiled),
        compiler_params=pltpu.CompilerParams(
            dimension_semantics=("parallel",),
            vmem_limit_bytes=32 << 20,
        ),
    )(x2d, w1b, b1f, w2b, b2f, w3b, b3f)

    return out[:B, :out_dim]


def init_params(key, n_x, K):
    """PyTorch-style Linear init. Weights are (in, out); biases kept 2-D (1, out)."""
    h = 800
    out_dim = 2 * K + 2
    k1, k2, k3, k4, k5, k6 = jax.random.split(key, 6)

    def lin(kw, kb, fan_in, fan_out):
        bound = 1.0 / jnp.sqrt(fan_in)
        w = jax.random.uniform(kw, (fan_in, fan_out), jnp.float32, -bound, bound)
        b = jax.random.uniform(kb, (1, fan_out), jnp.float32, -bound, bound)
        return w, b

    w1, b1 = lin(k1, k2, n_x, h)
    w2, b2 = lin(k3, k4, h, h)
    w3, b3 = lin(k5, k6, h, out_dim)
    return (w1, b1, w2, b2, w3, b3)


if __name__ == "__main__":
    # Small MNIST-like setup: batch=2, 1x16x16 images -> n_x=256, K=15 -> out=32.
    K = 15
    n_x = 16 * 16
    key = jax.random.PRNGKey(0)
    kx, kp = jax.random.split(key)

    x = jax.random.normal(kx, (2, 1, 16, 16), jnp.float32)  # NCHW like PyTorch
    params = init_params(kp, n_x, K)

    out = deterministic_encoder(x, params, n_x)
    out = jax.block_until_ready(out)

    # Reference: same math as the PyTorch module, with matching bf16 operand casts.
    w1, b1, w2, b2, w3, b3 = params
    xr = x.reshape(-1, n_x).astype(jnp.bfloat16)
    h1 = jnp.maximum(
        jnp.dot(xr, w1.astype(jnp.bfloat16), preferred_element_type=jnp.float32) + b1, 0.0)
    h2 = jnp.maximum(
        jnp.dot(h1.astype(jnp.bfloat16), w2.astype(jnp.bfloat16),
                preferred_element_type=jnp.float32) + b2, 0.0)
    ref = jnp.dot(h2.astype(jnp.bfloat16), w3.astype(jnp.bfloat16),
                  preferred_element_type=jnp.float32) + b3

    assert out.shape == (2, 2 * K + 2)
    assert jnp.allclose(out, ref, atol=2e-2, rtol=2e-2)

    print("KERNEL_OK")
</pallas_src>

<mosaic_0001>
module attributes {stable_mosaic.version = 11 : i64} {
  func.func @encoder_kernel(%arg0: i32, %arg1: memref<8x256xbf16, #tpu.memory_space<vmem>>, %arg2: memref<256x800xbf16, #tpu.memory_space<vmem>>, %arg3: memref<1x800xf32, #tpu.memory_space<vmem>>, %arg4: memref<800x800xbf16, #tpu.memory_space<vmem>>, %arg5: memref<1x800xf32, #tpu.memory_space<vmem>>, %arg6: memref<800x128xbf16, #tpu.memory_space<vmem>>, %arg7: memref<1x128xf32, #tpu.memory_space<vmem>>, %arg8: memref<8x128xf32, #tpu.memory_space<vmem>>) attributes {dimension_semantics = [#tpu.dimension_semantics<parallel>], iteration_bounds = array<i64: 1>, scalar_prefetch = 0 : i64, scratch_operands = 0 : i64, tpu.core_type = #tpu.core_type<tc>, window_params = [{transform_indices = @transform_0, window_bounds = array<i64: 8, 256>}, {pipeline_mode = #tpu.pipeline_mode<synchronous>, transform_indices = @transform_1, window_bounds = array<i64: 256, 800>}, {pipeline_mode = #tpu.pipeline_mode<synchronous>, transform_indices = @transform_2, window_bounds = array<i64: 1, 800>}, {pipeline_mode = #tpu.pipeline_mode<synchronous>, transform_indices = @transform_3, window_bounds = array<i64: 800, 800>}, {pipeline_mode = #tpu.pipeline_mode<synchronous>, transform_indices = @transform_4, window_bounds = array<i64: 1, 800>}, {pipeline_mode = #tpu.pipeline_mode<synchronous>, transform_indices = @transform_5, window_bounds = array<i64: 800, 128>}, {pipeline_mode = #tpu.pipeline_mode<synchronous>, transform_indices = @transform_6, window_bounds = array<i64: 1, 128>}, {transform_indices = @transform_7, window_bounds = array<i64: 8, 128>}]} {
    %c0 = arith.constant 0 : index
    %c0_0 = arith.constant 0 : index
    %0 = vector.load %arg1[%c0, %c0_0] : memref<8x256xbf16, #tpu.memory_space<vmem>>, vector<8x256xbf16>
    %c0_1 = arith.constant 0 : index
    %c0_2 = arith.constant 0 : index
    %1 = vector.load %arg2[%c0_1, %c0_2] : memref<256x800xbf16, #tpu.memory_space<vmem>>, vector<256x800xbf16>
    %cst = arith.constant dense<0.000000e+00> : vector<8x800xf32>
    %2 = tpu.matmul %0, %1, %cst {dimension_numbers = #tpu.dot_dimension_numbers<[1], [0], [0], [1], [0, 0, 1, 1], [], []>} : vector<8x256xbf16>, vector<256x800xbf16>, vector<8x800xf32> -> vector<8x800xf32>
    %c0_3 = arith.constant 0 : index
    %c0_4 = arith.constant 0 : index
    %3 = vector.load %arg3[%c0_3, %c0_4] : memref<1x800xf32, #tpu.memory_space<vmem>>, vector<1x800xf32>
    %4 = vector.broadcast %3 : vector<1x800xf32> to vector<8x800xf32>
    %5 = arith.addf %2, %4 : vector<8x800xf32>
    %cst_5 = arith.constant 0.000000e+00 : f32
    %6 = vector.broadcast %cst_5 : f32 to vector<8x800xf32>
    %7 = arith.maximumf %5, %6 : vector<8x800xf32>
    %8 = arith.truncf %7 : vector<8x800xf32> to vector<8x800xbf16>
    %c0_6 = arith.constant 0 : index
    %c0_7 = arith.constant 0 : index
    %9 = vector.load %arg4[%c0_6, %c0_7] : memref<800x800xbf16, #tpu.memory_space<vmem>>, vector<800x800xbf16>
    %cst_8 = arith.constant dense<0.000000e+00> : vector<8x800xf32>
    %10 = tpu.matmul %8, %9, %cst_8 {dimension_numbers = #tpu.dot_dimension_numbers<[1], [0], [0], [1], [0, 0, 1, 1], [], []>} : vector<8x800xbf16>, vector<800x800xbf16>, vector<8x800xf32> -> vector<8x800xf32>
    %c0_9 = arith.constant 0 : index
    %c0_10 = arith.constant 0 : index
    %11 = vector.load %arg5[%c0_9, %c0_10] : memref<1x800xf32, #tpu.memory_space<vmem>>, vector<1x800xf32>
    %12 = vector.broadcast %11 : vector<1x800xf32> to vector<8x800xf32>
    %13 = arith.addf %10, %12 : vector<8x800xf32>
    %cst_11 = arith.constant 0.000000e+00 : f32
    %14 = vector.broadcast %cst_11 : f32 to vector<8x800xf32>
    %15 = arith.maximumf %13, %14 : vector<8x800xf32>
    %16 = arith.truncf %15 : vector<8x800xf32> to vector<8x800xbf16>
    %c0_12 = arith.constant 0 : index
    %c0_13 = arith.constant 0 : index
    %17 = vector.load %arg6[%c0_12, %c0_13] : memref<800x128xbf16, #tpu.memory_space<vmem>>, vector<800x128xbf16>
    %cst_14 = arith.constant dense<0.000000e+00> : vector<8x128xf32>
    %18 = tpu.matmul %16, %17, %cst_14 {dimension_numbers = #tpu.dot_dimension_numbers<[1], [0], [0], [1], [0, 0, 1, 1], [], []>} : vector<8x800xbf16>, vector<800x128xbf16>, vector<8x128xf32> -> vector<8x128xf32>
    %c0_15 = arith.constant 0 : index
    %c0_16 = arith.constant 0 : index
    %19 = vector.load %arg7[%c0_15, %c0_16] : memref<1x128xf32, #tpu.memory_space<vmem>>, vector<1x128xf32>
    %20 = vector.broadcast %19 : vector<1x128xf32> to vector<8x128xf32>
    %21 = arith.addf %18, %20 : vector<8x128xf32>
    %c0_17 = arith.constant 0 : index
    %c0_18 = arith.constant 0 : index
    %22 = vector.load %arg8[%c0_17, %c0_18] : memref<8x128xf32, #tpu.memory_space<vmem>>, vector<8x128xf32>
    tpu.vector_store %arg8[%c0_17, %c0_18], %21 {strides = array<i32>} : memref<8x128xf32, #tpu.memory_space<vmem>>, vector<8x128xf32>,
    return
  }
  func.func @transform_0(%arg0: i32) -> (i32, i32) {
    %c0_i32 = arith.constant 0 : i32
    %c0_i32_0 = arith.constant 0 : i32
    return %arg0, %c0_i32 : i32, i32
  }
  func.func @transform_1(%arg0: i32) -> (i32, i32) {
    %c0_i32 = arith.constant 0 : i32
    %c0_i32_0 = arith.constant 0 : i32
    %c0_i32_1 = arith.constant 0 : i32
    return %c0_i32, %c0_i32_0 : i32, i32
  }
  func.func @transform_2(%arg0: i32) -> (i32, i32) {
    %c0_i32 = arith.constant 0 : i32
    %c0_i32_0 = arith.constant 0 : i32
    %c0_i32_1 = arith.constant 0 : i32
    return %c0_i32, %c0_i32_0 : i32, i32
  }
  func.func @transform_3(%arg0: i32) -> (i32, i32) {
    %c0_i32 = arith.constant 0 : i32
    %c0_i32_0 = arith.constant 0 : i32
    %c0_i32_1 = arith.constant 0 : i32
    return %c0_i32, %c0_i32_0 : i32, i32
  }
  func.func @transform_4(%arg0: i32) -> (i32, i32) {
    %c0_i32 = arith.constant 0 : i32
    %c0_i32_0 = arith.constant 0 : i32
    %c0_i32_1 = arith.constant 0 : i32
    return %c0_i32, %c0_i32_0 : i32, i32
  }
  func.func @transform_5(%arg0: i32) -> (i32, i32) {
    %c0_i32 = arith.constant 0 : i32
    %c0_i32_0 = arith.constant 0 : i32
    %c0_i32_1 = arith.constant 0 : i32
    return %c0_i32, %c0_i32_0 : i32, i32
  }
  func.func @transform_6(%arg0: i32) -> (i32, i32) {
    %c0_i32 = arith.constant 0 : i32
    %c0_i32_0 = arith.constant 0 : i32
    %c0_i32_1 = arith.constant 0 : i32
    return %c0_i32, %c0_i32_0 : i32, i32
  }
  func.func @transform_7(%arg0: i32) -> (i32, i32) {
    %c0_i32 = arith.constant 0 : i32
    %c0_i32_0 = arith.constant 0 : i32
    return %arg0, %c0_i32 : i32, i32
  }
}

</mosaic_0001>

<bundles_post_ra>
// kernel: deterministic_encoder.1
= control target key start
LH: loop header
LB: loop body
LE: loop exit
PB: predicated region body
PF: predicated region fallthrough
CT: control target
= control target key end

     0   :  { %vm3167_vm0 = vcmask 261120   ;;  %s10068_s1 = inlined_call_operand.vmem [shape: bf16[256,800], index: 1, kind: input, shape index: {}]   ;;  %s10069_s0 = inlined_call_operand.vmem [shape: bf16[8,256], index: 0, kind: input, shape index: {}]   ;;  %s10070_s3 = inlined_call_operand.vmem [shape: bf16[800,800], index: 3, kind: input, shape index: {}]   ;;  %s10071_s2 = inlined_call_operand.vmem [shape: f32[1,800], index: 2, kind: input, shape index: {}]   ;;  %s10072_s4 = inlined_call_operand.vmem [shape: f32[1,800], index: 4, kind: input, shape index: {}]   ;;  %s10073_s5 = inlined_call_operand.vmem [shape: bf16[800,128], index: 5, kind: input, shape index: {}]   ;;  %s10074_s6 = inlined_call_operand.vmem [shape: f32[1,128], index: 6, kind: input, shape index: {}]   ;;  %s10075_s7 = inlined_call_operand.vmem [shape: f32[8,128], index: 7, kind: output, shape index: {}]  }
   0x1   :  { %v4523_v0 = vld [vmem:[%s10068_s1 + $0x188] sm:$0xf]  ;;  %v6433_v1 = vld [vmem:[%s10068_s1 + $0x1a0] sm:$0xf0]  ;;  %v6430_v5 = vld [vmem:[%s10068_s1 + $0x18c] sm:$0xf] }
   0x2   :  { %v4747_v2 = vld [vmem:[%s10068_s1 + $0x348] sm:$0xf]  ;;  %v4524_v3 = vor.u32 %v6433_v1, %v4523_v0  ;;  %v6489_v4 = vld [vmem:[%s10068_s1 + $0x360] sm:$0xf0]  ;;  %v6486_v9 = vld [vmem:[%s10068_s1 + $0x34c] sm:$0xf] }
   0x3   :  { %v4525_v6 = vld [vmem:[%s10068_s1 + $0x1a4] sm:$0xf0]  ;;  %v4748_v7 = vor.u32 %v6489_v4, %v4747_v2  ;;  %v4495_v11 = vld [vmem:[%s10068_s1 + $0x150] sm:$0xf]  ;;  %v6426_v13 = vld [vmem:[%s10068_s1 + $0x168] sm:$0xf0] }
   0x4   :  { %v4528_v8 = vor.u32 %v6430_v5, %v4525_v6  ;;  %v4749_v10 = vld [vmem:[%s10068_s1 + $0x364] sm:$0xf0]  ;;  %755 = vmatpush.bf16.msra.mxu0 %v4524_v3  ;;  %v4719_v14 = vld [vmem:[%s10068_s1 + $0x310] sm:$0xf]  ;;  %v6482_v15 = vld [vmem:[%s10068_s1 + $0x328] sm:$0xf0]  ;;  %v4496_v16 = vor.u32 %v6426_v13, %v4495_v11 }
   0x5   :  { %v4752_v12 = vor.u32 %v6486_v9, %v4749_v10  ;;  %768 = vmatpush.bf16.msra.mxu1 %v4748_v7  ;;  %v4720_v17 = vor.u32 %v6482_v15, %v4719_v14  ;;  %v6423_v18 = vld [vmem:[%s10068_s1 + $0x154] sm:$0xf]  ;;  %v4497_v19 = vld [vmem:[%s10068_s1 + $0x16c] sm:$0xf0]  ;;  %v4467_v23 = vld [vmem:[%s10068_s1 + $0x118] sm:$0xf] }
   0x6   :  { %781 = vmatpush.bf16.msra.mxu2 %v4528_v8  ;;  %v6479_v20 = vld [vmem:[%s10068_s1 + $0x314] sm:$0xf]  ;;  %v4500_v21 = vor.u32 %v6423_v18, %v4497_v19  ;;  %v4721_v22 = vld [vmem:[%s10068_s1 + $0x32c] sm:$0xf0]  ;;  %v4691_v26 = vld [vmem:[%s10068_s1 + $0x2d8] sm:$0xf] }
   0x7   :  { %794 = vmatpush.bf16.msra.mxu3 %v4752_v12  ;;  %v6419_v24 = vld [vmem:[%s10068_s1 + $0x130] sm:$0xf0]  ;;  %v4724_v25 = vor.u32 %v6479_v20, %v4721_v22  ;;  %v6416_v28 = vld [vmem:[%s10068_s1 + $0x11c] sm:$0xf]  ;;  %v4469_v30 = vld [vmem:[%s10068_s1 + $0x134] sm:$0xf0] }
   0x8   :  { %v6475_v27 = vld [vmem:[%s10068_s1 + $0x2f0] sm:$0xf0]  ;;  %756 = vmatpush.bf16.msra.mxu0 %v4496_v16  ;;  %v4468_v29 = vor.u32 %v6419_v24, %v4467_v23  ;;  %v6472_v31 = vld [vmem:[%s10068_s1 + $0x2dc] sm:$0xf]  ;;  %v4693_v32 = vld [vmem:[%s10068_s1 + $0x2f4] sm:$0xf0]  ;;  %v4472_v34 = vor.u32 %v6416_v28, %v4469_v30 }
   0x9   :  { %769 = vmatpush.bf16.msra.mxu1 %v4720_v17  ;;  %v4692_v33 = vor.u32 %v6475_v27, %v4691_v26  ;;  %v4439_v35 = vld [vmem:[%s10068_s1 + $0xe0] sm:$0xf]  ;;  %v6412_v36 = vld [vmem:[%s10068_s1 + $0xf8] sm:$0xf0]  ;;  %v4696_v38 = vor.u32 %v6472_v31, %v4693_v32  ;;  %v6409_v40 = vld [vmem:[%s10068_s1 + $0xe4] sm:$0xf] }
   0xa   :  { %782 = vmatpush.bf16.msra.mxu2 %v4500_v21  ;;  %v4663_v37 = vld [vmem:[%s10068_s1 + $0x2a0] sm:$0xf]  ;;  %v6468_v39 = vld [vmem:[%s10068_s1 + $0x2b8] sm:$0xf0]  ;;  %v6465_v42 = vld [vmem:[%s10068_s1 + $0x2a4] sm:$0xf]  ;;  %v4440_v44 = vor.u32 %v6412_v36, %v4439_v35 }
   0xb   :  { %795 = vmatpush.bf16.msra.mxu3 %v4724_v25  ;;  %v4441_v41 = vld [vmem:[%s10068_s1 + $0xfc] sm:$0xf0]  ;;  %v4664_v45 = vor.u32 %v6468_v39, %v4663_v37  ;;  %v4411_v47 = vld [vmem:[%s10068_s1 + $0xa8] sm:$0xf]  ;;  %v6405_v48 = vld [vmem:[%s10068_s1 + $0xc0] sm:$0xf0] }
   0xc   :  { %v4665_v43 = vld [vmem:[%s10068_s1 + $0x2bc] sm:$0xf0]  ;;  %757 = vmatpush.bf16.msra.mxu0 %v4468_v29  ;;  %v4444_v46 = vor.u32 %v6409_v40, %v4441_v41  ;;  %v4635_v49 = vld [vmem:[%s10068_s1 + $0x268] sm:$0xf]  ;;  %v6461_v51 = vld [vmem:[%s10068_s1 + $0x280] sm:$0xf0]  ;;  %v4412_v56 = vor.u32 %v6405_v48, %v4411_v47 }
   0xd   :  { %770 = vmatpush.bf16.msra.mxu1 %v4692_v33  ;;  %v4668_v50 = vor.u32 %v6465_v42, %v4665_v43  ;;  %v6402_v52 = vld [vmem:[%s10068_s1 + $0xac] sm:$0xf]  ;;  %v4413_v53 = vld [vmem:[%s10068_s1 + $0xc4] sm:$0xf0]  ;;  %v4636_v57 = vor.u32 %v6461_v51, %v4635_v49  ;;  %v4383_v59 = vld [vmem:[%s10068_s1 + $0x70] sm:$0xf] }
   0xe   :  { %783 = vmatpush.bf16.msra.mxu2 %v4472_v34  ;;  %v6458_v54 = vld [vmem:[%s10068_s1 + $0x26c] sm:$0xf]  ;;  %v4637_v55 = vld [vmem:[%s10068_s1 + $0x284] sm:$0xf0]  ;;  %v4416_v58 = vor.u32 %v6402_v52, %v4413_v53  ;;  %v4607_v61 = vld [vmem:[%s10068_s1 + $0x230] sm:$0xf] }
   0xf   :  { %796 = vmatpush.bf16.msra.mxu3 %v4696_v38  ;;  %v6398_v60 = vld [vmem:[%s10068_s1 + $0x88] sm:$0xf0]  ;;  %v4640_v62 = vor.u32 %v6458_v54, %v4637_v55  ;;  %v6395_v0 = vld [vmem:[%s10068_s1 + $0x74] sm:$0xf]  ;;  %v4385_v1 = vld [vmem:[%s10068_s1 + $0x8c] sm:$0xf0] }
  0x10   :  { %758 = vmatpush.bf16.msra.mxu0 %v4440_v44  ;;  %v6454_v63 = vld [vmem:[%s10068_s1 + $0x248] sm:$0xf0]  ;;  %v6451_v2 = vld [vmem:[%s10068_s1 + $0x234] sm:$0xf]  ;;  %v4609_v3 = vld [vmem:[%s10068_s1 + $0x24c] sm:$0xf0]  ;;  %v4384_v4 = vor.u32 %v6398_v60, %v4383_v59  ;;  %v4388_v6 = vor.u32 %v6395_v0, %v4385_v1 }
  0x11   :  { %771 = vmatpush.bf16.msra.mxu1 %v4664_v45  ;;  %v4608_v5 = vor.u32 %v6454_v63, %v4607_v61  ;;  %v4355_v7 = vld [vmem:[%s10068_s1 + $0x38] sm:$0xf]  ;;  %v6391_v8 = vld [vmem:[%s10068_s1 + $0x50] sm:$0xf0]  ;;  %v4612_v10 = vor.u32 %v6451_v2, %v4609_v3  ;;  %v6388_v12 = vld [vmem:[%s10068_s1 + $0x3c] sm:$0xf] }
  0x12   :  { %784 = vmatpush.bf16.msra.mxu2 %v4444_v46  ;;  %v4579_v9 = vld [vmem:[%s10068_s1 + $0x1f8] sm:$0xf]  ;;  %v6447_v11 = vld [vmem:[%s10068_s1 + $0x210] sm:$0xf0]  ;;  %v6444_v14 = vld [vmem:[%s10068_s1 + $0x1fc] sm:$0xf]  ;;  %v4356_v16 = vor.u32 %v6391_v8, %v4355_v7 }
  0x13   :  { %797 = vmatpush.bf16.msra.mxu3 %v4668_v50  ;;  %v4357_v13 = vld [vmem:[%s10068_s1 + $0x54] sm:$0xf0]  ;;  %v4327_v17 = vld [vmem:[%s10068_s1] sm:$0xf]  ;;  %v6384_v18 = vld [vmem:[%s10068_s1 + $0x18] sm:$0xf0]  ;;  %v4580_v19 = vor.u32 %v6447_v11, %v4579_v9 }
  0x14   :  { %759 = vmatpush.bf16.msra.mxu0 %v4412_v56  ;;  %v4581_v15 = vld [vmem:[%s10068_s1 + $0x214] sm:$0xf0]  ;;  %v4360_v20 = vor.u32 %v6388_v12, %v4357_v13  ;;  %v4551_v21 = vld [vmem:[%s10068_s1 + $0x1c0] sm:$0xf]  ;;  %v6440_v22 = vld [vmem:[%s10068_s1 + $0x1d8] sm:$0xf0]  ;;  %v4328_v31 = vor.u32 %v6384_v18, %v4327_v17 }
  0x15   :  { %772 = vmatpush.bf16.msra.mxu1 %v4636_v57  ;;  %v6381_v23 = vld [vmem:[%s10068_s1 + $0x4] sm:$0xf]  ;;  %v4584_v24 = vor.u32 %v6444_v14, %v4581_v15  ;;  %v4329_v25 = vld [vmem:[%s10068_s1 + $0x1c] sm:$0xf0]  ;;  %v4531_v28 = vld [vmem:[%s10068_s1 + $0x190] sm:$0xf]  ;;  %v4552_v35 = vor.u32 %v6440_v22, %v4551_v21 }
  0x16   :  { %785 = vmatpush.bf16.msra.mxu2 %v4416_v58  ;;  %v6437_v26 = vld [vmem:[%s10068_s1 + $0x1c4] sm:$0xf]  ;;  %v4553_v27 = vld [vmem:[%s10068_s1 + $0x1dc] sm:$0xf0]  ;;  %v6434_v29 = vld [vmem:[%s10068_s1 + $0x1a8] sm:$0xf0]  ;;  %v4332_v36 = vor.u32 %v6381_v23, %v4329_v25 }
  0x17   :  { %798 = vmatpush.bf16.msra.mxu3 %v4640_v62  ;;  %v4755_v30 = vld [vmem:[%s10068_s1 + $0x350] sm:$0xf]  ;;  %v6490_v32 = vld [vmem:[%s10068_s1 + $0x368] sm:$0xf0]  ;;  %v6431_v33 = vld [vmem:[%s10068_s1 + $0x194] sm:$0xf]  ;;  %v4556_v39 = vor.u32 %v6437_v26, %v4553_v27  ;;  %v4532_v40 = vor.u32 %v6434_v29, %v4531_v28 }
  0x18   :  { %760 = vmatpush.bf16.msra.mxu0 %v4384_v4  ;;  %v4533_v34 = vld [vmem:[%s10068_s1 + $0x1ac] sm:$0xf0]  ;;  %v6487_v37 = vld [vmem:[%s10068_s1 + $0x354] sm:$0xf]  ;;  %v4756_v41 = vor.u32 %v6490_v32, %v4755_v30  ;;  %v4503_v43 = vld [vmem:[%s10068_s1 + $0x158] sm:$0xf] }
  0x19   :  { %773 = vmatpush.bf16.msra.mxu1 %v4608_v5  ;;  %v4757_v38 = vld [vmem:[%s10068_s1 + $0x36c] sm:$0xf0]  ;;  %v4536_v42 = vor.u32 %v6431_v33, %v4533_v34  ;;  %v6427_v44 = vld [vmem:[%s10068_s1 + $0x170] sm:$0xf0]  ;;  %v4727_v45 = vld [vmem:[%s10068_s1 + $0x318] sm:$0xf] }
  0x1a   :  { %786 = vmatpush.bf16.msra.mxu2 %v4388_v6  ;;  %v4760_v46 = vor.u32 %v6487_v37, %v4757_v38  ;;  %v6483_v47 = vld [vmem:[%s10068_s1 + $0x330] sm:$0xf0]  ;;  %v6424_v48 = vld [vmem:[%s10068_s1 + $0x15c] sm:$0xf]  ;;  %v4505_v49 = vld [vmem:[%s10068_s1 + $0x174] sm:$0xf0]  ;;  %v4504_v53 = vor.u32 %v6427_v44, %v4503_v43 }
  0x1b   :  { %799 = vmatpush.bf16.msra.mxu3 %v4612_v10  ;;  %v6480_v50 = vld [vmem:[%s10068_s1 + $0x31c] sm:$0xf]  ;;  %v4729_v51 = vld [vmem:[%s10068_s1 + $0x334] sm:$0xf0]  ;;  %v27_v52 = vld [vmem:[%s10069_s0] sm:$0xff]  ;;  %v4728_v56 = vor.u32 %v6483_v47, %v4727_v45  ;;  %v4508_v57 = vor.u32 %v6424_v48, %v4505_v49 }
  0x1c   :  { %761 = vmatpush.bf16.msra.mxu0 %v4356_v16  ;;  %v173_v54 = vunpack.c.l.b16 %v27_v52  ;;  %v174_v55 = vunpack.c.h.b16 %v27_v52  ;;  %v4475_v58 = vld [vmem:[%s10068_s1 + $0x120] sm:$0xf]  ;;  %v6420_v59 = vld [vmem:[%s10068_s1 + $0x138] sm:$0xf0]  ;;  %v4732_v61 = vor.u32 %v6480_v50, %v4729_v51  ;;  %v6417_v63 = vld [vmem:[%s10068_s1 + $0x124] sm:$0xf] }
  0x1d   :  { %774 = vmatpush.bf16.msra.mxu1 %v4580_v19  ;;  %v4699_v60 = vld [vmem:[%s10068_s1 + $0x2e0] sm:$0xf]  ;;  %v6476_v62 = vld [vmem:[%s10068_s1 + $0x2f8] sm:$0xf0]  ;;  %v6473_v2 = vld [vmem:[%s10068_s1 + $0x2e4] sm:$0xf]  ;;  %v4476_v5 = vor.u32 %v6420_v59, %v4475_v58 }
  0x1e   :  { %787 = vmatpush.bf16.msra.mxu2 %v4360_v20  ;;  %v4477_v0 = vld [vmem:[%s10068_s1 + $0x13c] sm:$0xf0]  ;;  %v7196_v1 = vpack.c.b16 %v173_v54, %v173_v54  ;;  %v7204_v4 = vpack.c.b16 %v174_v55, %v174_v55  ;;  %v4700_v6 = vor.u32 %v6476_v62, %v4699_v60  ;;  %v4447_v8 = vld [vmem:[%s10068_s1 + $0xe8] sm:$0xf]  ;;  %v6413_v9 = vld [vmem:[%s10068_s1 + $0x100] sm:$0xf0] }
  0x1f   :  { %800 = vmatpush.bf16.msra.mxu3 %v4584_v24  ;;  %v4701_v3 = vld [vmem:[%s10068_s1 + $0x2fc] sm:$0xf0]  ;;  %v4480_v7 = vor.u32 %v6417_v63, %v4477_v0  ;;  %v4671_v10 = vld [vmem:[%s10068_s1 + $0x2a8] sm:$0xf]  ;;  %v6469_v12 = vld [vmem:[%s10068_s1 + $0x2c0] sm:$0xf0]  ;;  %v4448_v17 = vor.u32 %v6413_v9, %v4447_v8 }
  0x20   :  { %762 = vmatpush.bf16.msra.mxu0 %v4328_v31  ;;  %v4704_v11 = vor.u32 %v6473_v2, %v4701_v3  ;;  %v6410_v13 = vld [vmem:[%s10068_s1 + $0xec] sm:$0xf]  ;;  %v4449_v14 = vld [vmem:[%s10068_s1 + $0x104] sm:$0xf0]  ;;  %v4672_v18 = vor.u32 %v6469_v12, %v4671_v10  ;;  %v4419_v20 = vld [vmem:[%s10068_s1 + $0xb0] sm:$0xf] }
  0x21   :  { %775 = vmatpush.bf16.msra.mxu1 %v4552_v35  ;;  %v6466_v15 = vld [vmem:[%s10068_s1 + $0x2ac] sm:$0xf]  ;;  %v4673_v16 = vld [vmem:[%s10068_s1 + $0x2c4] sm:$0xf0]  ;;  %v4452_v19 = vor.u32 %v6410_v13, %v4449_v14  ;;  %v4643_v22 = vld [vmem:[%s10068_s1 + $0x270] sm:$0xf] }
  0x22   :  { %788 = vmatpush.bf16.msra.mxu2 %v4332_v36  ;;  %v6406_v21 = vld [vmem:[%s10068_s1 + $0xc8] sm:$0xf0]  ;;  %v4676_v23 = vor.u32 %v6466_v15, %v4673_v16  ;;  %v6403_v25 = vld [vmem:[%s10068_s1 + $0xb4] sm:$0xf]  ;;  %v4421_v26 = vld [vmem:[%s10068_s1 + $0xcc] sm:$0xf0] }
  0x23   :  { %801 = vmatpush.bf16.msra.mxu3 %v4556_v39  ;;  %763 = vmatmul.bf16.vlgmr.msra.gmra.mxu0 %v7196_v1  ;;  %v6462_v24 = vld [vmem:[%s10068_s1 + $0x288] sm:$0xf0]  ;;  %v6459_v27 = vld [vmem:[%s10068_s1 + $0x274] sm:$0xf]  ;;  %v4645_v28 = vld [vmem:[%s10068_s1 + $0x28c] sm:$0xf0]  ;;  %v4420_v29 = vor.u32 %v6406_v21, %v4419_v20  ;;  %v4424_v31 = vor.u32 %v6403_v25, %v4421_v26 }
  0x24   :  { %807 = vmatpush.bf16.msrb.mxu0 %v4532_v40  ;;  %776 = vmatmul.bf16.vlgmr.msra.gmra.mxu1 %v7204_v4  ;;  %v4644_v30 = vor.u32 %v6462_v24, %v4643_v22  ;;  %v4391_v32 = vld [vmem:[%s10068_s1 + $0x78] sm:$0xf]  ;;  %v6399_v33 = vld [vmem:[%s10068_s1 + $0x90] sm:$0xf0]  ;;  %v4648_v35 = vor.u32 %v6459_v27, %v4645_v28  ;;  %v6396_v37 = vld [vmem:[%s10068_s1 + $0x7c] sm:$0xf] }
  0x25   :  { %820 = vmatpush.bf16.msrb.mxu1 %v4756_v41  ;;  %789 = vmatmul.bf16.vlgmr.msra.gmra.mxu2 %v7196_v1  ;;  %v4615_v34 = vld [vmem:[%s10068_s1 + $0x238] sm:$0xf]  ;;  %v6455_v36 = vld [vmem:[%s10068_s1 + $0x250] sm:$0xf0]  ;;  %v6452_v39 = vld [vmem:[%s10068_s1 + $0x23c] sm:$0xf]  ;;  %v4392_v41 = vor.u32 %v6399_v33, %v4391_v32 }
  0x26   :  { %833 = vmatpush.bf16.msrb.mxu2 %v4536_v42  ;;  %802 = vmatmul.bf16.vlgmr.msra.gmra.mxu3 %v7204_v4  ;;  %v4393_v38 = vld [vmem:[%s10068_s1 + $0x94] sm:$0xf0]  ;;  %v4616_v42 = vor.u32 %v6455_v36, %v4615_v34  ;;  %v4363_v44 = vld [vmem:[%s10068_s1 + $0x40] sm:$0xf]  ;;  %v6392_v45 = vld [vmem:[%s10068_s1 + $0x58] sm:$0xf0] }
  0x27   :  { %846 = vmatpush.bf16.msrb.mxu3 %v4760_v46  ;;  %v4617_v40 = vld [vmem:[%s10068_s1 + $0x254] sm:$0xf0]  ;;  %v4396_v43 = vor.u32 %v6396_v37, %v4393_v38  ;;  %v4587_v46 = vld [vmem:[%s10068_s1 + $0x200] sm:$0xf]  ;;  %v6448_v48 = vld [vmem:[%s10068_s1 + $0x218] sm:$0xf0] }
  0x28   :  { %808 = vmatpush.bf16.msrb.mxu0 %v4504_v53  ;;  %v4620_v47 = vor.u32 %v6452_v39, %v4617_v40  ;;  %v6389_v49 = vld [vmem:[%s10068_s1 + $0x44] sm:$0xf]  ;;  %v4365_v50 = vld [vmem:[%s10068_s1 + $0x5c] sm:$0xf0]  ;;  %v4364_v53 = vor.u32 %v6392_v45, %v4363_v44  ;;  %v4335_v54 = vld [vmem:[%s10068_s1 + $0x8] sm:$0xf] }
  0x29   :  { %821 = vmatpush.bf16.msrb.mxu1 %v4728_v56  ;;  %v6445_v51 = vld [vmem:[%s10068_s1 + $0x204] sm:$0xf]  ;;  %v4589_v52 = vld [vmem:[%s10068_s1 + $0x21c] sm:$0xf0]  ;;  %v4588_v56 = vor.u32 %v6448_v48, %v4587_v46  ;;  %v4559_v58 = vld [vmem:[%s10068_s1 + $0x1c8] sm:$0xf] }
  0x2a   :  { %834 = vmatpush.bf16.msrb.mxu2 %v4508_v57  ;;  %v6385_v55 = vld [vmem:[%s10068_s1 + $0x20] sm:$0xf0]  ;;  %v4368_v57 = vor.u32 %v6389_v49, %v4365_v50  ;;  %v6382_v60 = vld [vmem:[%s10068_s1 + $0xc] sm:$0xf]  ;;  %v4337_v62 = vld [vmem:[%s10068_s1 + $0x24] sm:$0xf0] }
  0x2b   :  { %847 = vmatpush.bf16.msrb.mxu3 %v4732_v61  ;;  %v6441_v59 = vld [vmem:[%s10068_s1 + $0x1e0] sm:$0xf0]  ;;  %v4592_v61 = vor.u32 %v6445_v51, %v4589_v52  ;;  %v6438_v63 = vld [vmem:[%s10068_s1 + $0x1cc] sm:$0xf]  ;;  %v4561_v0 = vld [vmem:[%s10068_s1 + $0x1e4] sm:$0xf0] }
  0x2c   :  { %809 = vmatpush.bf16.msrb.mxu0 %v4476_v5  ;;  %v4539_v2 = vld [vmem:[%s10068_s1 + $0x198] sm:$0xf]  ;;  %v6435_v3 = vld [vmem:[%s10068_s1 + $0x1b0] sm:$0xf0]  ;;  %v6432_v8 = vld [vmem:[%s10068_s1 + $0x19c] sm:$0xf]  ;;  %v4560_v10 = vor.u32 %v6441_v59, %v4559_v58  ;;  %v4564_v14 = vor.u32 %v6438_v63, %v4561_v0 }
  0x2d   :  { %822 = vmatpush.bf16.msrb.mxu1 %v4700_v6  ;;  %v4763_v5 = vld [vmem:[%s10068_s1 + $0x358] sm:$0xf]  ;;  %v4336_v6 = vor.u32 %v6385_v55, %v4335_v54  ;;  %v6488_v12 = vld [vmem:[%s10068_s1 + $0x35c] sm:$0xf]  ;;  %v4540_v15 = vor.u32 %v6435_v3, %v4539_v2  ;;  %v4735_v20 = vld [vmem:[%s10068_s1 + $0x320] sm:$0xf] }
  0x2e   :  { %835 = vmatpush.bf16.msrb.mxu2 %v4480_v7  ;;  %v6491_v7 = vld [vmem:[%s10068_s1 + $0x370] sm:$0xf0]  ;;  %v4541_v9 = vld [vmem:[%s10068_s1 + $0x1b4] sm:$0xf0]  ;;  %v6484_v22 = vld [vmem:[%s10068_s1 + $0x338] sm:$0xf0] }
  0x2f   :  { %848 = vmatpush.bf16.msrb.mxu3 %v4704_v11  ;;  %v4340_v11 = vor.u32 %v6382_v60, %v4337_v62  ;;  %v4765_v13 = vld [vmem:[%s10068_s1 + $0x374] sm:$0xf0]  ;;  %v4764_v16 = vor.u32 %v6491_v7, %v4763_v5  ;;  %v4513_v24 = vld [vmem:[%s10068_s1 + $0x17c] sm:$0xf0]  ;;  %v6481_v25 = vld [vmem:[%s10068_s1 + $0x324] sm:$0xf]  ;;  %v4736_v28 = vor.u32 %v6484_v22, %v4735_v20 }
  0x30   :  { %810 = vmatpush.bf16.msrb.mxu0 %v4448_v17  ;;  %v4544_v17 = vor.u32 %v6432_v8, %v4541_v9  ;;  %v4768_v21 = vor.u32 %v6488_v12, %v4765_v13  ;;  %v4737_v26 = vld [vmem:[%s10068_s1 + $0x33c] sm:$0xf0]  ;;  %v4707_v32 = vld [vmem:[%s10068_s1 + $0x2e8] sm:$0xf]  ;;  %v6477_v34 = vld [vmem:[%s10068_s1 + $0x300] sm:$0xf0] }
  0x31   :  { %823 = vmatpush.bf16.msrb.mxu1 %v4672_v18  ;;  %v4511_v18 = vld [vmem:[%s10068_s1 + $0x160] sm:$0xf]  ;;  %v4740_v33 = vor.u32 %v6481_v25, %v4737_v26  ;;  %v4485_v36 = vld [vmem:[%s10068_s1 + $0x144] sm:$0xf0]  ;;  %v6474_v37 = vld [vmem:[%s10068_s1 + $0x2ec] sm:$0xf]  ;;  %v4708_v40 = vor.u32 %v6477_v34, %v4707_v32 }
  0x32   :  { %836 = vmatpush.bf16.msrb.mxu2 %v4452_v19  ;;  %v6428_v19 = vld [vmem:[%s10068_s1 + $0x178] sm:$0xf0]  ;;  %v4709_v38 = vld [vmem:[%s10068_s1 + $0x304] sm:$0xf0]  ;;  %v4679_v44 = vld [vmem:[%s10068_s1 + $0x2b0] sm:$0xf] }
  0x33   :  { %849 = vmatpush.bf16.msrb.mxu3 %v4676_v23  ;;  %v6425_v23 = vld [vmem:[%s10068_s1 + $0x164] sm:$0xf]  ;;  %v4512_v27 = vor.u32 %v6428_v19, %v4511_v18  ;;  %v4712_v45 = vor.u32 %v6474_v37, %v4709_v38  ;;  %v6470_v46 = vld [vmem:[%s10068_s1 + $0x2c8] sm:$0xf0]  ;;  %v4457_v48 = vld [vmem:[%s10068_s1 + $0x10c] sm:$0xf0] }
  0x34   :  { %811 = vmatpush.bf16.msrb.mxu0 %v4420_v29  ;;  %v4516_v29 = vor.u32 %v6425_v23, %v4513_v24  ;;  %v6467_v49 = vld [vmem:[%s10068_s1 + $0x2b4] sm:$0xf]  ;;  %v4681_v50 = vld [vmem:[%s10068_s1 + $0x2cc] sm:$0xf0]  ;;  %v4680_v52 = vor.u32 %v6470_v46, %v4679_v44  ;;  %v4427_v54 = vld [vmem:[%s10068_s1 + $0xb8] sm:$0xf] }
  0x35   :  { %824 = vmatpush.bf16.msrb.mxu1 %v4644_v30  ;;  %v4483_v30 = vld [vmem:[%s10068_s1 + $0x128] sm:$0xf]  ;;  %v6407_v55 = vld [vmem:[%s10068_s1 + $0xd0] sm:$0xf0]  ;;  %v6404_v59 = vld [vmem:[%s10068_s1 + $0xbc] sm:$0xf] }
  0x36   :  { %837 = vmatpush.bf16.msrb.mxu2 %v4424_v31  ;;  %v6421_v31 = vld [vmem:[%s10068_s1 + $0x140] sm:$0xf0]  ;;  %v6463_v58 = vld [vmem:[%s10068_s1 + $0x290] sm:$0xf0]  ;;  %v4429_v60 = vld [vmem:[%s10068_s1 + $0xd4] sm:$0xf0]  ;;  %v4428_v63 = vor.u32 %v6407_v55, %v4427_v54 }
  0x37   :  { %850 = vmatpush.bf16.msrb.mxu3 %v4648_v35  ;;  %v6418_v35 = vld [vmem:[%s10068_s1 + $0x12c] sm:$0xf]  ;;  %v4484_v39 = vor.u32 %v6421_v31, %v4483_v30  ;;  %v4653_v62 = vld [vmem:[%s10068_s1 + $0x294] sm:$0xf0]  ;;  %v4432_v2 = vor.u32 %v6404_v59, %v4429_v60  ;;  %v4399_v3 = vld [vmem:[%s10068_s1 + $0x80] sm:$0xf] }
  0x38   :  { %812 = vmatpush.bf16.msrb.mxu0 %v4392_v41  ;;  %v4488_v41 = vor.u32 %v6418_v35, %v4485_v36  ;;  %v6400_v5 = vld [vmem:[%s10068_s1 + $0x98] sm:$0xf0]  ;;  %v6397_v9 = vld [vmem:[%s10068_s1 + $0x84] sm:$0xf]  ;;  %v4625_v12 = vld [vmem:[%s10068_s1 + $0x25c] sm:$0xf0] }
  0x39   :  { %825 = vmatpush.bf16.msrb.mxu1 %v4616_v42  ;;  %v4455_v42 = vld [vmem:[%s10068_s1 + $0xf0] sm:$0xf]  ;;  %v6456_v8 = vld [vmem:[%s10068_s1 + $0x258] sm:$0xf0]  ;;  %v4400_v13 = vor.u32 %v6400_v5, %v4399_v3  ;;  %v4595_v18 = vld [vmem:[%s10068_s1 + $0x208] sm:$0xf] }
  0x3a   :  { %838 = vmatpush.bf16.msrb.mxu2 %v4396_v43  ;;  %v6414_v43 = vld [vmem:[%s10068_s1 + $0x108] sm:$0xf0]  ;;  %v6449_v20 = vld [vmem:[%s10068_s1 + $0x220] sm:$0xf0]  ;;  %v4373_v22 = vld [vmem:[%s10068_s1 + $0x64] sm:$0xf0] }
  0x3b   :  { %851 = vmatpush.bf16.msrb.mxu3 %v4620_v47  ;;  %v6411_v47 = vld [vmem:[%s10068_s1 + $0xf4] sm:$0xf]  ;;  %v4456_v51 = vor.u32 %v6414_v43, %v4455_v42  ;;  %v6446_v23 = vld [vmem:[%s10068_s1 + $0x20c] sm:$0xf]  ;;  %v4597_v24 = vld [vmem:[%s10068_s1 + $0x224] sm:$0xf0] }
  0x3c   :  { %813 = vmatpush.bf16.msrb.mxu0 %v4364_v53  ;;  %v4460_v53 = vor.u32 %v6411_v47, %v4457_v48  ;;  %v4343_v26 = vld [vmem:[%s10068_s1 + $0x10] sm:$0xf]  ;;  %v6442_v31 = vld [vmem:[%s10068_s1 + $0x1e8] sm:$0xf0]  ;;  %v4600_v32 = vor.u32 %v6446_v23, %v4597_v24  ;;  %v6439_v35 = vld [vmem:[%s10068_s1 + $0x1d4] sm:$0xf] }
  0x3d   :  { %826 = vmatpush.bf16.msrb.mxu1 %v4588_v56  ;;  %v4651_v56 = vld [vmem:[%s10068_s1 + $0x278] sm:$0xf]  ;;  %v4567_v30 = vld [vmem:[%s10068_s1 + $0x1d0] sm:$0xf]  ;;  %v4547_v37 = vld [vmem:[%s10068_s1 + $0x1a0] sm:$0xf] }
  0x3e   :  { %839 = vmatpush.bf16.msrb.mxu2 %v4368_v57  ;;  %v4684_v57 = vor.u32 %v6467_v49, %v4681_v50  ;;  %v4652_v0 = vor.u32 %v6463_v58, %v4651_v56  ;;  %v4345_v34 = vld [vmem:[%s10068_s1 + $0x2c] sm:$0xf0]  ;;  %v6436_v38 = vld [vmem:[%s10068_s1 + $0x1b8] sm:$0xf0]  ;;  %v4568_v42 = vor.u32 %v6442_v31, %v4567_v30  ;;  %v4519_v47 = vld [vmem:[%s10068_s1 + $0x168] sm:$0xf] }
  0x3f   :  { %852 = vmatpush.bf16.msrb.mxu3 %v4592_v61  ;;  %v6460_v61 = vld [vmem:[%s10068_s1 + $0x27c] sm:$0xf]  ;;  %v4569_v36 = vld [vmem:[%s10068_s1 + $0x1ec] sm:$0xf0]  ;;  %v6429_v48 = vld [vmem:[%s10068_s1 + $0x180] sm:$0xf0] }
  0x40   :  { %814 = vmatpush.bf16.msrb.mxu0 %v4336_v6  ;;  %v4623_v6 = vld [vmem:[%s10068_s1 + $0x240] sm:$0xf]  ;;  %v4656_v7 = vor.u32 %v6460_v61, %v4653_v62  ;;  %v4572_v44 = vor.u32 %v6439_v35, %v4569_v36  ;;  %v4743_v49 = vld [vmem:[%s10068_s1 + $0x328] sm:$0xf]  ;;  %v6485_v50 = vld [vmem:[%s10068_s1 + $0x340] sm:$0xf0] }
  0x41   :  { %827 = vmatpush.bf16.msrb.mxu1 %v4560_v10  ;;  %v4401_v10 = vld [vmem:[%s10068_s1 + $0x9c] sm:$0xf0]  ;;  %v6545_v54 = vld [vmem:[%s10070_s3 + $0x1a0] sm:$0xf0]  ;;  %v4744_v55 = vor.u32 %v6485_v50, %v4743_v49  ;;  %v6422_v56 = vld [vmem:[%s10068_s1 + $0x148] sm:$0xf0] }
  0x42   :  { %840 = vmatpush.bf16.msrb.mxu2 %v4340_v11  ;;  %v6453_v11 = vld [vmem:[%s10068_s1 + $0x244] sm:$0xf]  ;;  %v4943_v58 = vld [vmem:[%s10070_s3 + $0x150] sm:$0xf]  ;;  %v6538_v59 = vld [vmem:[%s10070_s3 + $0x168] sm:$0xf0] }
  0x43   :  { %853 = vmatpush.bf16.msrb.mxu3 %v4564_v14  ;;  %815 = vmatmul.bf16.vlgmr.msrb.gmra.mxu0 %v7196_v1  ;;  %v4624_v14 = vor.u32 %v6456_v8, %v4623_v6  ;;  %v4628_v19 = vor.u32 %v6453_v11, %v4625_v12  ;;  %v4715_v60 = vld [vmem:[%s10068_s1 + $0x2f0] sm:$0xf]  ;;  %v6478_v61 = vld [vmem:[%s10068_s1 + $0x308] sm:$0xf0]  ;;  %v4944_v62 = vor.u32 %v6538_v59, %v4943_v58  ;;  %v4463_v5 = vld [vmem:[%s10068_s1 + $0xf8] sm:$0xf] }
  0x44   :  { %859 = vmatpush.bf16.msra.mxu0 %v4540_v15  ;;  %828 = vmatmul.bf16.vlgmr.msrb.gmra.mxu1 %v7204_v4  ;;  %v4404_v15 = vor.u32 %v6397_v9, %v4401_v10  ;;  %v4716_v3 = vor.u32 %v6478_v61, %v4715_v60  ;;  %v6415_v6 = vld [vmem:[%s10068_s1 + $0x110] sm:$0xf0]  ;;  %v4887_v11 = vld [vmem:[%s10070_s3 + $0xe0] sm:$0xf]  ;;  %v6524_v12 = vld [vmem:[%s10070_s3 + $0xf8] sm:$0xf0] }
  0x45   :  { %872 = vmatpush.bf16.msra.mxu1 %v4764_v16  ;;  %841 = vmatmul.bf16.vlgmr.msrb.gmra.mxu2 %v7196_v1  ;;  %v4371_v16 = vld [vmem:[%s10068_s1 + $0x48] sm:$0xf]  ;;  %v6471_v8 = vld [vmem:[%s10068_s1 + $0x2d0] sm:$0xf0]  ;;  %v4464_v10 = vor.u32 %v6415_v6, %v4463_v5  ;;  %v6401_v24 = vld [vmem:[%s10068_s1 + $0xa0] sm:$0xf0] }
  0x46   :  { %885 = vmatpush.bf16.msra.mxu2 %v4544_v17  ;;  %854 = vmatmul.bf16.vlgmr.msrb.gmra.mxu3 %v7204_v4  ;;  %v6393_v17 = vld [vmem:[%s10068_s1 + $0x60] sm:$0xf0]  ;;  %v4407_v23 = vld [vmem:[%s10068_s1 + $0x88] sm:$0xf]  ;;  %v6510_v30 = vld [vmem:[%s10070_s3 + $0x88] sm:$0xf0] }
  0x47   :  { %898 = vmatpush.bf16.msra.mxu3 %v4768_v21  ;;  %v6390_v21 = vld [vmem:[%s10068_s1 + $0x4c] sm:$0xf]  ;;  %v4372_v25 = vor.u32 %v6393_v17, %v4371_v16  ;;  %v4659_v16 = vld [vmem:[%s10068_s1 + $0x280] sm:$0xf]  ;;  %v6464_v17 = vld [vmem:[%s10068_s1 + $0x298] sm:$0xf0] }
  0x48   :  { %860 = vmatpush.bf16.msra.mxu0 %v4512_v27  ;;  %v4596_v27 = vor.u32 %v6449_v20, %v4595_v18  ;;  %v4888_v18 = vor.u32 %v6524_v12, %v4887_v11  ;;  %v4859_v20 = vld [vmem:[%s10070_s3 + $0xa8] sm:$0xf]  ;;  %v6450_v35 = vld [vmem:[%s10068_s1 + $0x228] sm:$0xf0]  ;;  %v4351_v36 = vld [vmem:[%s10068_s1 + $0x18] sm:$0xf] }
  0x49   :  { %873 = vmatpush.bf16.msra.mxu1 %v4736_v28  ;;  %v4376_v28 = vor.u32 %v6390_v21, %v4373_v22  ;;  %v6517_v21 = vld [vmem:[%s10070_s3 + $0xc0] sm:$0xf0]  ;;  %v4660_v22 = vor.u32 %v6464_v17, %v4659_v16  ;;  %v5643_v49 = vld [vmem:[%s10070_s3 + $0x6c8] sm:$0xf]  ;;  %v5391_v60 = vld [vmem:[%s10070_s3 + $0x4d0] sm:$0xf] }
  0x4a   :  { %886 = vmatpush.bf16.msra.mxu2 %v4516_v29  ;;  %v6386_v29 = vld [vmem:[%s10068_s1 + $0x28] sm:$0xf0]  ;;  %v6713_v50 = vld [vmem:[%s10070_s3 + $0x6e0] sm:$0xf0]  ;;  %v5867_v58 = vld [vmem:[%s10070_s3 + $0x888] sm:$0xf] }
  0x4b   :  { %899 = vmatpush.bf16.msra.mxu3 %v4740_v33  ;;  %v6383_v33 = vld [vmem:[%s10068_s1 + $0x14] sm:$0xf]  ;;  %v6769_v59 = vld [vmem:[%s10070_s3 + $0x8a0] sm:$0xf0]  ;;  %v6650_v61 = vld [vmem:[%s10070_s3 + $0x4e8] sm:$0xf0] }
  0x4c   :  { %861 = vmatpush.bf16.msra.mxu0 %v4484_v39  ;;  %v4344_v39 = vor.u32 %v6386_v29, %v4343_v26  ;;  %v4348_v43 = vor.u32 %v6383_v33, %v4345_v34  ;;  %v6457_v26 = vld [vmem:[%s10068_s1 + $0x260] sm:$0xf0]  ;;  %v4831_v29 = vld [vmem:[%s10070_s3 + $0x70] sm:$0xf]  ;;  %v6394_v33 = vld [vmem:[%s10068_s1 + $0x68] sm:$0xf0]  ;;  %v5868_v6 = vor.u32 %v6769_v59, %v5867_v58 }
  0x4d   :  { %874 = vmatpush.bf16.msra.mxu1 %v4708_v40  ;;  %v4771_v40 = vld [vmem:[%s10068_s1 + $0x360] sm:$0xf]  ;;  %v4603_v34 = vld [vmem:[%s10068_s1 + $0x210] sm:$0xf]  ;;  %v6594_v5 = vld [vmem:[%s10070_s3 + $0x328] sm:$0xf0] }
  0x4e   :  { %887 = vmatpush.bf16.msra.mxu2 %v4488_v41  ;;  %v6492_v41 = vld [vmem:[%s10068_s1 + $0x378] sm:$0xf0]  ;;  %v5587_v12 = vld [vmem:[%s10070_s3 + $0x658] sm:$0xf]  ;;  %v5559_v17 = vld [vmem:[%s10070_s3 + $0x620] sm:$0xf] }
  0x4f   :  { %900 = vmatpush.bf16.msra.mxu3 %v4712_v45  ;;  %v4548_v45 = vor.u32 %v6436_v38, %v4547_v37  ;;  %v4772_v46 = vor.u32 %v6492_v41, %v4771_v40  ;;  %v4832_v37 = vor.u32 %v6510_v30, %v4831_v29  ;;  %v4803_v40 = vld [vmem:[%s10070_s3 + $0x38] sm:$0xf]  ;;  %v6503_v41 = vld [vmem:[%s10070_s3 + $0x50] sm:$0xf0]  ;;  %v6622_v29 = vld [vmem:[%s10070_s3 + $0x408] sm:$0xf0] }
  0x50   :  { %862 = vmatpush.bf16.msra.mxu0 %v4456_v51  ;;  %v4520_v51 = vor.u32 %v6429_v48, %v4519_v47  ;;  %v6657_v47 = vld [vmem:[%s10070_s3 + $0x520] sm:$0xf0]  ;;  %v6748_v58 = vld [vmem:[%s10070_s3 + $0x7f8] sm:$0xf0]  ;;  %v4973_v59 = vld [vmem:[%s10070_s3 + $0x1a4] sm:$0xf0] }
  0x51   :  { %875 = vmatpush.bf16.msra.mxu1 %v4680_v52  ;;  %v4491_v52 = vld [vmem:[%s10068_s1 + $0x130] sm:$0xf]  ;;  %v6601_v48 = vld [vmem:[%s10070_s3 + $0x360] sm:$0xf0] }
  0x52   :  { %888 = vmatpush.bf16.msra.mxu2 %v4460_v53  ;;  %v4971_v53 = vld [vmem:[%s10070_s3 + $0x188] sm:$0xf] }
  0x53   :  { %901 = vmatpush.bf16.msra.mxu3 %v4684_v57  ;;  %v4972_v57 = vor.u32 %v6545_v54, %v4971_v53  ;;  %v4775_v54 = vld [vmem:[%s10070_s3] sm:$0xf] }
  0x54   :  { %863 = vmatpush.bf16.msra.mxu0 %v4428_v63  ;;  %v4492_v63 = vor.u32 %v6422_v56, %v4491_v52 }
  0x55   :  { %876 = vmatpush.bf16.msra.mxu1 %v4652_v0  ;;  %v4915_v0 = vld [vmem:[%s10070_s3 + $0x118] sm:$0xf] }
  0x56   :  { %889 = vmatpush.bf16.msra.mxu2 %v4432_v2  ;;  %v6531_v2 = vld [vmem:[%s10070_s3 + $0x130] sm:$0xf0] }
  0x57   :  { %902 = vmatpush.bf16.msra.mxu3 %v4656_v7  ;;  %v4687_v7 = vld [vmem:[%s10068_s1 + $0x2b8] sm:$0xf]  ;;  %v4916_v9 = vor.u32 %v6531_v2, %v4915_v0  ;;  %v6706_v0 = vld [vmem:[%s10070_s3 + $0x6a8] sm:$0xf0] }
  0x58   :  { %864 = vmatpush.bf16.msra.mxu0 %v4400_v13  ;;  %v4688_v13 = vor.u32 %v6471_v8, %v4687_v7  ;;  %v5392_v8 = vor.u32 %v6650_v61, %v5391_v60  ;;  %v5083_v61 = vld [vmem:[%s10070_s3 + $0x268] sm:$0xf] }
  0x59   :  { %877 = vmatpush.bf16.msra.mxu1 %v4624_v14  ;;  %v4435_v14 = vld [vmem:[%s10068_s1 + $0xc0] sm:$0xf] }
  0x5a   :  { %890 = vmatpush.bf16.msra.mxu2 %v4404_v15  ;;  %v6408_v15 = vld [vmem:[%s10068_s1 + $0xd8] sm:$0xf0] }
  0x5b   :  { %903 = vmatpush.bf16.msra.mxu3 %v4628_v19  ;;  %v4436_v19 = vor.u32 %v6408_v15, %v4435_v14  ;;  %v5335_v15 = vld [vmem:[%s10070_s3 + $0x460] sm:$0xf] }
  0x5c   :  { %865 = vmatpush.bf16.msra.mxu0 %v4372_v25  ;;  %v4631_v25 = vld [vmem:[%s10068_s1 + $0x248] sm:$0xf] }
  0x5d   :  { %878 = vmatpush.bf16.msra.mxu1 %v4596_v27  ;;  %v4860_v27 = vor.u32 %v6517_v21, %v4859_v20  ;;  %v4632_v31 = vor.u32 %v6457_v26, %v4631_v25  ;;  %v6629_v20 = vld [vmem:[%s10070_s3 + $0x440] sm:$0xf0]  ;;  %v6762_v25 = vld [vmem:[%s10070_s3 + $0x868] sm:$0xf0] }
  0x5e   :  { %891 = vmatpush.bf16.msra.mxu2 %v4376_v28  ;;  %v4408_v28 = vor.u32 %v6401_v24, %v4407_v23  ;;  %v6685_v23 = vld [vmem:[%s10070_s3 + $0x600] sm:$0xf0]  ;;  %v5839_v24 = vld [vmem:[%s10070_s3 + $0x850] sm:$0xf] }
  0x5f   :  { %904 = vmatpush.bf16.msra.mxu3 %v4600_v32  ;;  %v4379_v32 = vld [vmem:[%s10068_s1 + $0x50] sm:$0xf] }
  0x60   :  { %866 = vmatpush.bf16.msra.mxu0 %v4344_v39  ;;  %v4380_v38 = vor.u32 %v6394_v33, %v4379_v32  ;;  %v6387_v39 = vld [vmem:[%s10068_s1 + $0x30] sm:$0xf0]  ;;  %v6678_v32 = vld [vmem:[%s10070_s3 + $0x5c8] sm:$0xf0] }
  0x61   :  { %879 = vmatpush.bf16.msra.mxu1 %v4568_v42  ;;  %v4604_v42 = vor.u32 %v6450_v35, %v4603_v34  ;;  %v4352_v53 = vor.u32 %v6387_v39, %v4351_v36  ;;  %v5251_v34 = vld [vmem:[%s10070_s3 + $0x3b8] sm:$0xf]  ;;  %v6615_v35 = vld [vmem:[%s10070_s3 + $0x3d0] sm:$0xf0] }
  0x62   :  { %892 = vmatpush.bf16.msra.mxu2 %v4348_v43  ;;  %v4575_v43 = vld [vmem:[%s10068_s1 + $0x1d8] sm:$0xf]  ;;  %v6587_v39 = vld [vmem:[%s10070_s3 + $0x2f0] sm:$0xf0] }
  0x63   :  { %905 = vmatpush.bf16.msra.mxu3 %v4572_v44  ;;  %867 = vmatmul.bf16.vlgmr.msra.gmra.mxu0 %v7196_v1  ;;  %v6443_v44 = vld [vmem:[%s10068_s1 + $0x1f0] sm:$0xf0] }
  0x64   :  { %911 = vmatpush.bf16.msrb.mxu0 %v4548_v45  ;;  %880 = vmatmul.bf16.vlgmr.msra.gmra.mxu1 %v7204_v4  ;;  %v5195_v45 = vld [vmem:[%s10070_s3 + $0x348] sm:$0xf]  ;;  %v4576_v56 = vor.u32 %v6443_v44, %v4575_v43  ;;  %v6755_v43 = vld [vmem:[%s10070_s3 + $0x830] sm:$0xf0]  ;;  %v5223_v44 = vld [vmem:[%s10070_s3 + $0x380] sm:$0xf] }
  0x65   :  { %924 = vmatpush.bf16.msrb.mxu1 %v4772_v46  ;;  %893 = vmatmul.bf16.vlgmr.msra.gmra.mxu2 %v7196_v1  ;;  %v5419_v46 = vld [vmem:[%s10070_s3 + $0x508] sm:$0xf]  ;;  %v5196_v52 = vor.u32 %v6601_v48, %v5195_v45  ;;  %v6608_v45 = vld [vmem:[%s10070_s3 + $0x398] sm:$0xf0]  ;;  %v6710_v48 = vld [vmem:[%s10070_s3 + $0x6cc] sm:$0xf] }
  0x66   :  { %906 = vmatmul.bf16.vlgmr.msra.gmra.mxu3 %v7204_v4  ;;  %3171 = vmatpush.bf16.msrb.mxu2 %v4972_v57  ;;  %v5420_v57 = vor.u32 %v6657_v47, %v5419_v46  ;;  %v5252_v47 = vor.u32 %v6615_v35, %v5251_v34  ;;  %v6682_v34 = vld [vmem:[%s10070_s3 + $0x5ec] sm:$0xf]  ;;  %v5533_v35 = vld [vmem:[%s10070_s3 + $0x604] sm:$0xf0] }
  0x67   :  { %3184 = vmatpush.bf16.msrb.mxu3 %v5196_v52 }
  0x68   :  { %912 = vmatpush.bf16.msrb.mxu0 %v4520_v51  ;;  %v4804_v51 = vor.u32 %v6503_v41, %v4803_v40  ;;  %v6671_v40 = vld [vmem:[%s10070_s3 + $0x590] sm:$0xf0] }
  0x69   :  { %925 = vmatpush.bf16.msrb.mxu1 %v4744_v55  ;;  %v6496_v55 = vld [vmem:[%s10070_s3 + $0x18] sm:$0xf0] }
  0x6a   :  { %3172 = vmatpush.bf16.msrb.mxu2 %v4944_v62  ;;  %v5644_v62 = vor.u32 %v6713_v50, %v5643_v49  ;;  %v4776_v2 = vor.u32 %v6496_v55, %v4775_v54  ;;  %v5111_v49 = vld [vmem:[%s10070_s3 + $0x2a0] sm:$0xf]  ;;  %v6580_v50 = vld [vmem:[%s10070_s3 + $0x2b8] sm:$0xf0] }
  0x6b   :  { %v6664_v54 = vld [vmem:[%s10070_s3 + $0x558] sm:$0xf0]  ;;  %v5112_v55 = vor.u32 %v6580_v50, %v5111_v49  ;;  %v5505_v49 = vld [vmem:[%s10070_s3 + $0x5cc] sm:$0xf0] }
  0x6c   :  { %913 = vmatpush.bf16.msrb.mxu0 %v4492_v63  ;;  %v5615_v63 = vld [vmem:[%s10070_s3 + $0x690] sm:$0xf] }
  0x6d   :  { %926 = vmatpush.bf16.msrb.mxu1 %v4716_v3  ;;  %v5167_v3 = vld [vmem:[%s10070_s3 + $0x310] sm:$0xf]  ;;  %v5616_v11 = vor.u32 %v6706_v0, %v5615_v63  ;;  %v5224_v63 = vor.u32 %v6608_v45, %v5223_v44  ;;  %v5536_v44 = vor.u32 %v6682_v34, %v5533_v35  ;;  %v4999_v45 = vld [vmem:[%s10070_s3 + $0x1c0] sm:$0xf] }
  0x6e   :  { %3173 = vmatpush.bf16.msrb.mxu2 %v4916_v9  ;;  %v5168_v7 = vor.u32 %v6594_v5, %v5167_v3  ;;  %v5363_v9 = vld [vmem:[%s10070_s3 + $0x498] sm:$0xf]  ;;  %v6703_v5 = vld [vmem:[%s10070_s3 + $0x694] sm:$0xf] }
  0x70   :  { %914 = vmatpush.bf16.msrb.mxu0 %v4464_v10  ;;  %v6643_v10 = vld [vmem:[%s10070_s3 + $0x4b0] sm:$0xf0]  ;;  %3185 = vmatpush.bf16.msrb.mxu3 %v5168_v7  ;;  %v6741_v7 = vld [vmem:[%s10070_s3 + $0x7c0] sm:$0xf0] }
  0x71   :  { %927 = vmatpush.bf16.msrb.mxu1 %v4688_v13  ;;  %v6699_v13 = vld [vmem:[%s10070_s3 + $0x670] sm:$0xf0]  ;;  %v5364_v14 = vor.u32 %v6643_v10, %v5363_v9 }
  0x72   :  { %3174 = vmatpush.bf16.msrb.mxu2 %v4888_v18  ;;  %v5588_v16 = vor.u32 %v6699_v13, %v5587_v12  ;;  %v6566_v12 = vld [vmem:[%s10070_s3 + $0x248] sm:$0xf0]  ;;  %v6535_v13 = vld [vmem:[%s10070_s3 + $0x154] sm:$0xf] }
  0x74   :  { %915 = vmatpush.bf16.msrb.mxu0 %v4436_v19  ;;  %v5307_v19 = vld [vmem:[%s10070_s3 + $0x428] sm:$0xf] }
  0x75   :  { %928 = vmatpush.bf16.msrb.mxu1 %v4660_v22  ;;  %v5531_v22 = vld [vmem:[%s10070_s3 + $0x5e8] sm:$0xf]  ;;  %v5308_v26 = vor.u32 %v6629_v20, %v5307_v19  ;;  %v4917_v19 = vld [vmem:[%s10070_s3 + $0x134] sm:$0xf0]  ;;  %v7877_v20 = vld [vmem:[%s10071_s2] sm:$0x7f] }
  0x76   :  { %3175 = vmatpush.bf16.msrb.mxu2 %v4860_v27  ;;  %v5840_v27 = vor.u32 %v6762_v25, %v5839_v24  ;;  %v5532_v30 = vor.u32 %v6685_v23, %v5531_v22  ;;  %v6689_v22 = vld [vmem:[%s10070_s3 + $0x624] sm:$0xf]  ;;  %v5561_v23 = vld [vmem:[%s10070_s3 + $0x63c] sm:$0xf0] }
  0x77   :  { %v6521_v25 = vld [vmem:[%s10070_s3 + $0xe4] sm:$0xf] }
  0x78   :  { %916 = vmatpush.bf16.msrb.mxu0 %v4408_v28  ;;  %v5279_v28 = vld [vmem:[%s10070_s3 + $0x3f0] sm:$0xf] }
  0x79   :  { %929 = vmatpush.bf16.msrb.mxu1 %v4632_v31  ;;  %v5503_v31 = vld [vmem:[%s10070_s3 + $0x5b0] sm:$0xf]  ;;  %v5280_v33 = vor.u32 %v6622_v29, %v5279_v28  ;;  %v6734_v28 = vld [vmem:[%s10070_s3 + $0x788] sm:$0xf0] }
  0x7a   :  { %3176 = vmatpush.bf16.msrb.mxu2 %v4832_v37  ;;  %v5504_v36 = vor.u32 %v6678_v32, %v5503_v31  ;;  %v5475_v37 = vld [vmem:[%s10070_s3 + $0x578] sm:$0xf]  ;;  %v5564_v31 = vor.u32 %v6689_v22, %v5561_v23  ;;  %v6493_v23 = vld [vmem:[%s10070_s3 + $0x4] sm:$0xf] }
  0x7b   :  { %v5476_v52 = vor.u32 %v6671_v40, %v5475_v37  ;;  %v5027_v32 = vld [vmem:[%s10070_s3 + $0x1f8] sm:$0xf] }
  0x7c   :  { %917 = vmatpush.bf16.msrb.mxu0 %v4380_v38  ;;  %v5139_v38 = vld [vmem:[%s10070_s3 + $0x2d8] sm:$0xf] }
  0x7d   :  { %930 = vmatpush.bf16.msrb.mxu1 %v4604_v42  ;;  %v5140_v41 = vor.u32 %v6587_v39, %v5139_v38  ;;  %v5811_v42 = vld [vmem:[%s10070_s3 + $0x818] sm:$0xf]  ;;  %v6514_v38 = vld [vmem:[%s10070_s3 + $0xac] sm:$0xf]  ;;  %v4861_v39 = vld [vmem:[%s10070_s3 + $0xc4] sm:$0xf0] }
  0x7e   :  { %3177 = vmatpush.bf16.msrb.mxu2 %v4804_v51  ;;  %v5812_v46 = vor.u32 %v6755_v43, %v5811_v42  ;;  %v5645_v51 = vld [vmem:[%s10070_s3 + $0x6e4] sm:$0xf0]  ;;  %v5699_v40 = vld [vmem:[%s10070_s3 + $0x738] sm:$0xf]  ;;  %v159_v43 = vperm.slane %v7877_v20, 1  ;;  %v4864_v50 = vor.u32 %v6514_v38, %v4861_v39 }
  0x7f   :  { %3186 = vmatpush.bf16.msrb.mxu3 %v5140_v41  ;;  %v5648_v3 = vor.u32 %v6710_v48, %v5645_v51  ;;  %v6727_v41 = vld [vmem:[%s10070_s3 + $0x750] sm:$0xf0] }
  0x80   :  { %918 = vmatpush.bf16.msrb.mxu0 %v4352_v53  ;;  %v5447_v53 = vld [vmem:[%s10070_s3 + $0x540] sm:$0xf]  ;;  %v5700_v42 = vor.u32 %v6727_v41, %v5699_v40  ;;  %v6675_v48 = vld [vmem:[%s10070_s3 + $0x5b4] sm:$0xf]  ;;  %v6577_v41 = vld [vmem:[%s10070_s3 + $0x2a4] sm:$0xf] }
  0x81   :  { %931 = vmatpush.bf16.msrb.mxu1 %v4576_v56  ;;  %v6542_v56 = vld [vmem:[%s10070_s3 + $0x18c] sm:$0xf]  ;;  %v6811_v38 = vld [vmem:[%s10070_s3 + $0x9f0] sm:$0xf0] }
  0x82   :  { %3178 = vmatpush.bf16.msrb.mxu2 %v4776_v2  ;;  %v5755_v2 = vld [vmem:[%s10070_s3 + $0x7a8] sm:$0xf]  ;;  %v4976_v9 = vor.u32 %v6542_v56, %v4973_v59  ;;  %v5671_v56 = vld [vmem:[%s10070_s3 + $0x700] sm:$0xf] }
  0x83   :  { %919 = vmatmul.bf16.vlgmr.msrb.gmra.mxu0 %v7196_v1  ;;  %v6636_v1 = vld [vmem:[%s10070_s3 + $0x478] sm:$0xf0]  ;;  %3187 = vmatpush.bf16.msrb.mxu3 %v5112_v55  ;;  %v5756_v10 = vor.u32 %v6741_v7, %v5755_v2  ;;  %v4833_v55 = vld [vmem:[%s10070_s3 + $0x8c] sm:$0xf0]  ;;  %v5477_v2 = vld [vmem:[%s10070_s3 + $0x594] sm:$0xf0] }
  0x84   :  { %3197 = vmatpush.bf16.msra.mxu0 %v5420_v57  ;;  %932 = vmatmul.bf16.vlgmr.msrb.gmra.mxu1 %v7204_v4  ;;  %v6692_v4 = vld [vmem:[%s10070_s3 + $0x638] sm:$0xf0]  ;;  %v5336_v18 = vor.u32 %v6636_v1, %v5335_v15  ;;  %v5783_v57 = vld [vmem:[%s10070_s3 + $0x7e0] sm:$0xf] }
  0x85   :  { %3210 = vmatpush.bf16.msra.mxu1 %v5644_v62  ;;  %v5560_v21 = vor.u32 %v6692_v4, %v5559_v17  ;;  %v5784_v60 = vor.u32 %v6748_v58, %v5783_v57  ;;  %v6573_v62 = vld [vmem:[%s10070_s3 + $0x280] sm:$0xf0]  ;;  %v5589_v17 = vld [vmem:[%s10070_s3 + $0x674] sm:$0xf0]  ;;  %v6720_v57 = vld [vmem:[%s10070_s3 + $0x718] sm:$0xf0] }
  0x86   :  { %3223 = vmatpush.bf16.msra.mxu2 %v5868_v6  ;;  %v5084_v0 = vor.u32 %v6573_v62, %v5083_v61  ;;  %v5448_v6 = vor.u32 %v6664_v54, %v5447_v53  ;;  %v5672_v58 = vor.u32 %v6720_v57, %v5671_v56  ;;  %v6598_v61 = vld [vmem:[%s10070_s3 + $0x34c] sm:$0xf]  ;;  %v5197_v62 = vld [vmem:[%s10070_s3 + $0x364] sm:$0xf0]  ;;  %v6500_v7 = vld [vmem:[%s10070_s3 + $0x3c] sm:$0xf] }
  0x88   :  { %3198 = vmatpush.bf16.msra.mxu0 %v5392_v8  ;;  %v5617_v8 = vld [vmem:[%s10070_s3 + $0x6ac] sm:$0xf0]  ;;  %3188 = vmatpush.bf16.msrb.mxu3 %v5084_v0  ;;  %v6668_v0 = vld [vmem:[%s10070_s3 + $0x57c] sm:$0xf] }
  0x89   :  { %3211 = vmatpush.bf16.msra.mxu1 %v5616_v11  ;;  %v5055_v11 = vld [vmem:[%s10070_s3 + $0x230] sm:$0xf]  ;;  %v5620_v1 = vor.u32 %v6703_v5, %v5617_v8  ;;  %v4805_v8 = vld [vmem:[%s10070_s3 + $0x54] sm:$0xf0] }
  0x8a   :  { %3224 = vmatpush.bf16.msra.mxu2 %v5840_v27  ;;  %v5056_v15 = vor.u32 %v6566_v12, %v5055_v11  ;;  %v5727_v27 = vld [vmem:[%s10070_s3 + $0x770] sm:$0xf]  ;;  %v6825_v11 = vld [vmem:[%s10070_s3 + $0xa60] sm:$0xf0] }
  0x8b   :  { %v5728_v29 = vor.u32 %v6734_v28, %v5727_v27  ;;  %v6063_v27 = vld [vmem:[%s10070_s3 + $0xa10] sm:$0xf]  ;;  %v6818_v28 = vld [vmem:[%s10070_s3 + $0xa28] sm:$0xf0] }
  0x8c   :  { %3199 = vmatpush.bf16.msra.mxu0 %v5364_v14  ;;  %v4945_v14 = vld [vmem:[%s10070_s3 + $0x16c] sm:$0xf0]  ;;  %3189 = vmatpush.bf16.msrb.mxu3 %v5056_v15 }
  0x8d   :  { %3212 = vmatpush.bf16.msra.mxu1 %v5588_v16  ;;  %v6696_v16 = vld [vmem:[%s10070_s3 + $0x65c] sm:$0xf]  ;;  %v4948_v4 = vor.u32 %v6535_v13, %v4945_v14  ;;  %v5480_v14 = vor.u32 %v6668_v0, %v5477_v2  ;;  %v5029_v0 = vld [vmem:[%s10070_s3 + $0x214] sm:$0xf0] }
  0x8e   :  { %3225 = vmatpush.bf16.msra.mxu2 %v5812_v46  ;;  %v6552_v46 = vld [vmem:[%s10070_s3 + $0x1d8] sm:$0xf0] }
  0x8f   :  { %v5000_v51 = vor.u32 %v6552_v46, %v4999_v45  ;;  %v6804_v45 = vld [vmem:[%s10070_s3 + $0x9b8] sm:$0xf0] }
  0x90   :  { %3200 = vmatpush.bf16.msra.mxu0 %v5336_v18  ;;  %v6528_v18 = vld [vmem:[%s10070_s3 + $0x11c] sm:$0xf] }
  0x91   :  { %3213 = vmatpush.bf16.msra.mxu1 %v5560_v21  ;;  %v5592_v21 = vor.u32 %v6696_v16, %v5589_v17  ;;  %v4920_v24 = vor.u32 %v6528_v18, %v4917_v19  ;;  %v5169_v16 = vld [vmem:[%s10070_s3 + $0x32c] sm:$0xf0]  ;;  %v6661_v18 = vld [vmem:[%s10070_s3 + $0x544] sm:$0xf]  ;;  %v5449_v19 = vld [vmem:[%s10070_s3 + $0x55c] sm:$0xf0] }
  0x92   :  { %3226 = vmatpush.bf16.msra.mxu2 %v5784_v60  ;;  %v5508_v60 = vor.u32 %v6675_v48, %v5505_v49  ;;  %v5085_v48 = vld [vmem:[%s10070_s3 + $0x284] sm:$0xf0] }
  0x94   :  { %3201 = vmatpush.bf16.msra.mxu0 %v5308_v26  ;;  %v4889_v26 = vld [vmem:[%s10070_s3 + $0xfc] sm:$0xf0] }
  0x95   :  { %3214 = vmatpush.bf16.msra.mxu1 %v5532_v30  ;;  %v158_v30 = vperm.slane %v7877_v20, 0 }
  0x96   :  { %3227 = vmatpush.bf16.msra.mxu2 %v5756_v10  ;;  %v6091_v10 = vld [vmem:[%s10070_s3 + $0xa48] sm:$0xf] }
  0x97   :  { %v6092_v15 = vor.u32 %v6825_v11, %v6091_v10 }
  0x98   :  { %3202 = vmatpush.bf16.msra.mxu0 %v5280_v33  ;;  %v6559_v33 = vld [vmem:[%s10070_s3 + $0x210] sm:$0xf0] }
  0x99   :  { %3215 = vmatpush.bf16.msra.mxu1 %v5504_v36  ;;  %v4892_v36 = vor.u32 %v6521_v25, %v4889_v26  ;;  %v5028_v37 = vor.u32 %v6559_v33, %v5027_v32  ;;  %v5141_v32 = vld [vmem:[%s10070_s3 + $0x2f4] sm:$0xf0] }
  0x9a   :  { %3228 = vmatpush.bf16.msra.mxu2 %v5728_v29  ;;  %v5452_v29 = vor.u32 %v6661_v18, %v5449_v19 }
  0x9b   :  { %3190 = vmatpush.bf16.msrb.mxu3 %v5028_v37  ;;  %v6035_v37 = vld [vmem:[%s10070_s3 + $0x9d8] sm:$0xf] }
  0x9c   :  { %3203 = vmatpush.bf16.msra.mxu0 %v5252_v47  ;;  %v6036_v40 = vor.u32 %v6811_v38, %v6035_v37 }
  0x9d   :  { %3216 = vmatpush.bf16.msra.mxu1 %v5476_v52  ;;  %v6507_v52 = vld [vmem:[%s10070_s3 + $0x74] sm:$0xf] }
  0x9e   :  { %3229 = vmatpush.bf16.msra.mxu2 %v5700_v42  ;;  %v5113_v42 = vld [vmem:[%s10070_s3 + $0x2bc] sm:$0xf0] }
  0x9f   :  { %3191 = vmatpush.bf16.msrb.mxu3 %v5000_v51  ;;  %v6797_v51 = vld [vmem:[%s10070_s3 + $0x980] sm:$0xf0] }
  0xa0   :  { %3204 = vmatpush.bf16.msra.mxu0 %v5224_v63  ;;  %v764_v47 = vpop.f32.mrf.mxu0 }
  0xa1   :  { %3217 = vmatpush.bf16.msra.mxu1 %v5448_v6  ;;  %v765_v53 = vadd.f32 %v764_v47, %v158_v30  ;;  %v777_v54 = vpop.f32.mrf.mxu1  ;;  %v6064_v30 = vor.u32 %v6818_v28, %v6063_v27  ;;  %v6570_v47 = vld [vmem:[%s10070_s3 + $0x26c] sm:$0xf] }
  0xa2   :  { %3230 = vmatpush.bf16.msra.mxu2 %v5672_v58  ;;  %v5088_v49 = vor.u32 %v6570_v47, %v5085_v48  ;;  %v5951_v58 = vld [vmem:[%s10070_s3 + $0x930] sm:$0xf]  ;;  %v6766_v28 = vld [vmem:[%s10070_s3 + $0x88c] sm:$0xf]  ;;  %v6832_v47 = vld [vmem:[%s10070_s3 + $0xa98] sm:$0xf0] }
  0xa3   :  { %v778_v59 = vadd.f32 %v777_v54, %v765_v53  ;;  %3236 = vmatpush.bf16.msra.mxu3 %v6092_v15  ;;  %v6563_v54 = vld [vmem:[%s10070_s3 + $0x234] sm:$0xf] }
  0xa4   :  { %3301 = vmatpush.bf16.msrb.mxu0 %v5648_v3  ;;  %v4836_v3 = vor.u32 %v6507_v52, %v4833_v55  ;;  %v160_v52 = vperm.slane %v7877_v20, 2  ;;  %v5057_v55 = vld [vmem:[%s10070_s3 + $0x24c] sm:$0xf0] }
  0xa5   :  { %3262 = vmatpush.bf16.msrb.mxu1 %v4976_v9  ;;  %v937_v5 = vmax.f32 %v778_v59, 0.0  ;;  %v5200_v9 = vor.u32 %v6598_v61, %v5197_v62  ;;  %v5060_v57 = vor.u32 %v6563_v54, %v5057_v55  ;;  %v6790_v59 = vld [vmem:[%s10070_s3 + $0x948] sm:$0xf0]  ;;  %v4867_v54 = vld [vmem:[%s10070_s3 + $0xb0] sm:$0xf] }
  0xa6   :  { %v5952_v62 = vor.u32 %v6790_v59, %v5951_v58  ;;  %v6518_v55 = vld [vmem:[%s10070_s3 + $0xc8] sm:$0xf0]  ;;  %v6745_v58 = vld [vmem:[%s10070_s3 + $0x7e4] sm:$0xf]  ;;  %v5785_v59 = vld [vmem:[%s10070_s3 + $0x7fc] sm:$0xf0] }
  0xa7   :  { %v7971_v12 = vpack.c.bf16 %v937_v5, %v937_v5  ;;  %3237 = vmatpush.bf16.msra.mxu3 %v6064_v30  ;;  %v6546_v5 = vld [vmem:[%s10070_s3 + $0x1a8] sm:$0xf0]  ;;  %v4923_v30 = vld [vmem:[%s10070_s3 + $0x120] sm:$0xf] }
  0xa8   :  { %3302 = vmatpush.bf16.msrb.mxu0 %v5620_v1  ;;  %v790_v63 = vpop.f32.mrf.mxu2  ;;  %v6591_v1 = vld [vmem:[%s10070_s3 + $0x314] sm:$0xf]  ;;  %v766_v17 = vpop.f32.mrf.mxu0 }
  0xa9   :  { %3263 = vmatpush.bf16.msrb.mxu1 %v4948_v4  ;;  %v791_v6 = vadd.f32 %v790_v63, %v159_v43  ;;  %v803_v13 = vpop.f32.mrf.mxu3  ;;  %v779_v22 = vpop.f32.mrf.mxu1  ;;  %3179 = vmatmul.bf16.vlgmr.msrb.gmra.mxu2 %v7971_v12  ;;  %v5172_v26 = vor.u32 %v6591_v1, %v5169_v16  ;;  %v5116_v43 = vor.u32 %v6577_v41, %v5113_v42  ;;  %v6556_v63 = vld [vmem:[%s10070_s3 + $0x1fc] sm:$0xf]  ;;  %v4951_v17 = vld [vmem:[%s10070_s3 + $0x158] sm:$0xf]  ;;  %v6759_v41 = vld [vmem:[%s10070_s3 + $0x854] sm:$0xf] }
  0xaa   :  { %3275 = vmatpush.bf16.msrb.mxu2 %v5200_v9  ;;  %v6783_v9 = vld [vmem:[%s10070_s3 + $0x910] sm:$0xf0]  ;;  %v5841_v42 = vld [vmem:[%s10070_s3 + $0x86c] sm:$0xf0] }
  0xab   :  { %v804_v4 = vadd.f32 %v803_v13, %v791_v6  ;;  %3238 = vmatpush.bf16.msra.mxu3 %v6036_v40  ;;  %v161_v6 = vperm.slane %v7877_v20, 3  ;;  %v6549_v13 = vld [vmem:[%s10070_s3 + $0x1c4] sm:$0xf] }
  0xac   :  { %3303 = vmatpush.bf16.msrb.mxu0 %v5592_v21  ;;  %v4808_v21 = vor.u32 %v6500_v7, %v4805_v8  ;;  %v5032_v7 = vor.u32 %v6556_v63, %v5029_v0  ;;  %v5923_v8 = vld [vmem:[%s10070_s3 + $0x8f8] sm:$0xf]  ;;  %v162_v63 = vperm.slane %v7877_v20, 4 }
  0xad   :  { %3264 = vmatpush.bf16.msrb.mxu1 %v4920_v24  ;;  %v4777_v24 = vld [vmem:[%s10070_s3 + $0x1c] sm:$0xf0]  ;;  %v938_v25 = vmax.f32 %v804_v4, 0.0  ;;  %v5924_v11 = vor.u32 %v6783_v9, %v5923_v8  ;;  %v6539_v4 = vld [vmem:[%s10070_s3 + $0x170] sm:$0xf0] }
  0xae   :  { %v4780_v35 = vor.u32 %v6493_v23, %v4777_v24  ;;  %3276 = vmatpush.bf16.msrb.mxu2 %v5172_v26  ;;  %v5895_v23 = vld [vmem:[%s10070_s3 + $0x8c0] sm:$0xf]  ;;  %v4952_v27 = vor.u32 %v6539_v4, %v4951_v17  ;;  %v6822_v17 = vld [vmem:[%s10070_s3 + $0xa4c] sm:$0xf] }
  0xaf   :  { %v8004_v33 = vpack.c.bf16 %v938_v25, %v938_v25  ;;  %v6776_v25 = vld [vmem:[%s10070_s3 + $0x8d8] sm:$0xf0] }
  0xb0   :  { %3304 = vmatpush.bf16.msrb.mxu0 %v5564_v31  ;;  %v6584_v31 = vld [vmem:[%s10070_s3 + $0x2dc] sm:$0xf]  ;;  %v792_v34 = vpop.f32.mrf.mxu2 }
  0xb1   :  { %3265 = vmatpush.bf16.msrb.mxu1 %v4892_v36  ;;  %3192 = vmatmul.bf16.vlgmr.msrb.gmra.mxu3 %v8004_v33  ;;  %v5144_v36 = vor.u32 %v6584_v31, %v5141_v32  ;;  %v805_v39 = vpop.f32.mrf.mxu3  ;;  %v5896_v31 = vor.u32 %v6776_v25, %v5895_v23  ;;  %v6532_v32 = vld [vmem:[%s10070_s3 + $0x138] sm:$0xf0]  ;;  %v6147_v34 = vld [vmem:[%s10070_s3 + $0xab8] sm:$0xf] }
  0xb2   :  { %v4924_v40 = vor.u32 %v6532_v32, %v4923_v30  ;;  %v6815_v30 = vld [vmem:[%s10070_s3 + $0xa14] sm:$0xf] }
  0xb3   :  { %3277 = vmatpush.bf16.msrb.mxu2 %v5144_v36 }
  0xb4   :  { %3305 = vmatpush.bf16.msrb.mxu0 %v5536_v44  ;;  %v6007_v44 = vld [vmem:[%s10070_s3 + $0x9a0] sm:$0xf] }
  0xb5   :  { %3266 = vmatpush.bf16.msrb.mxu1 %v4864_v50  ;;  %v6008_v46 = vor.u32 %v6804_v45, %v6007_v44  ;;  %v5979_v50 = vld [vmem:[%s10070_s3 + $0x968] sm:$0xf]  ;;  %v6525_v44 = vld [vmem:[%s10070_s3 + $0x100] sm:$0xf0] }
  0xb6   :  { %v5980_v53 = vor.u32 %v6797_v51, %v5979_v50  ;;  %v5844_v50 = vor.u32 %v6759_v41, %v5841_v42  ;;  %v6717_v42 = vld [vmem:[%s10070_s3 + $0x704] sm:$0xf] }
  0xb7   :  { %3239 = vmatpush.bf16.msra.mxu3 %v6008_v46  ;;  %3278 = vmatpush.bf16.msrb.mxu2 %v5116_v43  ;;  %v4895_v43 = vld [vmem:[%s10070_s3 + $0xe8] sm:$0xf]  ;;  %v6119_v46 = vld [vmem:[%s10070_s3 + $0xa80] sm:$0xf] }
  0xb8   :  { %3306 = vmatpush.bf16.msrb.mxu0 %v5508_v60  ;;  %v4896_v51 = vor.u32 %v6525_v44, %v4895_v43  ;;  %v5673_v43 = vld [vmem:[%s10070_s3 + $0x71c] sm:$0xf0] }
  0xb9   :  { %3267 = vmatpush.bf16.msrb.mxu1 %v4836_v3  ;;  %v4979_v3 = vld [vmem:[%s10070_s3 + $0x190] sm:$0xf] }
  0xba   :  { %v4980_v15 = vor.u32 %v6546_v5, %v4979_v3  ;;  %v5757_v3 = vld [vmem:[%s10070_s3 + $0x7c4] sm:$0xf0]  ;;  %v4811_v5 = vld [vmem:[%s10070_s3 + $0x40] sm:$0xf] }
  0xbb   :  { %3240 = vmatpush.bf16.msra.mxu3 %v5980_v53  ;;  %3279 = vmatpush.bf16.msrb.mxu2 %v5088_v49  ;;  %v6120_v49 = vor.u32 %v6832_v47, %v6119_v46  ;;  %v5813_v53 = vld [vmem:[%s10070_s3 + $0x834] sm:$0xf0]  ;;  %v6658_v46 = vld [vmem:[%s10070_s3 + $0x528] sm:$0xf0] }
  0xbc   :  { %3307 = vmatpush.bf16.msrb.mxu0 %v5480_v14  ;;  %v5001_v14 = vld [vmem:[%s10070_s3 + $0x1dc] sm:$0xf0] }
  0xbd   :  { %3268 = vmatpush.bf16.msrb.mxu1 %v4808_v21  ;;  %v5004_v22 = vor.u32 %v6549_v13, %v5001_v14  ;;  %v6731_v13 = vld [vmem:[%s10070_s3 + $0x774] sm:$0xf]  ;;  %v5729_v14 = vld [vmem:[%s10070_s3 + $0x78c] sm:$0xf0] }
  0xbe   :  { %v5732_v23 = vor.u32 %v6731_v13, %v5729_v14 }
  0xbf   :  { %3241 = vmatpush.bf16.msra.mxu3 %v5952_v62  ;;  %3280 = vmatpush.bf16.msrb.mxu2 %v5060_v57  ;;  %v4868_v57 = vor.u32 %v6518_v55, %v4867_v54  ;;  %v5788_v62 = vor.u32 %v6745_v58, %v5785_v59  ;;  %v5819_v54 = vld [vmem:[%s10070_s3 + $0x820] sm:$0xf]  ;;  %v6756_v55 = vld [vmem:[%s10070_s3 + $0x838] sm:$0xf0]  ;;  %v5399_v59 = vld [vmem:[%s10070_s3 + $0x4d8] sm:$0xf] }
  0xc0   :  { %3308 = vmatpush.bf16.msrb.mxu0 %v5452_v29  ;;  %v816_v56 = vpop.f32.mrf.mxu0  ;;  %v5869_v29 = vld [vmem:[%s10070_s3 + $0x8a4] sm:$0xf0] }
  0xc1   :  { %3269 = vmatpush.bf16.msrb.mxu1 %v4780_v35  ;;  %v817_v60 = vadd.f32 %v816_v56, %v160_v52  ;;  %v829_v61 = vpop.f32.mrf.mxu1  ;;  %v6839_v35 = vld [vmem:[%s10070_s3 + $0xad0] sm:$0xf0]  ;;  %v5872_v38 = vor.u32 %v6766_v28, %v5869_v29  ;;  %v6752_v52 = vld [vmem:[%s10070_s3 + $0x81c] sm:$0xf] }
  0xc2   :  { %v6148_v37 = vor.u32 %v6839_v35, %v6147_v34  ;;  %v5816_v56 = vor.u32 %v6752_v52, %v5813_v53  ;;  %v6065_v34 = vld [vmem:[%s10070_s3 + $0xa2c] sm:$0xf0]  ;;  %v5847_v35 = vld [vmem:[%s10070_s3 + $0x858] sm:$0xf]  ;;  %v5421_v52 = vld [vmem:[%s10070_s3 + $0x524] sm:$0xf0] }
  0xc3   :  { %v830_v2 = vadd.f32 %v829_v61, %v817_v60  ;;  %3242 = vmatpush.bf16.msra.mxu3 %v5924_v11  ;;  %3281 = vmatpush.bf16.msrb.mxu2 %v5032_v7  ;;  %v4839_v60 = vld [vmem:[%s10070_s3 + $0x78] sm:$0xf]  ;;  %v6511_v61 = vld [vmem:[%s10070_s3 + $0x90] sm:$0xf0] }
  0xc4   :  { %v4840_v0 = vor.u32 %v6511_v61, %v4839_v60  ;;  %v6037_v53 = vld [vmem:[%s10070_s3 + $0x9f4] sm:$0xf0]  ;;  %v6651_v60 = vld [vmem:[%s10070_s3 + $0x4f0] sm:$0xf0] }
  0xc5   :  { %v939_v10 = vmax.f32 %v830_v2, 0.0  ;;  %v6738_v2 = vld [vmem:[%s10070_s3 + $0x7ac] sm:$0xf] }
  0xc6   :  { %v5760_v8 = vor.u32 %v6738_v2, %v5757_v3  ;;  %v6801_v2 = vld [vmem:[%s10070_s3 + $0x9a4] sm:$0xf]  ;;  %v6647_v3 = vld [vmem:[%s10070_s3 + $0x4d4] sm:$0xf] }
  0xc7   :  { %v8075_v1 = vpack.c.bf16 %v939_v10, %v939_v10  ;;  %3282 = vmatpush.bf16.msrb.mxu2 %v5004_v22  ;;  %3243 = vmatpush.bf16.msra.mxu3 %v5896_v31  ;;  %v163_v22 = vperm.slane %v7877_v20, 5 }
  0xc8   :  { %v842_v16 = vpop.f32.mrf.mxu2  ;;  %v818_v21 = vpop.f32.mrf.mxu0 }
  0xc9   :  { %v843_v18 = vadd.f32 %v842_v16, %v161_v6  ;;  %v855_v19 = vpop.f32.mrf.mxu3  ;;  %3205 = vmatmul.bf16.vlgmr.msra.gmra.mxu0 %v8075_v1  ;;  %v831_v24 = vpop.f32.mrf.mxu1  ;;  %v6504_v6 = vld [vmem:[%s10070_s3 + $0x58] sm:$0xf0]  ;;  %v6497_v16 = vld [vmem:[%s10070_s3 + $0x20] sm:$0xf0]  ;;  %v6770_v21 = vld [vmem:[%s10070_s3 + $0x8a8] sm:$0xf0] }
  0xca   :  { %3353 = vmatpush.bf16.msra.mxu0 %v4980_v15  ;;  %v4812_v11 = vor.u32 %v6504_v6, %v4811_v5  ;;  %v4783_v15 = vld [vmem:[%s10070_s3 + $0x8] sm:$0xf]  ;;  %v5393_v5 = vld [vmem:[%s10070_s3 + $0x4ec] sm:$0xf0] }
  0xcb   :  { %v856_v26 = vadd.f32 %v855_v19, %v843_v18  ;;  %3255 = vmatpush.bf16.msrb.mxu3 %v6148_v37  ;;  %v6093_v18 = vld [vmem:[%s10070_s3 + $0xa64] sm:$0xf0]  ;;  %v5875_v19 = vld [vmem:[%s10070_s3 + $0x890] sm:$0xf]  ;;  %v4784_v25 = vor.u32 %v6497_v16, %v4783_v15  ;;  %v5396_v13 = vor.u32 %v6647_v3, %v5393_v5  ;;  %v5371_v16 = vld [vmem:[%s10070_s3 + $0x4a0] sm:$0xf] }
  0xcc   :  { %v6096_v28 = vor.u32 %v6822_v17, %v6093_v18  ;;  %v5876_v29 = vor.u32 %v6770_v21, %v5875_v19  ;;  %v6644_v17 = vld [vmem:[%s10070_s3 + $0x4b8] sm:$0xf0]  ;;  %v5981_v18 = vld [vmem:[%s10070_s3 + $0x984] sm:$0xf0]  ;;  %v5763_v19 = vld [vmem:[%s10070_s3 + $0x7b0] sm:$0xf] }
  0xcd   :  { %v940_v36 = vmax.f32 %v856_v26, 0.0  ;;  %v6724_v26 = vld [vmem:[%s10070_s3 + $0x73c] sm:$0xf]  ;;  %v6742_v21 = vld [vmem:[%s10070_s3 + $0x7c8] sm:$0xf0] }
  0xce   :  { %3354 = vmatpush.bf16.msra.mxu0 %v4952_v27  ;;  %v5701_v27 = vld [vmem:[%s10070_s3 + $0x754] sm:$0xf0]  ;;  %v6714_v3 = vld [vmem:[%s10070_s3 + $0x6e8] sm:$0xf0]  ;;  %v6599_v5 = vld [vmem:[%s10070_s3 + $0x354] sm:$0xf] }
  0xcf   :  { %v8108_v39 = vpack.c.bf16 %v940_v36, %v940_v36  ;;  %3256 = vmatpush.bf16.msrb.mxu3 %v6120_v49  ;;  %v6763_v36 = vld [vmem:[%s10070_s3 + $0x870] sm:$0xf0] }
  0xd0   :  { %v844_v45 = vpop.f32.mrf.mxu2  ;;  %v5848_v49 = vor.u32 %v6763_v36, %v5847_v35  ;;  %v6735_v35 = vld [vmem:[%s10070_s3 + $0x790] sm:$0xf0]  ;;  %v6633_v36 = vld [vmem:[%s10070_s3 + $0x464] sm:$0xf] }
  0xd1   :  { %3218 = vmatmul.bf16.vlgmr.msra.gmra.mxu1 %v8108_v39  ;;  %v857_v48 = vpop.f32.mrf.mxu3  ;;  %v5427_v45 = vld [vmem:[%s10070_s3 + $0x510] sm:$0xf] }
  0xd2   :  { %3314 = vmatpush.bf16.msra.mxu1 %v5872_v38  ;;  %3355 = vmatpush.bf16.msra.mxu0 %v4924_v40  ;;  %v5704_v40 = vor.u32 %v6724_v26, %v5701_v27  ;;  %v6068_v48 = vor.u32 %v6815_v30, %v6065_v34  ;;  %v5428_v58 = vor.u32 %v6658_v46, %v5427_v45  ;;  %v5343_v27 = vld [vmem:[%s10070_s3 + $0x468] sm:$0xf]  ;;  %v5735_v34 = vld [vmem:[%s10070_s3 + $0x778] sm:$0xf]  ;;  %v6780_v45 = vld [vmem:[%s10070_s3 + $0x8fc] sm:$0xf] }
  0xd3   :  { %v5764_v26 = vor.u32 %v6742_v21, %v5763_v19  ;;  %v5623_v19 = vld [vmem:[%s10070_s3 + $0x698] sm:$0xf]  ;;  %v6707_v21 = vld [vmem:[%s10070_s3 + $0x6b0] sm:$0xf0] }
  0xd6   :  { %3315 = vmatpush.bf16.msra.mxu1 %v5844_v50  ;;  %3356 = vmatpush.bf16.msra.mxu0 %v4896_v51  ;;  %v6808_v50 = vld [vmem:[%s10070_s3 + $0x9dc] sm:$0xf]  ;;  %v6654_v51 = vld [vmem:[%s10070_s3 + $0x50c] sm:$0xf] }
  0xd7   :  { %v5424_v61 = vor.u32 %v6654_v51, %v5421_v52 }
  0xd9   :  { %3309 = vmatmul.bf16.vlgmr.msrb.gmra.mxu0 %v8108_v39 }
  0xda   :  { %3316 = vmatpush.bf16.msra.mxu1 %v5816_v56  ;;  %3357 = vmatpush.bf16.msra.mxu0 %v4868_v57  ;;  %v5676_v57 = vor.u32 %v6717_v42, %v5673_v43  ;;  %v5736_v42 = vor.u32 %v6735_v35, %v5735_v34  ;;  %v5315_v43 = vld [vmem:[%s10070_s3 + $0x430] sm:$0xf]  ;;  %v5624_v34 = vor.u32 %v6707_v21, %v5623_v19  ;;  %v6155_v35 = vld [vmem:[%s10070_s3 + $0xac0] sm:$0xf]  ;;  %v5175_v21 = vld [vmem:[%s10070_s3 + $0x318] sm:$0xf] }
  0xdb   :  { %v5373_v19 = vld [vmem:[%s10070_s3 + $0x4bc] sm:$0xf0] }
  0xde   :  { %3317 = vmatpush.bf16.msra.mxu1 %v5788_v62  ;;  %3358 = vmatpush.bf16.msra.mxu0 %v4840_v0  ;;  %v5820_v0 = vor.u32 %v6756_v55, %v5819_v54  ;;  %v5287_v55 = vld [vmem:[%s10070_s3 + $0x3f8] sm:$0xf] }
  0xe0   :  { %v868_v7 = vpop.f32.mrf.mxu0 }
  0xe1   :  { %v869_v9 = vadd.f32 %v868_v7, %v162_v63  ;;  %v881_v10 = vpop.f32.mrf.mxu1  ;;  %3270 = vmatmul.bf16.vlgmr.msrb.gmra.mxu1 %v7971_v12  ;;  %v6040_v63 = vor.u32 %v6808_v50, %v6037_v53  ;;  %v6009_v7 = vld [vmem:[%s10070_s3 + $0x9bc] sm:$0xf0]  ;;  %v5309_v50 = vld [vmem:[%s10070_s3 + $0x444] sm:$0xf0] }
  0xe2   :  { %3318 = vmatpush.bf16.msra.mxu1 %v5760_v8  ;;  %3359 = vmatpush.bf16.msra.mxu0 %v4812_v11  ;;  %v5791_v8 = vld [vmem:[%s10070_s3 + $0x7e8] sm:$0xf]  ;;  %v5400_v11 = vor.u32 %v6651_v60, %v5399_v59  ;;  %v6012_v14 = vor.u32 %v6801_v2, %v6009_v7  ;;  %v5651_v2 = vld [vmem:[%s10070_s3 + $0x6d0] sm:$0xf] }
  0xe3   :  { %v882_v4 = vadd.f32 %v881_v10, %v869_v9  ;;  %v6749_v9 = vld [vmem:[%s10070_s3 + $0x800] sm:$0xf0] }
  0xe4   :  { %v5792_v15 = vor.u32 %v6749_v9, %v5791_v8  ;;  %v5205_v8 = vld [vmem:[%s10070_s3 + $0x36c] sm:$0xf0]  ;;  %v6619_v9 = vld [vmem:[%s10070_s3 + $0x3f4] sm:$0xf] }
  0xe5   :  { %v941_v24 = vmax.f32 %v882_v4, 0.0  ;;  %v6794_v4 = vld [vmem:[%s10070_s3 + $0x96c] sm:$0xf] }
  0xe6   :  { %3319 = vmatpush.bf16.msra.mxu1 %v5732_v23  ;;  %3360 = vmatpush.bf16.msra.mxu0 %v4784_v25  ;;  %v5365_v23 = vld [vmem:[%s10070_s3 + $0x4b4] sm:$0xf0]  ;;  %v5984_v25 = vor.u32 %v6794_v4, %v5981_v18  ;;  %v5208_v4 = vor.u32 %v6599_v5, %v5205_v8  ;;  %v5203_v8 = vld [vmem:[%s10070_s3 + $0x350] sm:$0xf] }
  0xe7   :  { %v8202_v31 = vpack.c.bf16 %v941_v24, %v941_v24  ;;  %v5372_v24 = vor.u32 %v6644_v17, %v5371_v16  ;;  %v5652_v17 = vor.u32 %v6714_v3, %v5651_v2  ;;  %v6829_v2 = vld [vmem:[%s10070_s3 + $0xa84] sm:$0xf]  ;;  %v6121_v3 = vld [vmem:[%s10070_s3 + $0xa9c] sm:$0xf0] }
  0xe8   :  { %v894_v32 = vpop.f32.mrf.mxu2  ;;  %v870_v41 = vpop.f32.mrf.mxu0 }
  0xe9   :  { %v895_v37 = vadd.f32 %v894_v32, %v163_v22  ;;  %v907_v38 = vpop.f32.mrf.mxu3  ;;  %3231 = vmatmul.bf16.vlgmr.msra.gmra.mxu2 %v8202_v31  ;;  %v883_v44 = vpop.f32.mrf.mxu1  ;;  %3361 = vmatmul.bf16.vlgmr.msra.gmra.mxu0 %v7971_v12  ;;  %v6640_v22 = vld [vmem:[%s10070_s3 + $0x49c] sm:$0xf]  ;;  %v5953_v32 = vld [vmem:[%s10070_s3 + $0x94c] sm:$0xf0] }
  0xea   :  { %3327 = vmatpush.bf16.msra.mxu2 %v6096_v28  ;;  %3405 = vmatpush.bf16.msrb.mxu0 %v5876_v29  ;;  %v6637_v28 = vld [vmem:[%s10070_s3 + $0x480] sm:$0xf0]  ;;  %v6787_v29 = vld [vmem:[%s10070_s3 + $0x934] sm:$0xf]  ;;  %v5368_v30 = vor.u32 %v6640_v22, %v5365_v23  ;;  %v6630_v44 = vld [vmem:[%s10070_s3 + $0x448] sm:$0xf0] }
  0xeb   :  { %v908_v47 = vadd.f32 %v907_v38, %v895_v37  ;;  %3320 = vmatpush.bf16.msra.mxu1 %v5704_v40  ;;  %v5337_v37 = vld [vmem:[%s10070_s3 + $0x47c] sm:$0xf0]  ;;  %v5344_v38 = vor.u32 %v6637_v28, %v5343_v27  ;;  %v164_v40 = vperm.slane %v7877_v20, 6  ;;  %v5956_v41 = vor.u32 %v6787_v29, %v5953_v32  ;;  %v5925_v20 = vld [vmem:[%s10070_s3 + $0x914] sm:$0xf0] }
  0xec   :  { %v5340_v46 = vor.u32 %v6633_v36, %v5337_v37  ;;  %v5316_v51 = vor.u32 %v6630_v44, %v5315_v43  ;;  %v5928_v53 = vor.u32 %v6780_v45, %v5925_v20  ;;  %v6592_v22 = vld [vmem:[%s10070_s3 + $0x31c] sm:$0xf]  ;;  %v5253_v27 = vld [vmem:[%s10070_s3 + $0x3d4] sm:$0xf0]  ;;  %v5231_v29 = vld [vmem:[%s10070_s3 + $0x388] sm:$0xf] }
  0xed   :  { %v942_v56 = vmax.f32 %v908_v47, 0.0  ;;  %v5707_v47 = vld [vmem:[%s10070_s3 + $0x740] sm:$0xf]  ;;  %v6840_v36 = vld [vmem:[%s10070_s3 + $0xad8] sm:$0xf0] }
  0xee   :  { %3328 = vmatpush.bf16.msra.mxu2 %v6068_v48  ;;  %3406 = vmatpush.bf16.msrb.mxu0 %v5848_v49  ;;  %v6728_v48 = vld [vmem:[%s10070_s3 + $0x758] sm:$0xf0]  ;;  %v6626_v49 = vld [vmem:[%s10070_s3 + $0x42c] sm:$0xf]  ;;  %v6585_v43 = vld [vmem:[%s10070_s3 + $0x2e4] sm:$0xf] }
  0xef   :  { %v8251_v62 = vpack.c.bf16 %v942_v56, %v942_v56  ;;  %3321 = vmatpush.bf16.msra.mxu1 %v5676_v57  ;;  %v5708_v54 = vor.u32 %v6728_v48, %v5707_v47  ;;  %v6623_v56 = vld [vmem:[%s10070_s3 + $0x410] sm:$0xf0]  ;;  %v6773_v57 = vld [vmem:[%s10070_s3 + $0x8c4] sm:$0xf]  ;;  %v5312_v60 = vor.u32 %v6626_v49, %v5309_v50  ;;  %v5149_v44 = vld [vmem:[%s10070_s3 + $0x2fc] sm:$0xf0] }
  0xf0   :  { %v896_v6 = vpop.f32.mrf.mxu2  ;;  %v5288_v7 = vor.u32 %v6623_v56, %v5287_v55  ;;  %v6605_v45 = vld [vmem:[%s10070_s3 + $0x384] sm:$0xf]  ;;  %v5225_v20 = vld [vmem:[%s10070_s3 + $0x39c] sm:$0xf0]  ;;  %v6127_v47 = vld [vmem:[%s10070_s3 + $0xa88] sm:$0xf] }
  0xf1   :  { %v909_v10 = vpop.f32.mrf.mxu3  ;;  %3244 = vmatmul.bf16.vlgmr.msra.gmra.mxu3 %v8251_v62  ;;  %v6833_v48 = vld [vmem:[%s10070_s3 + $0xaa0] sm:$0xf0]  ;;  %v6836_v50 = vld [vmem:[%s10070_s3 + $0xabc] sm:$0xf]  ;;  %v5567_v55 = vld [vmem:[%s10070_s3 + $0x628] sm:$0xf] }
  0xf2   :  { %3288 = vmatpush.bf16.msra.mxu3 %v5424_v61  ;;  %3329 = vmatpush.bf16.msra.mxu2 %v6040_v63  ;;  %v5897_v61 = vld [vmem:[%s10070_s3 + $0x8dc] sm:$0xf0]  ;;  %v5679_v63 = vld [vmem:[%s10070_s3 + $0x708] sm:$0xf]  ;;  %v5281_v10 = vld [vmem:[%s10070_s3 + $0x40c] sm:$0xf0] }
  0xf3   :  { %3379 = vmatpush.bf16.msrb.mxu1 %v5428_v58  ;;  %3407 = vmatpush.bf16.msrb.mxu0 %v5820_v0  ;;  %v6721_v0 = vld [vmem:[%s10070_s3 + $0x720] sm:$0xf0]  ;;  %v5284_v18 = vor.u32 %v6619_v9, %v5281_v10  ;;  %v6602_v9 = vld [vmem:[%s10070_s3 + $0x368] sm:$0xf0]  ;;  %v5539_v10 = vld [vmem:[%s10070_s3 + $0x5f0] sm:$0xf] }
  0xf4   :  { %3322 = vmatmul.bf16.vlgmr.msra.gmra.mxu1 %v8202_v31  ;;  %v6693_v56 = vld [vmem:[%s10070_s3 + $0x640] sm:$0xf0] }
  0xf6   :  { %3289 = vmatpush.bf16.msra.mxu3 %v5396_v13  ;;  %3330 = vmatpush.bf16.msra.mxu2 %v6012_v14  ;;  %v5680_v13 = vor.u32 %v6721_v0, %v5679_v63  ;;  %v5259_v14 = vld [vmem:[%s10070_s3 + $0x3c0] sm:$0xf]  ;;  %v5568_v0 = vor.u32 %v6693_v56, %v5567_v55  ;;  %v6543_v55 = vld [vmem:[%s10070_s3 + $0x194] sm:$0xf]  ;;  %v4981_v56 = vld [vmem:[%s10070_s3 + $0x1ac] sm:$0xf0] }
  0xf7   :  { %3380 = vmatpush.bf16.msrb.mxu1 %v5400_v11  ;;  %3408 = vmatpush.bf16.msrb.mxu0 %v5792_v15  ;;  %v5900_v11 = vor.u32 %v6773_v57, %v5897_v61  ;;  %v6616_v15 = vld [vmem:[%s10070_s3 + $0x3d8] sm:$0xf0]  ;;  %v5228_v57 = vor.u32 %v6605_v45, %v5225_v20  ;;  %v6627_v45 = vld [vmem:[%s10070_s3 + $0x434] sm:$0xf] }
  0xf9   :  { %3283 = vmatmul.bf16.vlgmr.msrb.gmra.mxu2 %v8004_v33 }
  0xfa   :  { %3331 = vmatpush.bf16.msra.mxu2 %v5984_v25  ;;  %3290 = vmatpush.bf16.msra.mxu3 %v5368_v30  ;;  %v5177_v25 = vld [vmem:[%s10070_s3 + $0x334] sm:$0xf0]  ;;  %v6609_v30 = vld [vmem:[%s10070_s3 + $0x3a0] sm:$0xf0] }
  0xfb   :  { %3381 = vmatpush.bf16.msrb.mxu1 %v5372_v24  ;;  %3409 = vmatpush.bf16.msrb.mxu0 %v5764_v26  ;;  %v5260_v24 = vor.u32 %v6616_v15, %v5259_v14  ;;  %v6612_v26 = vld [vmem:[%s10070_s3 + $0x3bc] sm:$0xf]  ;;  %v5180_v37 = vor.u32 %v6592_v22, %v5177_v25  ;;  %v6571_v14 = vld [vmem:[%s10070_s3 + $0x274] sm:$0xf]  ;;  %v5093_v15 = vld [vmem:[%s10070_s3 + $0x28c] sm:$0xf0] }
  0xfc   :  { %v5096_v22 = vor.u32 %v6571_v14, %v5093_v15  ;;  %v5511_v25 = vld [vmem:[%s10070_s3 + $0x5b8] sm:$0xf]  ;;  %v6613_v14 = vld [vmem:[%s10070_s3 + $0x3c4] sm:$0xf]  ;;  %v5261_v15 = vld [vmem:[%s10070_s3 + $0x3dc] sm:$0xf0] }
  0xfe   :  { %3332 = vmatpush.bf16.msra.mxu2 %v5956_v41  ;;  %3291 = vmatpush.bf16.msra.mxu3 %v5340_v46  ;;  %v6700_v41 = vld [vmem:[%s10070_s3 + $0x678] sm:$0xf0]  ;;  %v6156_v46 = vor.u32 %v6840_v36, %v6155_v35  ;;  %v5345_v35 = vld [vmem:[%s10070_s3 + $0x484] sm:$0xf0]  ;;  %v5147_v36 = vld [vmem:[%s10070_s3 + $0x2e0] sm:$0xf] }
  0xff   :  { %3382 = vmatpush.bf16.msrb.mxu1 %v5344_v38  ;;  %3410 = vmatpush.bf16.msrb.mxu0 %v5736_v42  ;;  %v5256_v38 = vor.u32 %v6612_v26, %v5253_v27  ;;  %v5232_v42 = vor.u32 %v6609_v30, %v5231_v29  ;;  %v6679_v26 = vld [vmem:[%s10070_s3 + $0x5d0] sm:$0xf0]  ;;  %v6564_v27 = vld [vmem:[%s10070_s3 + $0x23c] sm:$0xf] }
 0x100   :  { %v920_v52 = vpop.f32.mrf.mxu0 }
 0x101   :  { %v921_v58 = vadd.f32 %v920_v52, %v164_v40  ;;  %v933_v59 = vpop.f32.mrf.mxu1  ;;  %v5595_v40 = vld [vmem:[%s10070_s3 + $0x660] sm:$0xf]  ;;  %v6655_v52 = vld [vmem:[%s10070_s3 + $0x514] sm:$0xf] }
 0x102   :  { %3333 = vmatpush.bf16.msra.mxu2 %v5928_v53  ;;  %3292 = vmatpush.bf16.msra.mxu3 %v5312_v60  ;;  %v5596_v49 = vor.u32 %v6700_v41, %v5595_v40  ;;  %v5152_v53 = vor.u32 %v6585_v43, %v5149_v44  ;;  %v6128_v60 = vor.u32 %v6833_v48, %v6127_v47  ;;  %v5483_v40 = vld [vmem:[%s10070_s3 + $0x580] sm:$0xf]  ;;  %v6672_v41 = vld [vmem:[%s10070_s3 + $0x598] sm:$0xf0]  ;;  %v5317_v47 = vld [vmem:[%s10070_s3 + $0x44c] sm:$0xf0] }
 0x103   :  { %v934_v6 = vadd.f32 %v933_v59, %v921_v58  ;;  %3383 = vmatpush.bf16.msrb.mxu1 %v5316_v51  ;;  %3411 = vmatpush.bf16.msrb.mxu0 %v5708_v54  ;;  %v6149_v51 = vld [vmem:[%s10070_s3 + $0xad4] sm:$0xf0]  ;;  %v5429_v54 = vld [vmem:[%s10070_s3 + $0x52c] sm:$0xf0]  ;;  %v6578_v58 = vld [vmem:[%s10070_s3 + $0x2ac] sm:$0xf]  ;;  %v5484_v20 = vor.u32 %v6672_v41, %v5483_v40 }
 0x104   :  { %v5121_v59 = vld [vmem:[%s10070_s3 + $0x2c4] sm:$0xf0]  ;;  %v6152_v61 = vor.u32 %v6836_v50, %v6149_v51  ;;  %v5432_v63 = vor.u32 %v6655_v52, %v5429_v54  ;;  %v5037_v43 = vld [vmem:[%s10070_s3 + $0x21c] sm:$0xf0]  ;;  %v6665_v52 = vld [vmem:[%s10070_s3 + $0x560] sm:$0xf0] }
 0x105   :  { %v943_v16 = vmax.f32 %v934_v6, 0.0  ;;  %v5124_v5 = vor.u32 %v6578_v58, %v5121_v59  ;;  %v6648_v6 = vld [vmem:[%s10070_s3 + $0x4dc] sm:$0xf]  ;;  %v5119_v48 = vld [vmem:[%s10070_s3 + $0x2a8] sm:$0xf] }
 0x106   :  { %3334 = vmatpush.bf16.msra.mxu2 %v5900_v11  ;;  %3293 = vmatpush.bf16.msra.mxu3 %v5284_v18  ;;  %v6686_v11 = vld [vmem:[%s10070_s3 + $0x608] sm:$0xf0]  ;;  %v6641_v18 = vld [vmem:[%s10070_s3 + $0x4a4] sm:$0xf]  ;;  %v5455_v51 = vld [vmem:[%s10070_s3 + $0x548] sm:$0xf] }
 0x107   :  { %v8398_v23 = vpack.c.bf16 %v943_v16, %v943_v16  ;;  %3384 = vmatpush.bf16.msrb.mxu1 %v5288_v7  ;;  %3412 = vmatpush.bf16.msrb.mxu0 %v5680_v13  ;;  %v5401_v7 = vld [vmem:[%s10070_s3 + $0x4f4] sm:$0xf0]  ;;  %v6124_v13 = vor.u32 %v6829_v2, %v6121_v3  ;;  %v5376_v29 = vor.u32 %v6641_v18, %v5373_v19  ;;  %v5009_v54 = vld [vmem:[%s10070_s3 + $0x1e4] sm:$0xf0]  ;;  %v6823_v58 = vld [vmem:[%s10070_s3 + $0xa54] sm:$0xf] }
 0x108   :  { %v922_v28 = vpop.f32.mrf.mxu0  ;;  %v5404_v16 = vor.u32 %v6648_v6, %v5401_v7  ;;  %v6101_v59 = vld [vmem:[%s10070_s3 + $0xa6c] sm:$0xf0]  ;;  %v4984_v3 = vor.u32 %v6543_v55, %v4981_v56  ;;  %v6574_v7 = vld [vmem:[%s10070_s3 + $0x288] sm:$0xf0]  ;;  %v6567_v19 = vld [vmem:[%s10070_s3 + $0x250] sm:$0xf0] }
 0x109   :  { %v935_v32 = vpop.f32.mrf.mxu1  ;;  %6173 = vmatmul.msk.bf16.vlgmr.msrb.gmra.mxu3 %vm3167_vm0, %v8398_v23  ;;  %3335 = vmatmul.bf16.vlgmr.msra.gmra.mxu2 %v8251_v62  ;;  %v5065_v28 = vld [vmem:[%s10070_s3 + $0x254] sm:$0xf0]  ;;  %v6104_v6 = vor.u32 %v6823_v58, %v6101_v59  ;;  %v4897_v40 = vld [vmem:[%s10070_s3 + $0x104] sm:$0xf0]  ;;  %v6795_v55 = vld [vmem:[%s10070_s3 + $0x974] sm:$0xf] }
 0x10a   :  { %3392 = vmatpush.bf16.msrb.mxu2 %v5652_v17  ;;  %3413 = vmatmul.bf16.vlgmr.msrb.gmra.mxu0 %v8202_v31  ;;  %v5204_v17 = vor.u32 %v6602_v9, %v5203_v8  ;;  %v5512_v32 = vor.u32 %v6679_v26, %v5511_v25  ;;  %v6536_v8 = vld [vmem:[%s10070_s3 + $0x15c] sm:$0xf]  ;;  %v4953_v9 = vld [vmem:[%s10070_s3 + $0x174] sm:$0xf0]  ;;  %v6809_v25 = vld [vmem:[%s10070_s3 + $0x9e4] sm:$0xf] }
 0x10b   :  { %3457 = vmatpush.bf16.msra.mxu0 %v5208_v4  ;;  %3385 = vmatpush.bf16.msrb.mxu1 %v5260_v24  ;;  %v5540_v4 = vor.u32 %v6686_v11, %v5539_v10  ;;  %v6595_v24 = vld [vmem:[%s10070_s3 + $0x330] sm:$0xf0]  ;;  %v6816_v11 = vld [vmem:[%s10070_s3 + $0xa1c] sm:$0xf]  ;;  %v6045_v26 = vld [vmem:[%s10070_s3 + $0x9fc] sm:$0xf0] }
 0x10c   :  { %3294 = vmatpush.bf16.msra.mxu3 %v5256_v38  ;;  %v5176_v30 = vor.u32 %v6595_v24, %v5175_v21  ;;  %v6588_v38 = vld [vmem:[%s10070_s3 + $0x2f8] sm:$0xf0]  ;;  %v6529_v21 = vld [vmem:[%s10070_s3 + $0x124] sm:$0xf]  ;;  %v5264_v24 = vor.u32 %v6613_v14, %v5261_v15  ;;  %v5989_v56 = vld [vmem:[%s10070_s3 + $0x98c] sm:$0xf0] }
 0x10d   :  { %v5211_v58 = vld [vmem:[%s10070_s3 + $0x358] sm:$0xf]  ;;  %v6603_v59 = vld [vmem:[%s10070_s3 + $0x370] sm:$0xf0]  ;;  %v6596_v14 = vld [vmem:[%s10070_s3 + $0x338] sm:$0xf0] }
 0x10e   :  { %3393 = vmatpush.bf16.msrb.mxu2 %v5624_v34  ;;  %v6634_v34 = vld [vmem:[%s10070_s3 + $0x46c] sm:$0xf] }
 0x10f   :  { %3458 = vmatpush.bf16.msra.mxu0 %v5180_v37  ;;  %3386 = vmatpush.bf16.msrb.mxu1 %v5232_v42  ;;  %v5068_v37 = vor.u32 %v6564_v27, %v5065_v28  ;;  %v6557_v42 = vld [vmem:[%s10070_s3 + $0x204] sm:$0xf]  ;;  %v5348_v44 = vor.u32 %v6634_v34, %v5345_v35  ;;  %v6606_v27 = vld [vmem:[%s10070_s3 + $0x38c] sm:$0xf]  ;;  %v5233_v28 = vld [vmem:[%s10070_s3 + $0x3a4] sm:$0xf0] }
 0x110   :  { %3295 = vmatpush.bf16.msra.mxu3 %v5228_v57  ;;  %v5040_v50 = vor.u32 %v6557_v42, %v5037_v43  ;;  %v5320_v57 = vor.u32 %v6627_v45, %v5317_v47  ;;  %v6837_v34 = vld [vmem:[%s10070_s3 + $0xac4] sm:$0xf]  ;;  %v6157_v35 = vld [vmem:[%s10070_s3 + $0xadc] sm:$0xf0]  ;;  %v5236_v41 = vor.u32 %v6606_v27, %v5233_v28  ;;  %v6802_v42 = vld [vmem:[%s10070_s3 + $0x9ac] sm:$0xf] }
 0x111   :  { %v6017_v43 = vld [vmem:[%s10070_s3 + $0x9c4] sm:$0xf0]  ;;  %v6553_v47 = vld [vmem:[%s10070_s3 + $0x1e0] sm:$0xf0] }
 0x112   :  { %3394 = vmatpush.bf16.msrb.mxu2 %v5596_v49  ;;  %3387 = vmatmul.bf16.vlgmr.msrb.gmra.mxu1 %v8075_v1  ;;  %v6581_v49 = vld [vmem:[%s10070_s3 + $0x2c0] sm:$0xf0]  ;;  %v5007_v45 = vld [vmem:[%s10070_s3 + $0x1c8] sm:$0xf] }
 0x113   :  { %3437 = vmatpush.bf16.msra.mxu1 %v6156_v46  ;;  %3459 = vmatpush.bf16.msra.mxu0 %v5152_v53  ;;  %v5148_v46 = vor.u32 %v6588_v38, %v5147_v36  ;;  %v6550_v53 = vld [vmem:[%s10070_s3 + $0x1cc] sm:$0xf]  ;;  %v6048_v36 = vor.u32 %v6809_v25, %v6045_v26  ;;  %v6781_v25 = vld [vmem:[%s10070_s3 + $0x904] sm:$0xf]  ;;  %v5933_v26 = vld [vmem:[%s10070_s3 + $0x91c] sm:$0xf0] }
 0x114   :  { %3346 = vmatpush.bf16.msrb.mxu3 %v6152_v61  ;;  %v5456_v61 = vor.u32 %v6665_v52, %v5455_v51  ;;  %v5012_v2 = vor.u32 %v6550_v53, %v5009_v54  ;;  %v6522_v38 = vld [vmem:[%s10070_s3 + $0xec] sm:$0xf]  ;;  %v6099_v51 = vld [vmem:[%s10070_s3 + $0xa50] sm:$0xf]  ;;  %v6515_v52 = vld [vmem:[%s10070_s3 + $0xb4] sm:$0xf] }
 0x115   :  { %v4869_v53 = vld [vmem:[%s10070_s3 + $0xcc] sm:$0xf0]  ;;  %v6826_v54 = vld [vmem:[%s10070_s3 + $0xa68] sm:$0xf0]  ;;  %v5155_v28 = vld [vmem:[%s10070_s3 + $0x2e8] sm:$0xf] }
 0x116   :  { %3395 = vmatpush.bf16.msrb.mxu2 %v5568_v0  ;;  %v5289_v0 = vld [vmem:[%s10070_s3 + $0x414] sm:$0xf0] }
 0x117   :  { %3438 = vmatpush.bf16.msra.mxu1 %v6128_v60  ;;  %3460 = vmatpush.bf16.msra.mxu0 %v5124_v5  ;;  %v5120_v60 = vor.u32 %v6581_v49, %v5119_v48  ;;  %v5091_v5 = vld [vmem:[%s10070_s3 + $0x270] sm:$0xf]  ;;  %v6830_v48 = vld [vmem:[%s10070_s3 + $0xa8c] sm:$0xf]  ;;  %v6129_v49 = vld [vmem:[%s10070_s3 + $0xaa4] sm:$0xf0] }
 0x118   :  { %3347 = vmatpush.bf16.msrb.mxu3 %v6124_v13  ;;  %v6073_v13 = vld [vmem:[%s10070_s3 + $0xa34] sm:$0xf0] }
 0x119   :  { %3296 = vmatmul.bf16.vlgmr.msra.gmra.mxu3 %v8075_v1  ;;  %v6076_v18 = vor.u32 %v6816_v11, %v6073_v13  ;;  %v5183_v13 = vld [vmem:[%s10070_s3 + $0x320] sm:$0xf] }
 0x11a   :  { %3396 = vmatpush.bf16.msrb.mxu2 %v5540_v4  ;;  %v5063_v4 = vld [vmem:[%s10070_s3 + $0x238] sm:$0xf] }
 0x11b   :  { %3470 = vmatpush.bf16.msrb.mxu1 %v5432_v63  ;;  %3461 = vmatpush.bf16.msra.mxu0 %v5096_v22  ;;  %v6620_v63 = vld [vmem:[%s10070_s3 + $0x3fc] sm:$0xf]  ;;  %v4925_v22 = vld [vmem:[%s10070_s3 + $0x13c] sm:$0xf0] }
 0x11c   :  { %3366 = vmatpush.bf16.msra.mxu3 %v5204_v17  ;;  %v5292_v10 = vor.u32 %v6620_v63, %v5289_v0  ;;  %v4956_v17 = vor.u32 %v6536_v8, %v4953_v9  ;;  %v4872_v63 = vor.u32 %v6515_v52, %v4869_v53  ;;  %v6071_v0 = vld [vmem:[%s10070_s3 + $0xa18] sm:$0xf]  ;;  %v5212_v8 = vor.u32 %v6603_v59, %v5211_v58  ;;  %v6788_v9 = vld [vmem:[%s10070_s3 + $0x93c] sm:$0xf] }
 0x11d   :  { %v5099_v58 = vld [vmem:[%s10070_s3 + $0x278] sm:$0xf] }
 0x11e   :  { %3397 = vmatpush.bf16.msrb.mxu2 %v5512_v32  ;;  %v5035_v32 = vld [vmem:[%s10070_s3 + $0x200] sm:$0xf] }
 0x11f   :  { %3471 = vmatpush.bf16.msrb.mxu1 %v5404_v16  ;;  %3462 = vmatpush.bf16.msra.mxu0 %v5068_v37  ;;  %v5092_v16 = vor.u32 %v6574_v7, %v5091_v5  ;;  %v6560_v37 = vld [vmem:[%s10070_s3 + $0x218] sm:$0xf0]  ;;  %v6819_v5 = vld [vmem:[%s10070_s3 + $0xa30] sm:$0xf0]  ;;  %v4841_v7 = vld [vmem:[%s10070_s3 + $0x94] sm:$0xf0] }
 0x120   :  { %3367 = vmatpush.bf16.msra.mxu3 %v5176_v30  ;;  %v4928_v30 = vor.u32 %v6529_v21, %v4925_v22  ;;  %v4813_v21 = vld [vmem:[%s10070_s3 + $0x5c] sm:$0xf0]  ;;  %v5184_v22 = vor.u32 %v6596_v14, %v5183_v13  ;;  %v6568_v14 = vld [vmem:[%s10070_s3 + $0x258] sm:$0xf0] }
 0x122   :  { %3398 = vmatpush.bf16.msrb.mxu2 %v5484_v20  ;;  %6175 = vmatmul.msk.bf16.vlgmr.msra.gmra.mxu1 %vm3167_vm0, %v8398_v23  ;;  %v4900_v20 = vor.u32 %v6522_v38, %v4897_v40  ;;  %v4785_v38 = vld [vmem:[%s10070_s3 + $0x24] sm:$0xf0] }
 0x123   :  { %3472 = vmatpush.bf16.msrb.mxu1 %v5376_v29  ;;  %3463 = vmatpush.bf16.msra.mxu0 %v5040_v50  ;;  %v5064_v29 = vor.u32 %v6567_v19, %v5063_v4  ;;  %v6020_v50 = vor.u32 %v6802_v42, %v6017_v43  ;;  %v6501_v19 = vld [vmem:[%s10070_s3 + $0x44] sm:$0xf]  ;;  %v6774_v42 = vld [vmem:[%s10070_s3 + $0x8cc] sm:$0xf]  ;;  %v5905_v43 = vld [vmem:[%s10070_s3 + $0x8e4] sm:$0xf0] }
 0x124   :  { %3368 = vmatpush.bf16.msra.mxu3 %v5148_v46  ;;  %v5036_v46 = vor.u32 %v6560_v37, %v5035_v32  ;;  %v6015_v32 = vld [vmem:[%s10070_s3 + $0x9a8] sm:$0xf]  ;;  %v6494_v37 = vld [vmem:[%s10070_s3 + $0xc] sm:$0xf]  ;;  %v5908_v53 = vor.u32 %v6774_v42, %v5905_v43  ;;  %v5015_v42 = vld [vmem:[%s10070_s3 + $0x1d0] sm:$0xf] }
 0x125   :  { %v6554_v43 = vld [vmem:[%s10070_s3 + $0x1e8] sm:$0xf0] }
 0x126   :  { %3399 = vmatpush.bf16.msrb.mxu2 %v5456_v61  ;;  %v5008_v61 = vor.u32 %v6553_v47, %v5007_v45  ;;  %v5877_v47 = vld [vmem:[%s10070_s3 + $0x8ac] sm:$0xf0] }
 0x127   :  { %3473 = vmatpush.bf16.msrb.mxu1 %v5348_v44  ;;  %3464 = vmatpush.bf16.msra.mxu0 %v5012_v2  ;;  %v6160_v44 = vor.u32 %v6837_v34, %v6157_v35  ;;  %v6100_v2 = vor.u32 %v6826_v54, %v6099_v51  ;;  %v5936_v35 = vor.u32 %v6781_v25, %v5933_v26  ;;  %v5043_v25 = vld [vmem:[%s10070_s3 + $0x208] sm:$0xf] }
 0x128   :  { %3369 = vmatpush.bf16.msra.mxu3 %v5120_v60  ;;  %v8712_v60 = vld [vmem:[%s10072_s4] sm:$0x7f] }
 0x129   :  { %3400 = vmatmul.bf16.vlgmr.msrb.gmra.mxu2 %v8108_v39  ;;  %6174 = vmatmul.msk.bf16.vlgmr.msrb.gmra.mxu3 %vm3167_vm0, %v8398_v23  ;;  %v1353_v11 = vperm.slane %v8712_v60, 0 }
 0x12a   :  { %3444 = vmatpush.bf16.msra.mxu2 %v4984_v3  ;;  %3465 = vmatmul.bf16.vlgmr.msra.gmra.mxu0 %v8004_v33  ;;  %v5992_v3 = vor.u32 %v6795_v55, %v5989_v56  ;;  %v5987_v56 = vld [vmem:[%s10070_s3 + $0x970] sm:$0xf] }
 0x12b   :  { %3474 = vmatpush.bf16.msrb.mxu1 %v5320_v57  ;;  %3509 = vmatpush.bf16.msrb.mxu0 %v6104_v6  ;;  %v6132_v57 = vor.u32 %v6830_v48, %v6129_v49  ;;  %v6508_v6 = vld [vmem:[%s10070_s3 + $0x7c] sm:$0xf]  ;;  %v4788_v48 = vor.u32 %v6494_v37, %v4785_v38  ;;  %v5659_v49 = vld [vmem:[%s10070_s3 + $0x6d8] sm:$0xf]  ;;  %v5903_v37 = vld [vmem:[%s10070_s3 + $0x8c8] sm:$0xf] }
 0x12c   :  { %3370 = vmatpush.bf16.msra.mxu3 %v5092_v16  ;;  %v4844_v15 = vor.u32 %v6508_v6, %v4841_v7  ;;  %v3180_v16 = vpop.f32.mrf.mxu2 }
 0x12d   :  { %v3181_v27 = vadd.f32 %v3180_v16, %v1353_v11  ;;  %v5071_v11 = vld [vmem:[%s10070_s3 + $0x240] sm:$0xf] }
 0x12e   :  { %3445 = vmatpush.bf16.msra.mxu2 %v4956_v17  ;;  %v6072_v17 = vor.u32 %v6819_v5, %v6071_v0  ;;  %v5849_v0 = vld [vmem:[%s10070_s3 + $0x874] sm:$0xf0]  ;;  %v5821_v16 = vld [vmem:[%s10070_s3 + $0x83c] sm:$0xf0] }
 0x12f   :  { %3475 = vmatpush.bf16.msrb.mxu1 %v5292_v10  ;;  %3510 = vmatpush.bf16.msrb.mxu0 %v6076_v18  ;;  %v5961_v10 = vld [vmem:[%s10070_s3 + $0x954] sm:$0xf0]  ;;  %v6043_v18 = vld [vmem:[%s10070_s3 + $0x9e0] sm:$0xf] }
 0x130   :  { %3371 = vmatpush.bf16.msra.mxu3 %v5064_v29  ;;  %v5964_v4 = vor.u32 %v6788_v9, %v5961_v10  ;;  %v6589_v29 = vld [vmem:[%s10070_s3 + $0x300] sm:$0xf0]  ;;  %v5959_v9 = vld [vmem:[%s10070_s3 + $0x938] sm:$0xf]  ;;  %v6791_v10 = vld [vmem:[%s10070_s3 + $0x950] sm:$0xf0] }
 0x132   :  { %3446 = vmatpush.bf16.msra.mxu2 %v4928_v30  ;;  %v4816_v30 = vor.u32 %v6501_v19, %v4813_v21  ;;  %v5072_v19 = vor.u32 %v6568_v14, %v5071_v11  ;;  %v5597_v14 = vld [vmem:[%s10070_s3 + $0x67c] sm:$0xf0] }
 0x133   :  { %3476 = vmatpush.bf16.msrb.mxu1 %v5264_v24  ;;  %3511 = vmatpush.bf16.msrb.mxu0 %v6048_v36  ;;  %v6812_v24 = vld [vmem:[%s10070_s3 + $0x9f8] sm:$0xf0]  ;;  %v6805_v36 = vld [vmem:[%s10070_s3 + $0x9c0] sm:$0xf0] }
 0x134   :  { %3372 = vmatpush.bf16.msra.mxu3 %v5036_v46  ;;  %v6044_v34 = vor.u32 %v6812_v24, %v6043_v18  ;;  %v3193_v40 = vpop.f32.mrf.mxu3  ;;  %v6582_v46 = vld [vmem:[%s10070_s3 + $0x2c8] sm:$0xf0]  ;;  %v3182_v51 = vpop.f32.mrf.mxu2  ;;  %v6016_v52 = vor.u32 %v6805_v36, %v6015_v32  ;;  %v5960_v18 = vor.u32 %v6791_v10, %v5959_v9  ;;  %v6784_v24 = vld [vmem:[%s10070_s3 + $0x918] sm:$0xf0]  ;;  %v5575_v32 = vld [vmem:[%s10070_s3 + $0x630] sm:$0xf] }
 0x135   :  { %v8786_v45 = vadd.f32 %v3193_v40, %v3181_v27  ;;  %v6561_v27 = vld [vmem:[%s10070_s3 + $0x220] sm:$0xf0]  ;;  %v6107_v51 = vld [vmem:[%s10070_s3 + $0xa58] sm:$0xf] }
 0x136   :  { %3447 = vmatpush.bf16.msra.mxu2 %v4900_v20  ;;  %v6767_v20 = vld [vmem:[%s10070_s3 + $0x894] sm:$0xf]  ;;  %v5044_v38 = vor.u32 %v6561_v27, %v5043_v25 }
 0x137   :  { %3477 = vmatpush.bf16.msrb.mxu1 %v5236_v41  ;;  %3512 = vmatpush.bf16.msrb.mxu0 %v6020_v50  ;;  %v5156_v41 = vor.u32 %v6589_v29, %v5155_v28  ;;  %v6715_v50 = vld [vmem:[%s10070_s3 + $0x6f0] sm:$0xf0]  ;;  %v5880_v55 = vor.u32 %v6767_v20, %v5877_v47  ;;  %v6746_v28 = vld [vmem:[%s10070_s3 + $0x7ec] sm:$0xf]  ;;  %v5793_v29 = vld [vmem:[%s10070_s3 + $0x804] sm:$0xf0] }
 0x138   :  { %3373 = vmatpush.bf16.msra.mxu3 %v5008_v61  ;;  %v5660_v59 = vor.u32 %v6715_v50, %v5659_v49  ;;  %v6575_v61 = vld [vmem:[%s10070_s3 + $0x290] sm:$0xf0]  ;;  %v5796_v40 = vor.u32 %v6746_v28, %v5793_v29  ;;  %v5765_v47 = vld [vmem:[%s10070_s3 + $0x7cc] sm:$0xf0]  ;;  %v5569_v28 = vld [vmem:[%s10070_s3 + $0x644] sm:$0xf0] }
 0x139   :  { %v5100_v7 = vor.u32 %v6575_v61, %v5099_v58  ;;  %v6739_v20 = vld [vmem:[%s10070_s3 + $0x7b4] sm:$0xf]  ;;  %v6704_v58 = vld [vmem:[%s10070_s3 + $0x69c] sm:$0xf]  ;;  %v6718_v29 = vld [vmem:[%s10070_s3 + $0x70c] sm:$0xf] }
 0x13a   :  { %3478 = vmatmul.bf16.vlgmr.msrb.gmra.mxu1 %v8075_v1  ;;  %3448 = vmatpush.bf16.msra.mxu2 %v4872_v63  ;;  %v6760_v63 = vld [vmem:[%s10070_s3 + $0x85c] sm:$0xf]  ;;  %v6687_v49 = vld [vmem:[%s10070_s3 + $0x610] sm:$0xf0] }
 0x13b   :  { %3528 = vmatpush.bf16.msra.mxu1 %v6160_v44  ;;  %3513 = vmatpush.bf16.msrb.mxu0 %v5992_v3  ;;  %v5127_v44 = vld [vmem:[%s10070_s3 + $0x2b0] sm:$0xf]  ;;  %v6708_v3 = vld [vmem:[%s10070_s3 + $0x6b8] sm:$0xf0] }
 0x13c   :  { %3418 = vmatpush.bf16.msrb.mxu3 %v6100_v2  ;;  %v5128_v54 = vor.u32 %v6582_v46, %v5127_v44  ;;  %v5631_v2 = vld [vmem:[%s10070_s3 + $0x6a0] sm:$0xf]  ;;  %v3195_v6 = vpop.f32.mrf.mxu3  ;;  %v5653_v46 = vld [vmem:[%s10070_s3 + $0x6ec] sm:$0xf0]  ;;  %v6732_v61 = vld [vmem:[%s10070_s3 + $0x77c] sm:$0xf] }
 0x13d   :  { %3374 = vmatmul.bf16.vlgmr.msra.gmra.mxu3 %v8004_v33  ;;  %v5632_v13 = vor.u32 %v6708_v3, %v5631_v2  ;;  %v5737_v3 = vld [vmem:[%s10070_s3 + $0x794] sm:$0xf0]  ;;  %v6680_v6 = vld [vmem:[%s10070_s3 + $0x5d8] sm:$0xf0] }
 0x13e   :  { %3449 = vmatpush.bf16.msra.mxu2 %v4844_v15  ;;  %v6753_v15 = vld [vmem:[%s10070_s3 + $0x824] sm:$0xf]  ;;  %v5740_v10 = vor.u32 %v6732_v61, %v5737_v3  ;;  %v5513_v3 = vld [vmem:[%s10070_s3 + $0x5d4] sm:$0xf0] }
 0x13f   :  { %3529 = vmatpush.bf16.msra.mxu1 %v6132_v57  ;;  %3514 = vmatpush.bf16.msrb.mxu0 %v5964_v4  ;;  %v6798_v57 = vld [vmem:[%s10070_s3 + $0x988] sm:$0xf0]  ;;  %v6701_v4 = vld [vmem:[%s10070_s3 + $0x680] sm:$0xf0]  ;;  %v5824_v21 = vor.u32 %v6753_v15, %v5821_v16 }
 0x140   :  { %3419 = vmatpush.bf16.msrb.mxu3 %v6072_v17  ;;  %v5988_v5 = vor.u32 %v6798_v57, %v5987_v56  ;;  %v5603_v17 = vld [vmem:[%s10070_s3 + $0x668] sm:$0xf]  ;;  %v5768_v56 = vor.u32 %v6739_v20, %v5765_v47  ;;  %v6725_v15 = vld [vmem:[%s10070_s3 + $0x744] sm:$0xf] }
 0x141   :  { %v5604_v26 = vor.u32 %v6701_v4, %v5603_v17  ;;  %v5709_v17 = vld [vmem:[%s10070_s3 + $0x75c] sm:$0xf0]  ;;  %v5491_v4 = vld [vmem:[%s10070_s3 + $0x588] sm:$0xf] }
 0x142   :  { %3450 = vmatpush.bf16.msra.mxu2 %v4816_v30 }
 0x143   :  { %3548 = vmatpush.bf16.msrb.mxu1 %v5212_v8  ;;  %3515 = vmatpush.bf16.msrb.mxu0 %v5936_v35  ;;  %v5852_v8 = vor.u32 %v6760_v63, %v5849_v0 }
 0x144   :  { %3420 = vmatpush.bf16.msrb.mxu3 %v6044_v34  ;;  %v6694_v34 = vld [vmem:[%s10070_s3 + $0x648] sm:$0xf0] }
 0x145   :  { %v5576_v44 = vor.u32 %v6694_v34, %v5575_v32 }
 0x146   :  { %3451 = vmatpush.bf16.msra.mxu2 %v4788_v48  ;;  %v3206_v30 = vpop.f32.mrf.mxu0  ;;  %v5547_v48 = vld [vmem:[%s10070_s3 + $0x5f8] sm:$0xf] }
 0x147   :  { %3549 = vmatpush.bf16.msrb.mxu1 %v5184_v22  ;;  %3516 = vmatpush.bf16.msrb.mxu0 %v5908_v53  ;;  %v5931_v22 = vld [vmem:[%s10070_s3 + $0x900] sm:$0xf]  ;;  %v3207_v36 = vadd.f32 %v3206_v30, %v8786_v45  ;;  %v6711_v45 = vld [vmem:[%s10070_s3 + $0x6d4] sm:$0xf]  ;;  %v5016_v53 = vor.u32 %v6554_v43, %v5015_v42  ;;  %v5548_v57 = vor.u32 %v6687_v49, %v5547_v48  ;;  %v5681_v30 = vld [vmem:[%s10070_s3 + $0x724] sm:$0xf0] }
 0x148   :  { %3421 = vmatpush.bf16.msrb.mxu3 %v6016_v52  ;;  %v5932_v35 = vor.u32 %v6784_v24, %v5931_v22  ;;  %v6827_v52 = vld [vmem:[%s10070_s3 + $0xa70] sm:$0xf0]  ;;  %v6690_v24 = vld [vmem:[%s10070_s3 + $0x62c] sm:$0xf]  ;;  %v6544_v43 = vld [vmem:[%s10070_s3 + $0x19c] sm:$0xf] }
 0x149   :  { %3452 = vmatmul.bf16.vlgmr.msra.gmra.mxu2 %v7971_v12  ;;  %v6108_v0 = vor.u32 %v6827_v52, %v6107_v51  ;;  %v5572_v42 = vor.u32 %v6690_v24, %v5569_v28  ;;  %v6683_v48 = vld [vmem:[%s10070_s3 + $0x5f4] sm:$0xf]  ;;  %v5541_v49 = vld [vmem:[%s10070_s3 + $0x60c] sm:$0xf0]  ;;  %v6662_v28 = vld [vmem:[%s10070_s3 + $0x54c] sm:$0xf] }
 0x14a   :  { %3496 = vmatpush.bf16.msrb.mxu2 %v5880_v55  ;;  %6176 = vmatmul.msk.bf16.vlgmr.msra.gmra.mxu1 %vm3167_vm0, %v8398_v23  ;;  %v6799_v52 = vld [vmem:[%s10070_s3 + $0x990] sm:$0xf0] }
 0x14b   :  { %3550 = vmatpush.bf16.msrb.mxu1 %v5156_v41  ;;  %3574 = vmatpush.bf16.msra.mxu0 %v5660_v59  ;;  %v6777_v41 = vld [vmem:[%s10070_s3 + $0x8e0] sm:$0xf0]  ;;  %v5625_v59 = vld [vmem:[%s10070_s3 + $0x6b4] sm:$0xf0]  ;;  %v6523_v24 = vld [vmem:[%s10070_s3 + $0xf4] sm:$0xf] }
 0x14c   :  { %3517 = vmatmul.bf16.vlgmr.msrb.gmra.mxu0 %v8251_v62  ;;  %3422 = vmatpush.bf16.msrb.mxu3 %v5988_v5  ;;  %v5904_v50 = vor.u32 %v6777_v41, %v5903_v37  ;;  %v5519_v5 = vld [vmem:[%s10070_s3 + $0x5c0] sm:$0xf]  ;;  %v5628_v9 = vor.u32 %v6704_v58, %v5625_v59  ;;  %v6023_v37 = vld [vmem:[%s10070_s3 + $0x9b0] sm:$0xf]  ;;  %v6659_v41 = vld [vmem:[%s10070_s3 + $0x530] sm:$0xf0]  ;;  %v5544_v58 = vor.u32 %v6683_v48, %v5541_v49 }
 0x14d   :  { %v5520_v11 = vor.u32 %v6680_v6, %v5519_v5  ;;  %v5967_v5 = vld [vmem:[%s10070_s3 + $0x940] sm:$0xf]  ;;  %v5661_v48 = vld [vmem:[%s10070_s3 + $0x6f4] sm:$0xf0] }
 0x14e   :  { %3497 = vmatpush.bf16.msrb.mxu2 %v5852_v8  ;;  %v3219_v55 = vpop.f32.mrf.mxu1  ;;  %v3208_v2 = vpop.f32.mrf.mxu0  ;;  %v6820_v8 = vld [vmem:[%s10070_s3 + $0xa38] sm:$0xf0] }
 0x14f   :  { %3551 = vmatpush.bf16.msrb.mxu1 %v5128_v54  ;;  %3575 = vmatpush.bf16.msra.mxu0 %v5632_v13  ;;  %v5656_v54 = vor.u32 %v6711_v45, %v5653_v46  ;;  %v8925_v63 = vadd.f32 %v3219_v55, %v3207_v36  ;;  %v6697_v13 = vld [vmem:[%s10070_s3 + $0x664] sm:$0xf]  ;;  %v6666_v36 = vld [vmem:[%s10070_s3 + $0x568] sm:$0xf0]  ;;  %v5684_v45 = vor.u32 %v6718_v29, %v5681_v30  ;;  %v6676_v2 = vld [vmem:[%s10070_s3 + $0x5bc] sm:$0xf] }
 0x150   :  { %3423 = vmatpush.bf16.msrb.mxu3 %v5960_v18  ;;  %v6673_v18 = vld [vmem:[%s10070_s3 + $0x5a0] sm:$0xf0]  ;;  %v5600_v22 = vor.u32 %v6697_v13, %v5597_v14  ;;  %v5516_v13 = vor.u32 %v6676_v2, %v5513_v3  ;;  %v5633_v3 = vld [vmem:[%s10070_s3 + $0x6bc] sm:$0xf0] }
 0x151   :  { %v5492_v27 = vor.u32 %v6673_v18, %v5491_v4  ;;  %v6537_v55 = vld [vmem:[%s10070_s3 + $0x164] sm:$0xf]  ;;  %v5939_v4 = vld [vmem:[%s10070_s3 + $0x908] sm:$0xf] }
 0x152   :  { %3498 = vmatpush.bf16.msrb.mxu2 %v5824_v21  ;;  %v6813_v21 = vld [vmem:[%s10070_s3 + $0xa00] sm:$0xf0] }
 0x153   :  { %3552 = vmatpush.bf16.msrb.mxu1 %v5100_v7  ;;  %3576 = vmatpush.bf16.msra.mxu0 %v5604_v26  ;;  %v6079_v7 = vld [vmem:[%s10070_s3 + $0xa20] sm:$0xf]  ;;  %v5712_v26 = vor.u32 %v6725_v15, %v5709_v17  ;;  %v6705_v2 = vld [vmem:[%s10070_s3 + $0x6a4] sm:$0xf] }
 0x154   :  { %3424 = vmatpush.bf16.msrb.mxu3 %v5932_v35  ;;  %v6080_v16 = vor.u32 %v6820_v8, %v6079_v7  ;;  %v5463_v35 = vld [vmem:[%s10070_s3 + $0x550] sm:$0xf]  ;;  %v6792_v7 = vld [vmem:[%s10070_s3 + $0x958] sm:$0xf0]  ;;  %v5379_v8 = vld [vmem:[%s10070_s3 + $0x4a8] sm:$0xf] }
 0x155   :  { %v5464_v46 = vor.u32 %v6666_v36, %v5463_v35  ;;  %v5968_v14 = vor.u32 %v6792_v7, %v5967_v5  ;;  %v5485_v17 = vld [vmem:[%s10070_s3 + $0x59c] sm:$0xf0]  ;;  %v5457_v35 = vld [vmem:[%s10070_s3 + $0x564] sm:$0xf0]  ;;  %v5911_v36 = vld [vmem:[%s10070_s3 + $0x8d0] sm:$0xf] }
 0x156   :  { %3499 = vmatpush.bf16.msrb.mxu2 %v5796_v40  ;;  %v3221_v25 = vpop.f32.mrf.mxu1  ;;  %v8980_v34 = vpop.f32.mrf.mxu0  ;;  %v5435_v40 = vld [vmem:[%s10070_s3 + $0x518] sm:$0xf] }
 0x157   :  { %3553 = vmatpush.bf16.msrb.mxu1 %v5072_v19  ;;  %3577 = vmatpush.bf16.msra.mxu0 %v5576_v44  ;;  %v6051_v19 = vld [vmem:[%s10070_s3 + $0x9e8] sm:$0xf]  ;;  %v4989_v44 = vld [vmem:[%s10070_s3 + $0x1b4] sm:$0xf0]  ;;  %v5436_v47 = vor.u32 %v6659_v41, %v5435_v40  ;;  %v4905_v25 = vld [vmem:[%s10070_s3 + $0x10c] sm:$0xf0] }
 0x158   :  { %3425 = vmatpush.bf16.msrb.mxu3 %v5904_v50  ;;  %v6052_v32 = vor.u32 %v6813_v21, %v6051_v19  ;;  %v5995_v50 = vld [vmem:[%s10070_s3 + $0x978] sm:$0xf]  ;;  %v4992_v51 = vor.u32 %v6544_v43, %v4989_v44  ;;  %v6785_v19 = vld [vmem:[%s10070_s3 + $0x920] sm:$0xf0]  ;;  %v5351_v21 = vld [vmem:[%s10070_s3 + $0x470] sm:$0xf] }
 0x159   :  { %v5996_v59 = vor.u32 %v6799_v52, %v5995_v50  ;;  %v5940_v29 = vor.u32 %v6785_v19, %v5939_v4  ;;  %v4987_v40 = vld [vmem:[%s10070_s3 + $0x198] sm:$0xf]  ;;  %v6547_v41 = vld [vmem:[%s10070_s3 + $0x1b0] sm:$0xf0]  ;;  %v6516_v44 = vld [vmem:[%s10070_s3 + $0xbc] sm:$0xf] }
 0x15a   :  { %3500 = vmatpush.bf16.msrb.mxu2 %v5768_v56  ;;  %v4961_v56 = vld [vmem:[%s10070_s3 + $0x17c] sm:$0xf0]  ;;  %v6631_v43 = vld [vmem:[%s10070_s3 + $0x450] sm:$0xf0]  ;;  %v6698_v19 = vld [vmem:[%s10070_s3 + $0x66c] sm:$0xf] }
 0x15b   :  { %3554 = vmatpush.bf16.msrb.mxu1 %v5044_v38  ;;  %3578 = vmatpush.bf16.msra.mxu0 %v5548_v57  ;;  %v6806_v38 = vld [vmem:[%s10070_s3 + $0x9c8] sm:$0xf0]  ;;  %v4964_v6 = vor.u32 %v6537_v55, %v4961_v56  ;;  %v6540_v55 = vld [vmem:[%s10070_s3 + $0x178] sm:$0xf0]  ;;  %v5295_v56 = vld [vmem:[%s10070_s3 + $0x400] sm:$0xf] }
 0x15c   :  { %3483 = vmatpush.bf16.msra.mxu3 %v5656_v54  ;;  %v6024_v20 = vor.u32 %v6806_v38, %v6023_v37  ;;  %v6652_v54 = vld [vmem:[%s10070_s3 + $0x4f8] sm:$0xf0]  ;;  %v6778_v37 = vld [vmem:[%s10070_s3 + $0x8e8] sm:$0xf0]  ;;  %v4908_v38 = vor.u32 %v6523_v24, %v4905_v25  ;;  %v4903_v25 = vld [vmem:[%s10070_s3 + $0xf0] sm:$0xf] }
 0x15d   :  { %3426 = vmatmul.bf16.vlgmr.msrb.gmra.mxu3 %v8251_v62  ;;  %v5912_v50 = vor.u32 %v6778_v37, %v5911_v36  ;;  %v4793_v36 = vld [vmem:[%s10070_s3 + $0x2c] sm:$0xf0]  ;;  %v6691_v37 = vld [vmem:[%s10070_s3 + $0x634] sm:$0xf] }
 0x15e   :  { %3501 = vmatpush.bf16.msrb.mxu2 %v5740_v10  ;;  %v9030_v57 = vpop.f32.mrf.mxu1  ;;  %v3312_v61 = vpop.f32.mrf.mxu0  ;;  %v6530_v10 = vld [vmem:[%s10070_s3 + $0x12c] sm:$0xf] }
 0x15f   :  { %3555 = vmatpush.bf16.msrb.mxu1 %v5016_v53  ;;  %3579 = vmatpush.bf16.msra.mxu0 %v5520_v11  ;;  %v5407_v53 = vld [vmem:[%s10070_s3 + $0x4e0] sm:$0xf]  ;;  %v4933_v11 = vld [vmem:[%s10070_s3 + $0x144] sm:$0xf0] }
 0x160   :  { %3484 = vmatpush.bf16.msra.mxu3 %v5628_v9  ;;  %v6645_v9 = vld [vmem:[%s10070_s3 + $0x4c0] sm:$0xf0]  ;;  %v4936_v18 = vor.u32 %v6530_v10, %v4933_v11  ;;  %v4849_v61 = vld [vmem:[%s10070_s3 + $0x9c] sm:$0xf0]  ;;  %v5267_v11 = vld [vmem:[%s10070_s3 + $0x3c8] sm:$0xf] }
 0x161   :  { %v5380_v15 = vor.u32 %v6645_v9, %v5379_v8  ;;  %v4931_v9 = vld [vmem:[%s10070_s3 + $0x128] sm:$0xf]  ;;  %v6533_v10 = vld [vmem:[%s10070_s3 + $0x140] sm:$0xf0] }
 0x162   :  { %3556 = vmatmul.bf16.vlgmr.msrb.gmra.mxu1 %v8004_v33  ;;  %3502 = vmatpush.bf16.msrb.mxu2 %v5712_v26  ;;  %v4932_v24 = vor.u32 %v6533_v10, %v4931_v9  ;;  %v6512_v9 = vld [vmem:[%s10070_s3 + $0x98] sm:$0xf0] }
 0x163   :  { %3600 = vmatpush.bf16.msra.mxu1 %v6108_v0  ;;  %3580 = vmatpush.bf16.msra.mxu0 %v5492_v27  ;;  %v5408_v0 = vor.u32 %v6652_v54, %v5407_v53  ;;  %v4959_v54 = vld [vmem:[%s10070_s3 + $0x160] sm:$0xf] }
 0x164   :  { %3485 = vmatpush.bf16.msra.mxu3 %v5600_v22  ;;  %v6638_v22 = vld [vmem:[%s10070_s3 + $0x488] sm:$0xf0] }
 0x166   :  { %3503 = vmatpush.bf16.msrb.mxu2 %v5684_v45  ;;  %v3273_v26 = vpop.f32.mrf.mxu1  ;;  %v9085_v30 = vpop.f32.mrf.mxu0  ;;  %v4877_v45 = vld [vmem:[%s10070_s3 + $0xd4] sm:$0xf0] }
 0x167   :  { %3601 = vmatpush.bf16.msra.mxu1 %v6080_v16  ;;  %3581 = vmatpush.bf16.msra.mxu0 %v5464_v46  ;;  %v6669_v16 = vld [vmem:[%s10070_s3 + $0x584] sm:$0xf]  ;;  %v4880_v53 = vor.u32 %v6516_v44, %v4877_v45  ;;  %v6768_v44 = vld [vmem:[%s10070_s3 + $0x89c] sm:$0xf]  ;;  %v5885_v45 = vld [vmem:[%s10070_s3 + $0x8b4] sm:$0xf0] }
 0x168   :  { %3486 = vmatpush.bf16.msra.mxu3 %v5572_v42  ;;  %v5488_v27 = vor.u32 %v6669_v16, %v5485_v17  ;;  %v5323_v42 = vld [vmem:[%s10070_s3 + $0x438] sm:$0xf]  ;;  %v6502_v16 = vld [vmem:[%s10070_s3 + $0x4c] sm:$0xf]  ;;  %v4821_v17 = vld [vmem:[%s10070_s3 + $0x64] sm:$0xf0] }
 0x169   :  { %3504 = vmatmul.bf16.vlgmr.msrb.gmra.mxu2 %v8202_v31  ;;  %v5324_v52 = vor.u32 %v6631_v43, %v5323_v42  ;;  %v6841_v42 = vld [vmem:[%s10070_s3 + $0xae0] sm:$0xf0] }
 0x16a   :  { %3561 = vmatpush.bf16.msra.mxu2 %v5436_v47  ;;  %3582 = vmatmul.bf16.vlgmr.msra.gmra.mxu0 %v8108_v39  ;;  %v6712_v47 = vld [vmem:[%s10070_s3 + $0x6dc] sm:$0xf] }
 0x16b   :  { %3602 = vmatpush.bf16.msra.mxu1 %v6052_v32  ;;  %3626 = vmatpush.bf16.msrb.mxu0 %v4992_v51  ;;  %v5352_v32 = vor.u32 %v6638_v22, %v5351_v21  ;;  %v4988_v51 = vor.u32 %v6547_v41, %v4987_v40  ;;  %v5605_v21 = vld [vmem:[%s10070_s3 + $0x684] sm:$0xf0]  ;;  %v1354_v22 = vperm.slane %v8712_v60, 1  ;;  %v6610_v60 = vld [vmem:[%s10070_s3 + $0x3a8] sm:$0xf0] }
 0x16c   :  { %3487 = vmatpush.bf16.msra.mxu3 %v5544_v58  ;;  %v3232_v46 = vpop.f32.mrf.mxu2  ;;  %v5664_v58 = vor.u32 %v6712_v47, %v5661_v48  ;;  %v5577_v40 = vld [vmem:[%s10070_s3 + $0x64c] sm:$0xf0]  ;;  %v6163_v41 = vld [vmem:[%s10070_s3 + $0xac8] sm:$0xf]  ;;  %v4875_v47 = vld [vmem:[%s10070_s3 + $0xb8] sm:$0xf] }
 0x16d   :  { %v3233_v49 = vadd.f32 %v3232_v46, %v8925_v63  ;;  %v6624_v63 = vld [vmem:[%s10070_s3 + $0x418] sm:$0xf0]  ;;  %v3272_v48 = vadd.f32 %v9030_v57, %v1354_v22  ;;  %v6135_v57 = vld [vmem:[%s10070_s3 + $0xa90] sm:$0xf]  ;;  %v4819_v22 = vld [vmem:[%s10070_s3 + $0x48] sm:$0xf] }
 0x16e   :  { %3562 = vmatpush.bf16.msra.mxu2 %v5408_v0  ;;  %v3364_v5 = vpop.f32.mrf.mxu0  ;;  %v5296_v7 = vor.u32 %v6624_v63, %v5295_v56  ;;  %v6761_v63 = vld [vmem:[%s10070_s3 + $0x864] sm:$0xf] }
 0x16f   :  { %3603 = vmatpush.bf16.msra.mxu1 %v6024_v20  ;;  %3627 = vmatpush.bf16.msrb.mxu0 %v4964_v6  ;;  %v5460_v20 = vor.u32 %v6662_v28, %v5457_v35  ;;  %v4960_v6 = vor.u32 %v6540_v55, %v4959_v54  ;;  %v6526_v28 = vld [vmem:[%s10070_s3 + $0x108] sm:$0xf0]  ;;  %v6495_v35 = vld [vmem:[%s10070_s3 + $0x14] sm:$0xf]  ;;  %v5549_v54 = vld [vmem:[%s10070_s3 + $0x614] sm:$0xf0]  ;;  %v5888_v55 = vor.u32 %v6768_v44, %v5885_v45 }
 0x170   :  { %3488 = vmatpush.bf16.msra.mxu3 %v5516_v13  ;;  %v5636_v13 = vor.u32 %v6705_v2, %v5633_v3  ;;  %v4904_v43 = vor.u32 %v6526_v28, %v4903_v25  ;;  %v6600_v2 = vld [vmem:[%s10070_s3 + $0x35c] sm:$0xf]  ;;  %v5213_v3 = vld [vmem:[%s10070_s3 + $0x374] sm:$0xf0]  ;;  %v6670_v28 = vld [vmem:[%s10070_s3 + $0x58c] sm:$0xf] }
 0x171   :  { %v9139_v0 = vpop.f32.mrf.mxu1  ;;  %v5465_v44 = vld [vmem:[%s10070_s3 + $0x56c] sm:$0xf0] }
 0x172   :  { %3563 = vmatpush.bf16.msra.mxu2 %v5380_v15  ;;  %v6617_v15 = vld [vmem:[%s10070_s3 + $0x3e0] sm:$0xf0] }
 0x173   :  { %3604 = vmatpush.bf16.msra.mxu1 %v5996_v59  ;;  %3628 = vmatpush.bf16.msrb.mxu0 %v4936_v18  ;;  %v6509_v59 = vld [vmem:[%s10070_s3 + $0x84] sm:$0xf]  ;;  %v5268_v26 = vor.u32 %v6617_v15, %v5267_v11  ;;  %v5216_v11 = vor.u32 %v6600_v2, %v5213_v3  ;;  %v6754_v15 = vld [vmem:[%s10070_s3 + $0x82c] sm:$0xf]  ;;  %v5855_v2 = vld [vmem:[%s10070_s3 + $0x860] sm:$0xf] }
 0x174   :  { %3489 = vmatpush.bf16.msra.mxu3 %v5488_v27  ;;  %v4852_v8 = vor.u32 %v6509_v59, %v4849_v61  ;;  %v3234_v18 = vpop.f32.mrf.mxu2  ;;  %v4824_v27 = vor.u32 %v6502_v16, %v4821_v17  ;;  %v5857_v61 = vld [vmem:[%s10070_s3 + $0x87c] sm:$0xf0]  ;;  %v5829_v16 = vld [vmem:[%s10070_s3 + $0x844] sm:$0xf0]  ;;  %v6593_v17 = vld [vmem:[%s10070_s3 + $0x324] sm:$0xf] }
 0x175   :  { %v5860_v10 = vor.u32 %v6761_v63, %v5857_v61  ;;  %v5185_v18 = vld [vmem:[%s10070_s3 + $0x33c] sm:$0xf0]  ;;  %v5832_v25 = vor.u32 %v6754_v15, %v5829_v16  ;;  %v6764_v3 = vld [vmem:[%s10070_s3 + $0x878] sm:$0xf0] }
 0x176   :  { %3564 = vmatpush.bf16.msra.mxu2 %v5352_v32  ;;  %v5608_v32 = vor.u32 %v6698_v19, %v5605_v21  ;;  %v5856_v15 = vor.u32 %v6764_v3, %v5855_v2  ;;  %v5017_v3 = vld [vmem:[%s10070_s3 + $0x1ec] sm:$0xf0] }
 0x177   :  { %3605 = vmatpush.bf16.msra.mxu1 %v5968_v14  ;;  %3629 = vmatpush.bf16.msrb.mxu0 %v4908_v38  ;;  %v3245_v14 = vpop.f32.mrf.mxu3 }
 0x178   :  { %3490 = vmatpush.bf16.msra.mxu3 %v5460_v20  ;;  %v9167_v4 = vadd.f32 %v3245_v14, %v3233_v49  ;;  %v4796_v20 = vor.u32 %v6495_v35, %v4793_v36  ;;  %v5580_v49 = vor.u32 %v6691_v37, %v5577_v40  ;;  %v5521_v14 = vld [vmem:[%s10070_s3 + $0x5dc] sm:$0xf0]  ;;  %v6586_v35 = vld [vmem:[%s10070_s3 + $0x2ec] sm:$0xf]  ;;  %v5157_v36 = vld [vmem:[%s10070_s3 + $0x304] sm:$0xf0] }
 0x179   :  { %v3325_v38 = vpop.f32.mrf.mxu1  ;;  %v4791_v40 = vld [vmem:[%s10070_s3 + $0x10] sm:$0xf] }
 0x17a   :  { %3565 = vmatpush.bf16.msra.mxu2 %v5324_v52  ;;  %v6519_v52 = vld [vmem:[%s10070_s3 + $0xd0] sm:$0xf0] }
 0x17b   :  { %3606 = vmatpush.bf16.msra.mxu1 %v5940_v29  ;;  %3630 = vmatpush.bf16.msrb.mxu0 %v4880_v53  ;;  %v5239_v29 = vld [vmem:[%s10070_s3 + $0x390] sm:$0xf]  ;;  %v6684_v53 = vld [vmem:[%s10070_s3 + $0x5fc] sm:$0xf]  ;;  %v4876_v5 = vor.u32 %v6519_v52, %v4875_v47  ;;  %v6771_v47 = vld [vmem:[%s10070_s3 + $0x8b0] sm:$0xf0] }
 0x17c   :  { %3535 = vmatpush.bf16.msrb.mxu3 %v4988_v51  ;;  %v5240_v46 = vor.u32 %v6610_v60, %v5239_v29  ;;  %v6164_v51 = vor.u32 %v6841_v42, %v6163_v41  ;;  %v3284_v56 = vpop.f32.mrf.mxu2  ;;  %v5493_v29 = vld [vmem:[%s10070_s3 + $0x5a4] sm:$0xf0]  ;;  %v6747_v60 = vld [vmem:[%s10070_s3 + $0x7f4] sm:$0xf]  ;;  %v6498_v42 = vld [vmem:[%s10070_s3 + $0x28] sm:$0xf0] }
 0x17d   :  { %3491 = vmatmul.bf16.vlgmr.msra.gmra.mxu3 %v8108_v39  ;;  %v9234_v59 = vadd.f32 %v3284_v56, %v3272_v48  ;;  %v5496_v41 = vor.u32 %v6670_v28, %v5493_v29  ;;  %v6740_v48 = vld [vmem:[%s10070_s3 + $0x7bc] sm:$0xf]  ;;  %v6565_v28 = vld [vmem:[%s10070_s3 + $0x244] sm:$0xf]  ;;  %v5073_v29 = vld [vmem:[%s10070_s3 + $0x25c] sm:$0xf0] }
 0x17e   :  { %3566 = vmatpush.bf16.msra.mxu2 %v5296_v7 }
 0x17f   :  { %3607 = vmatpush.bf16.msra.mxu1 %v5912_v50  ;;  %3631 = vmatpush.bf16.msrb.mxu0 %v4852_v8  ;;  %v3247_v50 = vpop.f32.mrf.mxu3  ;;  %v4847_v8 = vld [vmem:[%s10070_s3 + $0x80] sm:$0xf] }
 0x180   :  { %3536 = vmatpush.bf16.msrb.mxu3 %v4960_v6  ;;  %v5552_v6 = vor.u32 %v6684_v53, %v5549_v54  ;;  %v4848_v19 = vor.u32 %v6512_v9, %v4847_v8  ;;  %v4995_v50 = vld [vmem:[%s10070_s3 + $0x1a0] sm:$0xf]  ;;  %v4792_v53 = vor.u32 %v6498_v42, %v4791_v40  ;;  %v6579_v54 = vld [vmem:[%s10070_s3 + $0x2b4] sm:$0xf]  ;;  %v4967_v9 = vld [vmem:[%s10070_s3 + $0x168] sm:$0xf] }
 0x181   :  { %v5745_v8 = vld [vmem:[%s10070_s3 + $0x79c] sm:$0xf0]  ;;  %v6719_v40 = vld [vmem:[%s10070_s3 + $0x714] sm:$0xf] }
 0x182   :  { %3608 = vmatmul.bf16.vlgmr.msra.gmra.mxu1 %v8251_v62  ;;  %3567 = vmatpush.bf16.msra.mxu2 %v5268_v26  ;;  %v5188_v26 = vor.u32 %v6593_v17, %v5185_v18  ;;  %v5827_v18 = vld [vmem:[%s10070_s3 + $0x828] sm:$0xf] }
 0x183   :  { %3665 = vmatpush.bf16.msrb.mxu1 %v5664_v58  ;;  %3632 = vmatpush.bf16.msrb.mxu0 %v4824_v27  ;;  %v6834_v58 = vld [vmem:[%s10070_s3 + $0xaa8] sm:$0xf0] }
 0x184   :  { %3537 = vmatpush.bf16.msrb.mxu3 %v4932_v24  ;;  %v6136_v7 = vor.u32 %v6834_v58, %v6135_v57  ;;  %v6505_v24 = vld [vmem:[%s10070_s3 + $0x60] sm:$0xf0]  ;;  %v3286_v27 = vpop.f32.mrf.mxu2 }
 0x185   :  { %v4820_v38 = vor.u32 %v6505_v24, %v4819_v22  ;;  %v5717_v24 = vld [vmem:[%s10070_s3 + $0x764] sm:$0xf0] }
 0x186   :  { %3568 = vmatpush.bf16.msra.mxu2 %v5240_v46  ;;  %v5160_v46 = vor.u32 %v6586_v35, %v5157_v36 }
 0x187   :  { %3666 = vmatpush.bf16.msrb.mxu1 %v5636_v13  ;;  %3633 = vmatpush.bf16.msrb.mxu0 %v4796_v20  ;;  %v6677_v13 = vld [vmem:[%s10070_s3 + $0x5c4] sm:$0xf]  ;;  %v9295_v37 = vpop.f32.mrf.mxu0  ;;  %v5883_v20 = vld [vmem:[%s10070_s3 + $0x898] sm:$0xf] }
 0x188   :  { %3538 = vmatpush.bf16.msrb.mxu3 %v4904_v43  ;;  %v5524_v21 = vor.u32 %v6677_v13, %v5521_v14  ;;  %v6663_v43 = vld [vmem:[%s10070_s3 + $0x554] sm:$0xf]  ;;  %v5884_v58 = vor.u32 %v6771_v47, %v5883_v20  ;;  %v6572_v13 = vld [vmem:[%s10070_s3 + $0x27c] sm:$0xf]  ;;  %v5101_v14 = vld [vmem:[%s10070_s3 + $0x294] sm:$0xf0] }
 0x189   :  { %3569 = vmatmul.bf16.vlgmr.msra.gmra.mxu2 %v8075_v1  ;;  %v5468_v57 = vor.u32 %v6663_v43, %v5465_v44  ;;  %v5104_v22 = vor.u32 %v6572_v13, %v5101_v14  ;;  %v5076_v43 = vor.u32 %v6565_v28, %v5073_v29  ;;  %v6558_v20 = vld [vmem:[%s10070_s3 + $0x20c] sm:$0xf]  ;;  %v5045_v47 = vld [vmem:[%s10070_s3 + $0x224] sm:$0xf0]  ;;  %v5743_v14 = vld [vmem:[%s10070_s3 + $0x780] sm:$0xf] }
 0x18a   :  { %3619 = vmatpush.bf16.msrb.mxu2 %v6164_v51  ;;  %3634 = vmatmul.bf16.vlgmr.msrb.gmra.mxu0 %v7971_v12  ;;  %v6548_v51 = vld [vmem:[%s10070_s3 + $0x1b8] sm:$0xf0] }
 0x18b   :  { %3667 = vmatpush.bf16.msrb.mxu1 %v5608_v32  ;;  %3678 = vmatpush.bf16.msra.mxu0 %v5888_v55  ;;  %v5801_v32 = vld [vmem:[%s10070_s3 + $0x80c] sm:$0xf0]  ;;  %v4996_v61 = vor.u32 %v6548_v51, %v4995_v50 }
 0x18c   :  { %3539 = vmatpush.bf16.msrb.mxu3 %v4876_v5  ;;  %v5804_v45 = vor.u32 %v6747_v60, %v5801_v32  ;;  %v3258_v52 = vpop.f32.mrf.mxu3  ;;  %v5129_v55 = vld [vmem:[%s10070_s3 + $0x2cc] sm:$0xf0]  ;;  %v6733_v5 = vld [vmem:[%s10070_s3 + $0x784] sm:$0xf] }
 0x18d   :  { %v9334_v56 = vadd.f32 %v3258_v52, %v9167_v4  ;;  %v5748_v16 = vor.u32 %v6733_v5, %v5745_v8  ;;  %v5799_v32 = vld [vmem:[%s10070_s3 + $0x7f0] sm:$0xf]  ;;  %v5415_v5 = vld [vmem:[%s10070_s3 + $0x4e8] sm:$0xf] }
 0x18e   :  { %3620 = vmatpush.bf16.msrb.mxu2 %v6136_v7  ;;  %v9347_v7 = vpop.f32.mrf.mxu2 }
 0x18f   :  { %3668 = vmatpush.bf16.msrb.mxu1 %v5580_v49  ;;  %3679 = vmatpush.bf16.msra.mxu0 %v5860_v10  ;;  %v5773_v49 = vld [vmem:[%s10070_s3 + $0x7d4] sm:$0xf0]  ;;  %v9345_v4 = vpop.f32.mrf.mxu1  ;;  %v6541_v10 = vld [vmem:[%s10070_s3 + $0x180] sm:$0xf0] }
 0x190   :  { %3540 = vmatpush.bf16.msrb.mxu3 %v4848_v19  ;;  %v5776_v63 = vor.u32 %v6740_v48, %v5773_v49  ;;  %v4968_v17 = vor.u32 %v6541_v10, %v4967_v9  ;;  %v6757_v19 = vld [vmem:[%s10070_s3 + $0x840] sm:$0xf0]  ;;  %v5443_v48 = vld [vmem:[%s10070_s3 + $0x520] sm:$0xf]  ;;  %v6660_v49 = vld [vmem:[%s10070_s3 + $0x538] sm:$0xf0] }
 0x191   :  { %v5828_v60 = vor.u32 %v6757_v19, %v5827_v18  ;;  %v6824_v10 = vld [vmem:[%s10070_s3 + $0xa5c] sm:$0xf]  ;;  %v4855_v18 = vld [vmem:[%s10070_s3 + $0x88] sm:$0xf]  ;;  %v6513_v19 = vld [vmem:[%s10070_s3 + $0xa0] sm:$0xf0] }
 0x192   :  { %3639 = vmatpush.bf16.msra.mxu2 %v5216_v11  ;;  %v3416_v11 = vpop.f32.mrf.mxu0  ;;  %v4856_v29 = vor.u32 %v6513_v19, %v4855_v18  ;;  %v6765_v18 = vld [vmem:[%s10070_s3 + $0x880] sm:$0xf0] }
 0x193   :  { %3669 = vmatpush.bf16.msrb.mxu1 %v5552_v6  ;;  %3680 = vmatpush.bf16.msra.mxu0 %v5832_v25  ;;  %v5132_v6 = vor.u32 %v6579_v54, %v5129_v55  ;;  %v4939_v25 = vld [vmem:[%s10070_s3 + $0x130] sm:$0xf]  ;;  %v6743_v54 = vld [vmem:[%s10070_s3 + $0x7d0] sm:$0xf0]  ;;  %v5048_v55 = vor.u32 %v6558_v20, %v5045_v47  ;;  %v6109_v11 = vld [vmem:[%s10070_s3 + $0xa74] sm:$0xf0] }
 0x194   :  { %3541 = vmatpush.bf16.msrb.mxu3 %v4820_v38  ;;  %v3260_v27 = vpop.f32.mrf.mxu3  ;;  %v6750_v38 = vld [vmem:[%s10070_s3 + $0x808] sm:$0xf0] }
 0x195   :  { %v5800_v50 = vor.u32 %v6750_v38, %v5799_v32  ;;  %v6081_v27 = vld [vmem:[%s10070_s3 + $0xa3c] sm:$0xf0]  ;;  %v6729_v32 = vld [vmem:[%s10070_s3 + $0x760] sm:$0xf0]  ;;  %v6722_v47 = vld [vmem:[%s10070_s3 + $0x728] sm:$0xf0] }
 0x196   :  { %3640 = vmatpush.bf16.msra.mxu2 %v5188_v26  ;;  %v6534_v26 = vld [vmem:[%s10070_s3 + $0x148] sm:$0xf0]  ;;  %v3338_v44 = vpop.f32.mrf.mxu2 }
 0x197   :  { %3670 = vmatpush.bf16.msrb.mxu1 %v5524_v21  ;;  %3681 = vmatpush.bf16.msra.mxu0 %v5804_v45  ;;  %v6726_v21 = vld [vmem:[%s10070_s3 + $0x74c] sm:$0xf]  ;;  %v4940_v36 = vor.u32 %v6534_v26, %v4939_v25  ;;  %v3390_v42 = vpop.f32.mrf.mxu1  ;;  %v4911_v45 = vld [vmem:[%s10070_s3 + $0xf8] sm:$0xf]  ;;  %v6817_v26 = vld [vmem:[%s10070_s3 + $0xa24] sm:$0xf] }
 0x198   :  { %3542 = vmatpush.bf16.msrb.mxu3 %v4792_v53  ;;  %v5720_v35 = vor.u32 %v6726_v21, %v5717_v24  ;;  %v5771_v53 = vld [vmem:[%s10070_s3 + $0x7b8] sm:$0xf]  ;;  %v5387_v24 = vld [vmem:[%s10070_s3 + $0x4b0] sm:$0xf] }
 0x199   :  { %6177 = vmatmul.msk.bf16.vlgmr.msrb.gmra.mxu2 %vm3167_vm0, %v8398_v23  ;;  %v5772_v9 = vor.u32 %v6743_v54, %v5771_v53  ;;  %v5359_v42 = vld [vmem:[%s10070_s3 + $0x478] sm:$0xf]  ;;  %v5331_v54 = vld [vmem:[%s10070_s3 + $0x440] sm:$0xf] }
 0x19a   :  { %3641 = vmatpush.bf16.msra.mxu2 %v5160_v46  ;;  %v6527_v46 = vld [vmem:[%s10070_s3 + $0x110] sm:$0xf0]  ;;  %v5437_v53 = vld [vmem:[%s10070_s3 + $0x534] sm:$0xf0] }
 0x19b   :  { %3671 = vmatpush.bf16.msrb.mxu1 %v5496_v41  ;;  %3682 = vmatpush.bf16.msra.mxu0 %v5776_v63  ;;  %v5689_v41 = vld [vmem:[%s10070_s3 + $0x72c] sm:$0xf0]  ;;  %v4912_v52 = vor.u32 %v6527_v46, %v4911_v45  ;;  %v6520_v63 = vld [vmem:[%s10070_s3 + $0xd8] sm:$0xf0]  ;;  %v6810_v45 = vld [vmem:[%s10070_s3 + $0x9ec] sm:$0xf] }
 0x19c   :  { %3587 = vmatpush.bf16.msra.mxu3 %v5884_v58  ;;  %v5692_v51 = vor.u32 %v6719_v40, %v5689_v41  ;;  %v4883_v58 = vld [vmem:[%s10070_s3 + $0xc0] sm:$0xf]  ;;  %v3297_v2 = vpop.f32.mrf.mxu3  ;;  %v6084_v40 = vor.u32 %v6817_v26, %v6081_v27  ;;  %v5687_v46 = vld [vmem:[%s10070_s3 + $0x710] sm:$0xf] }
 0x19d   :  { %3543 = vmatmul.bf16.vlgmr.msrb.gmra.mxu3 %v7971_v12  ;;  %v3298_v8 = vadd.f32 %v3297_v2, %v9234_v59  ;;  %v4884_v13 = vor.u32 %v6520_v63, %v4883_v58  ;;  %v6736_v59 = vld [vmem:[%s10070_s3 + $0x798] sm:$0xf0]  ;;  %v5891_v63 = vld [vmem:[%s10070_s3 + $0x8a0] sm:$0xf]  ;;  %v5688_v2 = vor.u32 %v6722_v47, %v5687_v46  ;;  %v5247_v46 = vld [vmem:[%s10070_s3 + $0x398] sm:$0xf] }
 0x19e   :  { %3642 = vmatpush.bf16.msra.mxu2 %v5132_v6  ;;  %v6653_v6 = vld [vmem:[%s10070_s3 + $0x500] sm:$0xf0]  ;;  %v5744_v25 = vor.u32 %v6736_v59, %v5743_v14  ;;  %v6632_v58 = vld [vmem:[%s10070_s3 + $0x458] sm:$0xf0]  ;;  %v5303_v14 = vld [vmem:[%s10070_s3 + $0x408] sm:$0xf] }
 0x19f   :  { %3672 = vmatpush.bf16.msrb.mxu1 %v5468_v57  ;;  %3683 = vmatpush.bf16.msra.mxu0 %v5748_v16  ;;  %v5444_v57 = vor.u32 %v6660_v49, %v5443_v48  ;;  %v9466_v21 = vpop.f32.mrf.mxu1  ;;  %v4799_v48 = vld [vmem:[%s10070_s3 + $0x18] sm:$0xf]  ;;  %v6499_v49 = vld [vmem:[%s10070_s3 + $0x30] sm:$0xf0] }
 0x1a0   :  { %3588 = vmatpush.bf16.msra.mxu3 %v5856_v15  ;;  %v3311_v15 = vadd.f32 %v8980_v34, %v3298_v8  ;;  %v6646_v34 = vld [vmem:[%s10070_s3 + $0x4c8] sm:$0xf0] }
 0x1a2   :  { %3673 = vmatmul.bf16.vlgmr.msrb.gmra.mxu1 %v8108_v39  ;;  %3643 = vmatpush.bf16.msra.mxu2 %v5104_v22  ;;  %v6112_v22 = vor.u32 %v6824_v10, %v6109_v11  ;;  %v3324_v28 = vadd.f32 %v9139_v0, %v3311_v15  ;;  %v6506_v0 = vld [vmem:[%s10070_s3 + $0x68] sm:$0xf0]  ;;  %v6649_v11 = vld [vmem:[%s10070_s3 + $0x4e4] sm:$0xf] }
 0x1a3   :  { %3717 = vmatpush.bf16.msra.mxu1 %v4996_v61  ;;  %3684 = vmatpush.bf16.msra.mxu0 %v5720_v35  ;;  %v6551_v61 = vld [vmem:[%s10070_s3 + $0x1d4] sm:$0xf]  ;;  %v5388_v35 = vor.u32 %v6646_v34, %v5387_v24  ;;  %v5997_v24 = vld [vmem:[%s10070_s3 + $0x994] sm:$0xf0] }
 0x1a4   :  { %3589 = vmatpush.bf16.msra.mxu3 %v5828_v60  ;;  %v5020_v16 = vor.u32 %v6551_v61, %v5017_v3  ;;  %v5715_v60 = vld [vmem:[%s10070_s3 + $0x748] sm:$0xf]  ;;  %v9495_v38 = vadd.f32 %v9347_v7, %v3324_v28  ;;  %v3299_v41 = vpop.f32.mrf.mxu3  ;;  %v6772_v61 = vld [vmem:[%s10070_s3 + $0x8b8] sm:$0xf0]  ;;  %v6803_v3 = vld [vmem:[%s10070_s3 + $0x9b4] sm:$0xf] }
 0x1a5   :  { %v5716_v44 = vor.u32 %v6729_v32, %v5715_v60  ;;  %v6053_v7 = vld [vmem:[%s10070_s3 + $0xa04] sm:$0xf0]  ;;  %v5892_v10 = vor.u32 %v6772_v61, %v5891_v63  ;;  %v6642_v28 = vld [vmem:[%s10070_s3 + $0x4ac] sm:$0xf]  ;;  %v5275_v60 = vld [vmem:[%s10070_s3 + $0x3d0] sm:$0xf] }
 0x1a6   :  { %3644 = vmatpush.bf16.msra.mxu2 %v5076_v43  ;;  %v6639_v43 = vld [vmem:[%s10070_s3 + $0x490] sm:$0xf0]  ;;  %v6789_v41 = vld [vmem:[%s10070_s3 + $0x944] sm:$0xf] }
 0x1a7   :  { %3718 = vmatpush.bf16.msra.mxu1 %v4968_v17  ;;  %3685 = vmatpush.bf16.msra.mxu0 %v5692_v51  ;;  %v5416_v17 = vor.u32 %v6653_v6, %v5415_v5  ;;  %v5360_v51 = vor.u32 %v6639_v43, %v5359_v42  ;;  %v6025_v5 = vld [vmem:[%s10070_s3 + $0x9cc] sm:$0xf0]  ;;  %v4800_v6 = vor.u32 %v6499_v49, %v4799_v48  ;;  %v5969_v42 = vld [vmem:[%s10070_s3 + $0x95c] sm:$0xf0]  ;;  %v5807_v49 = vld [vmem:[%s10070_s3 + $0x7f8] sm:$0xf] }
 0x1a8   :  { %3590 = vmatpush.bf16.msra.mxu3 %v5800_v50  ;;  %v9522_v50 = vpop.f32.mrf.mxu0  ;;  %v6028_v15 = vor.u32 %v6803_v3, %v6025_v5  ;;  %v5972_v48 = vor.u32 %v6789_v41, %v5969_v42  ;;  %v9637_v63 = vld [vmem:[%s10072_s4] sm:$0x7f]  ;;  %v6628_v5 = vld [vmem:[%s10070_s3 + $0x43c] sm:$0xf]  ;;  %v5639_v42 = vld [vmem:[%s10070_s3 + $0x6a8] sm:$0xf] }
 0x1a9   :  { %v1355_v61 = vperm.slane %v9637_v63, 2 }
 0x1aa   :  { %3645 = vmatpush.bf16.msra.mxu2 %v5048_v55  ;;  %3686 = vmatmul.bf16.vlgmr.msra.gmra.mxu0 %v8202_v31  ;;  %v3442_v55 = vpop.f32.mrf.mxu1 }
 0x1ab   :  { %3719 = vmatpush.bf16.msra.mxu1 %v4940_v36  ;;  %3743 = vmatpush.bf16.msrb.mxu0 %v5444_v57  ;;  %v4827_v36 = vld [vmem:[%s10070_s3 + $0x50] sm:$0xf]  ;;  %v6056_v57 = vor.u32 %v6810_v45, %v6053_v7 }
 0x1ac   :  { %3591 = vmatpush.bf16.msra.mxu3 %v5772_v9  ;;  %v4828_v20 = vor.u32 %v6506_v0, %v4827_v36  ;;  %v5332_v9 = vor.u32 %v6632_v58, %v5331_v54  ;;  %v9557_v59 = vpop.f32.mrf.mxu2  ;;  %v9568_v19 = vpop.f32.mrf.mxu3  ;;  %v5835_v36 = vld [vmem:[%s10070_s3 + $0x830] sm:$0xf]  ;;  %v6758_v0 = vld [vmem:[%s10070_s3 + $0x848] sm:$0xf0]  ;;  %v5941_v54 = vld [vmem:[%s10070_s3 + $0x924] sm:$0xf0] }
 0x1ad   :  { %v5353_v7 = vld [vmem:[%s10070_s3 + $0x48c] sm:$0xf0] }
 0x1ae   :  { %3646 = vmatpush.bf16.msra.mxu2 %v5020_v16  ;;  %v6625_v16 = vld [vmem:[%s10070_s3 + $0x420] sm:$0xf0]  ;;  %v6171_v55 = vld [vmem:[%s10070_s3 + $0xad0] sm:$0xf] }
 0x1af   :  { %3720 = vmatpush.bf16.msra.mxu1 %v4912_v52  ;;  %3744 = vmatpush.bf16.msrb.mxu0 %v5416_v17  ;;  %v6656_v52 = vld [vmem:[%s10070_s3 + $0x51c] sm:$0xf]  ;;  %v5863_v17 = vld [vmem:[%s10070_s3 + $0x868] sm:$0xf]  ;;  %v5304_v26 = vor.u32 %v6625_v16, %v5303_v14  ;;  %v6143_v16 = vld [vmem:[%s10070_s3 + $0xa98] sm:$0xf] }
 0x1b0   :  { %3592 = vmatpush.bf16.msra.mxu3 %v5744_v25  ;;  %v5440_v8 = vor.u32 %v6656_v52, %v5437_v53  ;;  %v3468_v25 = vpop.f32.mrf.mxu0  ;;  %v5864_v27 = vor.u32 %v6765_v18, %v5863_v17  ;;  %v6782_v52 = vld [vmem:[%s10070_s3 + $0x90c] sm:$0xf]  ;;  %v6835_v17 = vld [vmem:[%s10070_s3 + $0xab0] sm:$0xf0] }
 0x1b1   :  { %3647 = vmatmul.bf16.vlgmr.msra.gmra.mxu2 %v8004_v33  ;;  %v6621_v25 = vld [vmem:[%s10070_s3 + $0x404] sm:$0xf] }
 0x1b2   :  { %3691 = vmatpush.bf16.msrb.mxu2 %v6112_v22  ;;  %v6796_v22 = vld [vmem:[%s10070_s3 + $0x97c] sm:$0xf] }
 0x1b3   :  { %3721 = vmatpush.bf16.msra.mxu1 %v4884_v13  ;;  %3745 = vmatpush.bf16.msrb.mxu0 %v5388_v35  ;;  %v5409_v13 = vld [vmem:[%s10070_s3 + $0x4fc] sm:$0xf0]  ;;  %v6000_v32 = vor.u32 %v6796_v22, %v5997_v24  ;;  %v6618_v35 = vld [vmem:[%s10070_s3 + $0x3e8] sm:$0xf0]  ;;  %v6716_v24 = vld [vmem:[%s10070_s3 + $0x6f8] sm:$0xf0] }
 0x1b4   :  { %3593 = vmatpush.bf16.msra.mxu3 %v5716_v44  ;;  %v5412_v34 = vor.u32 %v6649_v11, %v5409_v13  ;;  %v6635_v44 = vld [vmem:[%s10070_s3 + $0x474] sm:$0xf]  ;;  %v5276_v45 = vor.u32 %v6618_v35, %v5275_v60  ;;  %v3403_v47 = vpop.f32.mrf.mxu2  ;;  %v3351_v53 = vpop.f32.mrf.mxu3  ;;  %v6744_v11 = vld [vmem:[%s10070_s3 + $0x7d8] sm:$0xf0]  ;;  %v5667_v22 = vld [vmem:[%s10070_s3 + $0x6e0] sm:$0xf] }
 0x1b5   :  { %v5356_v58 = vor.u32 %v6635_v44, %v5353_v7  ;;  %v6775_v13 = vld [vmem:[%s10070_s3 + $0x8d4] sm:$0xf]  ;;  %v5751_v60 = vld [vmem:[%s10070_s3 + $0x788] sm:$0xf] }
 0x1b6   :  { %3692 = vmatpush.bf16.msrb.mxu2 %v6084_v40 }
 0x1b7   :  { %3722 = vmatpush.bf16.msra.mxu1 %v4856_v29  ;;  %3746 = vmatpush.bf16.msrb.mxu0 %v5360_v51  ;;  %v5381_v29 = vld [vmem:[%s10070_s3 + $0x4c4] sm:$0xf0]  ;;  %v9596_v40 = vpop.f32.mrf.mxu1  ;;  %v6751_v51 = vld [vmem:[%s10070_s3 + $0x810] sm:$0xf0] }
 0x1b8   :  { %3594 = vmatpush.bf16.msra.mxu3 %v5688_v2  ;;  %v5384_v43 = vor.u32 %v6642_v28, %v5381_v29  ;;  %v5808_v3 = vor.u32 %v6751_v51, %v5807_v49  ;;  %v6144_v29 = vor.u32 %v6835_v17, %v6143_v16  ;;  %v6702_v51 = vld [vmem:[%s10070_s3 + $0x688] sm:$0xf0]  ;;  %v6866_v16 = vld [vmem:[%s10073_s5 + $0xb8] sm:$0xff]  ;;  %v6831_v17 = vld [vmem:[%s10070_s3 + $0xa94] sm:$0xf] }
 0x1ba   :  { %3693 = vmatpush.bf16.msrb.mxu2 %v6056_v57  ;;  %v6842_v57 = vld [vmem:[%s10070_s3 + $0xae8] sm:$0xf0] }
 0x1bb   :  { %3723 = vmatpush.bf16.msra.mxu1 %v4828_v20  ;;  %3747 = vmatpush.bf16.msrb.mxu0 %v5332_v9  ;;  %v6611_v20 = vld [vmem:[%s10070_s3 + $0x3b0] sm:$0xf0]  ;;  %v6172_v9 = vor.u32 %v6842_v57, %v6171_v55  ;;  %v5241_v57 = vld [vmem:[%s10070_s3 + $0x3ac] sm:$0xf0] }
 0x1bc   :  { %3652 = vmatpush.bf16.msrb.mxu3 %v5440_v8  ;;  %v5248_v2 = vor.u32 %v6611_v20, %v5247_v46  ;;  %v5944_v8 = vor.u32 %v6782_v52, %v5941_v54  ;;  %v5723_v46 = vld [vmem:[%s10070_s3 + $0x750] sm:$0xf]  ;;  %v6730_v20 = vld [vmem:[%s10070_s3 + $0x768] sm:$0xf0]  ;;  %v6607_v55 = vld [vmem:[%s10070_s3 + $0x394] sm:$0xf] }
 0x1bd   :  { %3595 = vmatmul.bf16.vlgmr.msra.gmra.mxu3 %v8202_v31  ;;  %v5724_v54 = vor.u32 %v6730_v20, %v5723_v46  ;;  %v6853_v46 = vld [vmem:[%s10073_s5 + $0x50] sm:$0xff] }
 0x1be   :  { %3694 = vmatpush.bf16.msrb.mxu2 %v6028_v15  ;;  %v5913_v15 = vld [vmem:[%s10070_s3 + $0x8ec] sm:$0xf0] }
 0x1bf   :  { %3724 = vmatpush.bf16.msra.mxu1 %v4800_v6  ;;  %3748 = vmatpush.bf16.msrb.mxu0 %v5304_v26  ;;  %v5325_v6 = vld [vmem:[%s10070_s3 + $0x454] sm:$0xf0]  ;;  %v3481_v14 = vpop.f32.mrf.mxu1  ;;  %v5297_v26 = vld [vmem:[%s10070_s3 + $0x41c] sm:$0xf0]  ;;  %v5916_v28 = vor.u32 %v6775_v13, %v5913_v15  ;;  %v6695_v13 = vld [vmem:[%s10070_s3 + $0x650] sm:$0xf0] }
 0x1c0   :  { %3653 = vmatpush.bf16.msrb.mxu3 %v5412_v34  ;;  %v5328_v18 = vor.u32 %v6628_v5, %v5325_v6  ;;  %v3375_v35 = vpop.f32.mrf.mxu3  ;;  %v5300_v41 = vor.u32 %v6621_v25, %v5297_v26  ;;  %v1356_v15 = vperm.slane %v9637_v63, 3  ;;  %v6604_v25 = vld [vmem:[%s10070_s3 + $0x378] sm:$0xf0]  ;;  %v5163_v20 = vld [vmem:[%s10070_s3 + $0x2f0] sm:$0xf] }
 0x1c2   :  { %3725 = vmatmul.bf16.vlgmr.msra.gmra.mxu1 %v7971_v12  ;;  %v5836_v12 = vor.u32 %v6758_v0, %v5835_v36  ;;  %3695 = vmatpush.bf16.msrb.mxu2 %v6000_v32  ;;  %v6737_v32 = vld [vmem:[%s10070_s3 + $0x7a0] sm:$0xf0]  ;;  %v5668_v36 = vor.u32 %v6716_v24, %v5667_v22  ;;  %v6858_v0 = vld [vmem:[%s10073_s5 + $0x78] sm:$0xff] }
 0x1c3   :  { %3769 = vmatpush.bf16.msrb.mxu1 %v5892_v10  ;;  %3749 = vmatpush.bf16.msrb.mxu0 %v5276_v45  ;;  %v5779_v10 = vld [vmem:[%s10070_s3 + $0x7c0] sm:$0xf]  ;;  %v5752_v44 = vor.u32 %v6737_v32, %v5751_v60  ;;  %v6614_v45 = vld [vmem:[%s10070_s3 + $0x3cc] sm:$0xf] }
 0x1c4   :  { %3654 = vmatpush.bf16.msrb.mxu3 %v5384_v43  ;;  %v5780_v34 = vor.u32 %v6744_v11, %v5779_v10  ;;  %v6709_v43 = vld [vmem:[%s10070_s3 + $0x6c0] sm:$0xf0]  ;;  %v5244_v10 = vor.u32 %v6607_v55, %v5241_v57  ;;  %v5583_v11 = vld [vmem:[%s10070_s3 + $0x638] sm:$0xf]  ;;  %v6852_v55 = vld [vmem:[%s10073_s5 + $0x48] sm:$0xff] }
 0x1c5   :  { %v5640_v47 = vor.u32 %v6709_v43, %v5639_v42  ;;  %v5584_v22 = vor.u32 %v6695_v13, %v5583_v11  ;;  %v6855_v24 = vld [vmem:[%s10073_s5 + $0x60] sm:$0xff]  ;;  %v6854_v42 = vld [vmem:[%s10073_s5 + $0x58] sm:$0xff]  ;;  %v5191_v43 = vld [vmem:[%s10070_s3 + $0x328] sm:$0xf] }
 0x1c6   :  { %3696 = vmatpush.bf16.msrb.mxu2 %v5972_v48  ;;  %v6857_v48 = vld [vmem:[%s10073_s5 + $0x70] sm:$0xff]  ;;  %v5135_v57 = vld [vmem:[%s10070_s3 + $0x2b8] sm:$0xf]  ;;  %v5107_v13 = vld [vmem:[%s10070_s3 + $0x280] sm:$0xf] }
 0x1c7   :  { %3770 = vmatpush.bf16.msrb.mxu1 %v5864_v27  ;;  %3750 = vmatpush.bf16.msrb.mxu0 %v5248_v2  ;;  %v3363_v27 = vadd.f32 %v9085_v30, %v1355_v61  ;;  %v9717_v53 = vpop.f32.mrf.mxu1  ;;  %v6838_v2 = vld [vmem:[%s10070_s3 + $0xacc] sm:$0xf]  ;;  %v6850_v11 = vld [vmem:[%s10073_s5 + $0x38] sm:$0xff] }
 0x1c8   :  { %3655 = vmatpush.bf16.msrb.mxu3 %v5356_v58  ;;  %v5695_v58 = vld [vmem:[%s10070_s3 + $0x718] sm:$0xf]  ;;  %v3377_v6 = vpop.f32.mrf.mxu3 }
 0x1c9   :  { %v3376_v30 = vadd.f32 %v3375_v35, %v3363_v27  ;;  %v9728_v61 = vpop.f32.mrf.mxu0  ;;  %v5555_v27 = vld [vmem:[%s10070_s3 + $0x600] sm:$0xf]  ;;  %v6862_v6 = vld [vmem:[%s10073_s5 + $0x98] sm:$0xff] }
 0x1ca   :  { %3697 = vmatpush.bf16.msrb.mxu2 %v5944_v8  ;;  %3751 = vmatmul.bf16.vlgmr.msrb.gmra.mxu0 %v8075_v1 }
 0x1cb   :  { %3771 = vmatpush.bf16.msrb.mxu1 %v5836_v12  ;;  %3801 = vmatpush.bf16.msra.mxu0 %v6172_v9  ;;  %v5269_v12 = vld [vmem:[%s10070_s3 + $0x3e4] sm:$0xf0]  ;;  %v3389_v7 = vadd.f32 %v9345_v4, %v3376_v30  ;;  %v5611_v4 = vld [vmem:[%s10070_s3 + $0x670] sm:$0xf] }
 0x1cc   :  { %3656 = vmatpush.bf16.msrb.mxu3 %v5328_v18  ;;  %v5272_v49 = vor.u32 %v6614_v45, %v5269_v12  ;;  %v5612_v8 = vor.u32 %v6702_v51, %v5611_v4  ;;  %v6856_v9 = vld [vmem:[%s10073_s5 + $0x68] sm:$0xff]  ;;  %v6137_v18 = vld [vmem:[%s10070_s3 + $0xaac] sm:$0xf0]  ;;  %v3453_v26 = vpop.f32.mrf.mxu2  ;;  %v6681_v45 = vld [vmem:[%s10070_s3 + $0x5e0] sm:$0xf0] }
 0x1cd   :  { %v3402_v52 = vadd.f32 %v9557_v59, %v3389_v7  ;;  %v6723_v59 = vld [vmem:[%s10070_s3 + $0x730] sm:$0xf0]  ;;  %v6140_v32 = vor.u32 %v6831_v17, %v6137_v18  ;;  %v6863_v4 = vld [vmem:[%s10073_s5 + $0xa0] sm:$0xff] }
 0x1ce   :  { %3698 = vmatpush.bf16.msrb.mxu2 %v5916_v28  ;;  %v6688_v28 = vld [vmem:[%s10070_s3 + $0x618] sm:$0xf0]  ;;  %v6861_v17 = vld [vmem:[%s10073_s5 + $0x90] sm:$0xff] }
 0x1cf   :  { %3772 = vmatpush.bf16.msrb.mxu1 %v5808_v3  ;;  %3802 = vmatpush.bf16.msra.mxu0 %v6144_v29  ;;  %v6165_v3 = vld [vmem:[%s10070_s3 + $0xae4] sm:$0xf0]  ;;  %v9740_v5 = vadd.f32 %v9295_v37, %v3402_v52  ;;  %v5696_v37 = vor.u32 %v6723_v59, %v5695_v58  ;;  %v3454_v29 = vadd.f32 %v3453_v26, %v1356_v15  ;;  %v3533_v60 = vpop.f32.mrf.mxu1  ;;  %v6583_v58 = vld [vmem:[%s10070_s3 + $0x2d0] sm:$0xf0] }
 0x1d0   :  { %3657 = vmatpush.bf16.msrb.mxu3 %v5300_v41  ;;  %v6168_v14 = vor.u32 %v6838_v2, %v6165_v3  ;;  %v5556_v41 = vor.u32 %v6688_v28, %v5555_v27  ;;  %v3350_v59 = vadd.f32 %v9568_v19, %v9495_v38  ;;  %v5471_v2 = vld [vmem:[%s10070_s3 + $0x558] sm:$0xf]  ;;  %v6667_v3 = vld [vmem:[%s10070_s3 + $0x570] sm:$0xf0]  ;;  %v6851_v38 = vld [vmem:[%s10073_s5 + $0x40] sm:$0xff] }
 0x1d1   :  { %3699 = vmatmul.bf16.vlgmr.msrb.gmra.mxu2 %v8251_v62  ;;  %v3520_v35 = vpop.f32.mrf.mxu0  ;;  %v3467_v30 = vadd.f32 %v9522_v50, %v3454_v29  ;;  %v5527_v50 = vld [vmem:[%s10070_s3 + $0x5c8] sm:$0xf]  ;;  %v6562_v28 = vld [vmem:[%s10070_s3 + $0x228] sm:$0xf0]  ;;  %v6859_v29 = vld [vmem:[%s10073_s5 + $0x80] sm:$0xff] }
 0x1d2   :  { %3756 = vmatpush.bf16.msra.mxu2 %v5668_v36  ;;  %v6865_v36 = vld [vmem:[%s10073_s5 + $0xb0] sm:$0xff]  ;;  %v5528_v7 = vor.u32 %v6681_v45, %v5527_v50  ;;  %v3809_v19 = vmax.f32 %v3350_v59, 0.0  ;;  %v6848_v27 = vld [vmem:[%s10073_s5 + $0x28] sm:$0xff]  ;;  %v6847_v35 = vld [vmem:[%s10073_s5 + $0x20] sm:$0xff] }
 0x1d3   :  { %3773 = vmatpush.bf16.msrb.mxu1 %v5780_v34  ;;  %4242 = vmatpush.bf16.msrb.mxu0 %v6858_v0  ;;  %v5219_v34 = vld [vmem:[%s10070_s3 + $0x360] sm:$0xf]  ;;  %v9800_v12 = vadd.f32 %v9596_v40, %v3467_v30  ;;  %v6590_v40 = vld [vmem:[%s10070_s3 + $0x308] sm:$0xf0] }
 0x1d4   :  { %3658 = vmatpush.bf16.msrb.mxu3 %v5272_v49  ;;  %v5220_v0 = vor.u32 %v6604_v25, %v5219_v34  ;;  %v6674_v49 = vld [vmem:[%s10070_s3 + $0x5a8] sm:$0xf0]  ;;  %v5164_v51 = vor.u32 %v6590_v40, %v5163_v20  ;;  %v6115_v30 = vld [vmem:[%s10070_s3 + $0xa60] sm:$0xf]  ;;  %v6845_v20 = vld [vmem:[%s10073_s5 + $0x10] sm:$0xff] }
 0x1d5   :  { %v6059_v40 = vld [vmem:[%s10070_s3 + $0x9f0] sm:$0xf]  ;;  %v6003_v59 = vld [vmem:[%s10070_s3 + $0x980] sm:$0xf] }
 0x1d6   :  { %3757 = vmatpush.bf16.msra.mxu2 %v5640_v47  ;;  %v3455_v47 = vpop.f32.mrf.mxu2 }
 0x1d7   :  { %3774 = vmatpush.bf16.msrb.mxu1 %v5752_v44  ;;  %4243 = vmatpush.bf16.msrb.mxu0 %v6857_v48  ;;  %v6597_v44 = vld [vmem:[%s10070_s3 + $0x340] sm:$0xf0]  ;;  %v5499_v48 = vld [vmem:[%s10070_s3 + $0x590] sm:$0xf]  ;;  %v6814_v47 = vld [vmem:[%s10070_s3 + $0xa08] sm:$0xf0] }
 0x1d8   :  { %3659 = vmatpush.bf16.msrb.mxu3 %v5244_v10 }
 0x1da   :  { %3758 = vmatpush.bf16.msra.mxu2 %v5612_v8  ;;  %6179 = vmatmul.msk.bf16.vlgmr.msra.gmra.mxu0 %vm3167_vm0, %v8398_v23  ;;  %v5136_v8 = vor.u32 %v6583_v58, %v5135_v57  ;;  %v6843_v57 = vld [vmem:[%s10073_s5] sm:$0xff]  ;;  %v3808_v58 = vmax.f32 %v9334_v56, 0.0  ;;  %v5975_v56 = vld [vmem:[%s10070_s3 + $0x948] sm:$0xf] }
 0x1db   :  { %3775 = vmatpush.bf16.msrb.mxu1 %v5724_v54  ;;  %4244 = vmatpush.bf16.msrb.mxu0 %v6856_v9  ;;  %v5500_v54 = vor.u32 %v6674_v49, %v5499_v48  ;;  %v5472_v9 = vor.u32 %v6667_v3, %v5471_v2  ;;  %v6060_v49 = vor.u32 %v6814_v47, %v6059_v40  ;;  %v6800_v2 = vld [vmem:[%s10070_s3 + $0x998] sm:$0xf0]  ;;  %v6867_v40 = vld [vmem:[%s10073_s5 + $0xc0] sm:$0xff] }
 0x1dc   :  { %3710 = vmatpush.bf16.msra.mxu3 %v6168_v14 }
 0x1dd   :  { %3660 = vmatmul.bf16.vlgmr.msrb.gmra.mxu3 %v8075_v1  ;;  %v6864_v1 = vld [vmem:[%s10073_s5 + $0xa8] sm:$0xff] }
 0x1de   :  { %3759 = vmatpush.bf16.msra.mxu2 %v5584_v22  ;;  %v3816_v22 = vpack.c.bf16 %v3809_v19, %v3809_v19 }
 0x1df   :  { %3776 = vmatpush.bf16.msrb.mxu1 %v5696_v37  ;;  %4245 = vmatpush.bf16.msrb.mxu0 %v6855_v24  ;;  %v9823_v52 = vpop.f32.mrf.mxu1  ;;  %v6576_v37 = vld [vmem:[%s10070_s3 + $0x298] sm:$0xf0]  ;;  %v6569_v24 = vld [vmem:[%s10070_s3 + $0x260] sm:$0xf0] }
 0x1e0   :  { %3711 = vmatpush.bf16.msra.mxu3 %v6140_v32  ;;  %v3427_v10 = vpop.f32.mrf.mxu3  ;;  %v5108_v18 = vor.u32 %v6576_v37, %v5107_v13  ;;  %v5947_v37 = vld [vmem:[%s10070_s3 + $0x910] sm:$0xf] }
 0x1e1   :  { %v3428_v14 = vadd.f32 %v3427_v10, %v9740_v5  ;;  %v6849_v5 = vld [vmem:[%s10073_s5 + $0x30] sm:$0xff]  ;;  %v6793_v10 = vld [vmem:[%s10070_s3 + $0x960] sm:$0xf0] }
 0x1e2   :  { %3777 = vmatmul.bf16.vlgmr.msrb.gmra.mxu1 %v8202_v31  ;;  %v5192_v31 = vor.u32 %v6597_v44, %v5191_v43  ;;  %3760 = vmatpush.bf16.msra.mxu2 %v5556_v41  ;;  %v6828_v41 = vld [vmem:[%s10070_s3 + $0xa78] sm:$0xf0]  ;;  %v5976_v13 = vor.u32 %v6793_v10, %v5975_v56 }
 0x1e3   :  { %4255 = vmatpush.bf16.msra.mxu1 %v6866_v16  ;;  %4246 = vmatpush.bf16.msrb.mxu0 %v6854_v42  ;;  %v3441_v15 = vadd.f32 %v9466_v21, %v3428_v14  ;;  %v5079_v21 = vld [vmem:[%s10070_s3 + $0x248] sm:$0xf]  ;;  %v6116_v45 = vor.u32 %v6828_v41, %v6115_v30  ;;  %v6786_v14 = vld [vmem:[%s10070_s3 + $0x928] sm:$0xf0]  ;;  %v6870_v41 = vld [vmem:[%s10073_s5 + $0xd8] sm:$0xff] }
 0x1e4   :  { %3730 = vmatpush.bf16.msrb.mxu3 %v5220_v0  ;;  %v5080_v34 = vor.u32 %v6569_v24, %v5079_v21  ;;  %v6555_v0 = vld [vmem:[%s10070_s3 + $0x1f0] sm:$0xf0]  ;;  %v6874_v24 = vld [vmem:[%s10073_s5 + $0xf8] sm:$0xff] }
 0x1e5   :  { %v3810_v32 = vmax.f32 %v3441_v15, 0.0  ;;  %v6882_v15 = vld [vmem:[%s10073_s5 + $0x138] sm:$0xff] }
 0x1e6   :  { %3761 = vmatpush.bf16.msra.mxu2 %v5528_v7  ;;  %v6821_v7 = vld [vmem:[%s10070_s3 + $0xa40] sm:$0xf0] }
 0x1e7   :  { %4256 = vmatpush.bf16.msra.mxu1 %v6865_v36  ;;  %4247 = vmatpush.bf16.msrb.mxu0 %v6853_v46  ;;  %v3559_v16 = vpop.f32.mrf.mxu1  ;;  %v9877_v25 = vpop.f32.mrf.mxu0  ;;  %v5023_v36 = vld [vmem:[%s10070_s3 + $0x1d8] sm:$0xf]  ;;  %v3817_v44 = vpack.c.bf16 %v3810_v32, %v3810_v32  ;;  %v1357_v32 = vperm.slane %v9637_v63, 4 }
 0x1e8   :  { %3731 = vmatpush.bf16.msrb.mxu3 %v5192_v31  ;;  %v3429_v26 = vpop.f32.mrf.mxu3  ;;  %v5024_v43 = vor.u32 %v6555_v0, %v5023_v36  ;;  %v6087_v31 = vld [vmem:[%s10070_s3 + $0xa28] sm:$0xf] }
 0x1e9   :  { %v6088_v46 = vor.u32 %v6821_v7, %v6087_v31  ;;  %v6879_v26 = vld [vmem:[%s10073_s5 + $0x120] sm:$0xff] }
 0x1ea   :  { %3762 = vmatpush.bf16.msra.mxu2 %v5500_v54  ;;  %v6031_v54 = vld [vmem:[%s10070_s3 + $0x9b8] sm:$0xf] }
 0x1eb   :  { %4257 = vmatpush.bf16.msra.mxu1 %v6864_v1  ;;  %4248 = vmatpush.bf16.msrb.mxu0 %v6852_v55  ;;  %v6846_v1 = vld [vmem:[%s10073_s5 + $0x18] sm:$0xff]  ;;  %v6807_v55 = vld [vmem:[%s10070_s3 + $0x9d0] sm:$0xf0] }
 0x1ec   :  { %3732 = vmatpush.bf16.msrb.mxu3 %v5164_v51  ;;  %v3505_v42 = vpop.f32.mrf.mxu2 }
 0x1ed   :  { %6178 = vmatmul.msk.bf16.vlgmr.msra.gmra.mxu3 %vm3167_vm0, %v8398_v23  ;;  %v6860_v23 = vld [vmem:[%s10073_s5 + $0x88] sm:$0xff] }
 0x1ee   :  { %3763 = vmatpush.bf16.msra.mxu2 %v5472_v9  ;;  %v3815_v9 = vpack.c.bf16 %v3808_v58, %v3808_v58 }
 0x1ef   :  { %4258 = vmatpush.bf16.msra.mxu1 %v6863_v4  ;;  %4249 = vmatpush.bf16.msrb.mxu0 %v6851_v38  ;;  %v3585_v50 = vpop.f32.mrf.mxu0  ;;  %v6844_v4 = vld [vmem:[%s10073_s5 + $0x8] sm:$0xff] }
 0x1f0   :  { %3733 = vmatpush.bf16.msrb.mxu3 %v5136_v8  ;;  %v6004_v8 = vor.u32 %v6800_v2, %v6003_v59  ;;  %v6869_v50 = vld [vmem:[%s10073_s5 + $0xd0] sm:$0xff]  ;;  %v6887_v2 = vld [vmem:[%s10073_s5 + $0x160] sm:$0xff] }
 0x1f1   :  { %3764 = vmatmul.bf16.vlgmr.msra.gmra.mxu2 %v8108_v39  ;;  %v5051_v39 = vld [vmem:[%s10070_s3 + $0x210] sm:$0xf] }
 0x1f2   :  { %4229 = vmatpush.bf16.msrb.mxu2 %v6850_v11  ;;  %4250 = vmatmul.bf16.vlgmr.msrb.gmra.mxu0 %v3816_v22  ;;  %v5052_v60 = vor.u32 %v6562_v28, %v5051_v39  ;;  %v6881_v22 = vld [vmem:[%s10073_s5 + $0x130] sm:$0xff]  ;;  %v6872_v28 = vld [vmem:[%s10073_s5 + $0xe8] sm:$0xff] }
 0x1f3   :  { %4259 = vmatpush.bf16.msra.mxu1 %v6862_v6 }
 0x1f4   :  { %3734 = vmatpush.bf16.msrb.mxu3 %v5108_v18  ;;  %v3507_v48 = vpop.f32.mrf.mxu2  ;;  %v6779_v18 = vld [vmem:[%s10070_s3 + $0x8f0] sm:$0xf0] }
 0x1f6   :  { %4230 = vmatpush.bf16.msrb.mxu2 %v6849_v5 }
 0x1f7   :  { %4260 = vmatpush.bf16.msra.mxu1 %v6861_v17  ;;  %v5948_v17 = vor.u32 %v6786_v14, %v5947_v37  ;;  %v1358_v14 = vperm.slane %v9637_v63, 5 }
 0x1f8   :  { %3735 = vmatpush.bf16.msrb.mxu3 %v5080_v34 }
 0x1fa   :  { %4231 = vmatpush.bf16.msrb.mxu2 %v6848_v27  ;;  %v6873_v27 = vld [vmem:[%s10073_s5 + $0xf0] sm:$0xff] }
 0x1fb   :  { %4261 = vmatpush.bf16.msra.mxu1 %v6860_v23  ;;  %v6880_v23 = vld [vmem:[%s10073_s5 + $0x128] sm:$0xff] }
 0x1fc   :  { %3736 = vmatpush.bf16.msrb.mxu3 %v5052_v60 }
 0x1fe   :  { %4232 = vmatpush.bf16.msrb.mxu2 %v6847_v35  ;;  %v6877_v35 = vld [vmem:[%s10073_s5 + $0x110] sm:$0xff] }
 0x1ff   :  { %4262 = vmatpush.bf16.msra.mxu1 %v6859_v29  ;;  %v9928_v51 = vpop.f32.mrf.mxu1  ;;  %v6878_v29 = vld [vmem:[%s10073_s5 + $0x118] sm:$0xff] }
 0x200   :  { %3737 = vmatpush.bf16.msrb.mxu3 %v5024_v43  ;;  %v3492_v3 = vpop.f32.mrf.mxu3 }
 0x201   :  { %v3493_v6 = vadd.f32 %v3492_v3, %v9800_v12 }
 0x202   :  { %4263 = vmatmul.bf16.vlgmr.msra.gmra.mxu1 %v3817_v44  ;;  %4233 = vmatpush.bf16.msrb.mxu2 %v6846_v1  ;;  %v6875_v1 = vld [vmem:[%s10073_s5 + $0x100] sm:$0xff] }
 0x203   :  { %3738 = vmatmul.bf16.vlgmr.msrb.gmra.mxu3 %v8004_v33  ;;  %v6032_v33 = vor.u32 %v6807_v55, %v6031_v54  ;;  %v3506_v38 = vadd.f32 %v3505_v42, %v3493_v6  ;;  %v6876_v42 = vld [vmem:[%s10073_s5 + $0x108] sm:$0xff]  ;;  %v6889_v54 = vld [vmem:[%s10073_s5 + $0x170] sm:$0xff] }
 0x204   :  { %3782 = vmatpush.bf16.msra.mxu3 %v6116_v45 }
 0x205   :  { %v3519_v11 = vadd.f32 %v9728_v61, %v3506_v38 }
 0x206   :  { %4234 = vmatpush.bf16.msrb.mxu2 %v6845_v20 }
 0x207   :  { %v3611_v19 = vpop.f32.mrf.mxu1  ;;  %v9955_v12 = vadd.f32 %v9717_v53, %v3519_v11  ;;  %v9966_v16 = vpop.f32.mrf.mxu0  ;;  %v5919_v53 = vld [vmem:[%s10070_s3 + $0x8d8] sm:$0xf]  ;;  %v6885_v11 = vld [vmem:[%s10073_s5 + $0x150] sm:$0xff] }
 0x208   :  { %3783 = vmatpush.bf16.msra.mxu3 %v6088_v46  ;;  %v3494_v61 = vpop.f32.mrf.mxu3  ;;  %v5920_v21 = vor.u32 %v6779_v18, %v5919_v53 }
 0x209   :  { %v3811_v47 = vmax.f32 %v9955_v12, 0.0  ;;  %v6883_v12 = vld [vmem:[%s10073_s5 + $0x140] sm:$0xff] }
 0x20a   :  { %4235 = vmatpush.bf16.msrb.mxu2 %v6844_v4 }
 0x20c   :  { %3784 = vmatpush.bf16.msra.mxu3 %v6060_v49  ;;  %v3570_v5 = vpop.f32.mrf.mxu2  ;;  %v3818_v49 = vpack.c.bf16 %v3811_v47, %v3811_v47 }
 0x20e   :  { %4236 = vmatpush.bf16.msrb.mxu2 %v6843_v57 }
 0x20f   :  { %v3637_v34 = vpop.f32.mrf.mxu0 }
 0x210   :  { %3785 = vmatpush.bf16.msra.mxu3 %v6032_v33  ;;  %v6888_v33 = vld [vmem:[%s10073_s5 + $0x168] sm:$0xff] }
 0x211   :  { %4237 = vmatmul.bf16.vlgmr.msrb.gmra.mxu2 %v3815_v9  ;;  %v6886_v9 = vld [vmem:[%s10073_s5 + $0x158] sm:$0xff] }
 0x212   :  { %4281 = vmatpush.bf16.msra.mxu2 %v6882_v15 }
 0x214   :  { %3786 = vmatpush.bf16.msra.mxu3 %v6004_v8  ;;  %v3572_v39 = vpop.f32.mrf.mxu2 }
 0x216   :  { %4282 = vmatpush.bf16.msra.mxu2 %v6881_v22 }
 0x218   :  { %3787 = vmatpush.bf16.msra.mxu3 %v5976_v13 }
 0x21a   :  { %4283 = vmatpush.bf16.msra.mxu2 %v6880_v23 }
 0x21c   :  { %3788 = vmatpush.bf16.msra.mxu3 %v5948_v17  ;;  %v3622_v30 = vpop.f32.mrf.mxu2  ;;  %v3636_v17 = vadd.f32 %v9966_v16, %v1358_v14  ;;  %v6892_v16 = vld [vmem:[%s10073_s5 + $0x188] sm:$0xff] }
 0x21d   :  { %4313 = vmatpush.bf16.msrb.mxu1 %v6892_v16 }
 0x21e   :  { %4284 = vmatpush.bf16.msra.mxu2 %v6879_v26 }
 0x21f   :  { %v9996_v60 = vpop.f32.mrf.mxu1 }
 0x220   :  { %3789 = vmatpush.bf16.msra.mxu3 %v5920_v21  ;;  %v3544_v36 = vpop.f32.mrf.mxu3 }
 0x221   :  { %v3545_v0 = vadd.f32 %v3544_v36, %v1357_v32 }
 0x222   :  { %4285 = vmatpush.bf16.msra.mxu2 %v6878_v29 }
 0x223   :  { %3790 = vmatmul.bf16.vlgmr.msra.gmra.mxu3 %v8251_v62  ;;  %v6871_v62 = vld [vmem:[%s10073_s5 + $0xe0] sm:$0xff]  ;;  %v3558_v43 = vadd.f32 %v9823_v52, %v3545_v0  ;;  %v6868_v52 = vld [vmem:[%s10073_s5 + $0xc8] sm:$0xff] }
 0x224   :  { %4268 = vmatpush.bf16.msrb.mxu3 %v6874_v24  ;;  %v3624_v20 = vpop.f32.mrf.mxu2 }
 0x225   :  { %v3571_v45 = vadd.f32 %v3570_v5, %v3558_v43  ;;  %v6893_v20 = vld [vmem:[%s10074_s6] ss:$0 sm:$0xff] }
 0x226   :  { %4286 = vmatpush.bf16.msra.mxu2 %v6877_v35 }
 0x227   :  { %v3676_v44 = vpop.f32.mrf.mxu1  ;;  %v3584_v31 = vadd.f32 %v9877_v25, %v3571_v45  ;;  %v3687_v7 = vpop.f32.mrf.mxu0  ;;  %v6890_v25 = vld [vmem:[%s10073_s5 + $0x178] sm:$0xff]  ;;  %v6891_v45 = vld [vmem:[%s10073_s5 + $0x180] sm:$0xff] }
 0x228   :  { %4269 = vmatpush.bf16.msrb.mxu3 %v6873_v27  ;;  %v3546_v46 = vpop.f32.mrf.mxu3  ;;  %4294 = vmatpush.bf16.msra.mxu0 %v6890_v25 }
 0x229   :  { %4314 = vmatpush.bf16.msrb.mxu1 %v6891_v45 }
 0x22a   :  { %4287 = vmatpush.bf16.msra.mxu2 %v6876_v42 }
 0x22c   :  { %4270 = vmatpush.bf16.msrb.mxu3 %v6872_v28  ;;  %4295 = vmatpush.bf16.msra.mxu0 %v6889_v54 }
 0x22e   :  { %4288 = vmatpush.bf16.msra.mxu2 %v6875_v1 }
 0x22f   :  { %v3689_v48 = vpop.f32.mrf.mxu0 }
 0x230   :  { %4271 = vmatpush.bf16.msrb.mxu3 %v6871_v62  ;;  %4296 = vmatpush.bf16.msra.mxu0 %v6888_v33 }
 0x234   :  { %4272 = vmatpush.bf16.msrb.mxu3 %v6870_v41  ;;  %v3648_v4 = vpop.f32.mrf.mxu2  ;;  %4297 = vmatpush.bf16.msra.mxu0 %v6887_v2  ;;  %v1359_v41 = vperm.slane %v9637_v63, 6 }
 0x235   :  { %v3649_v18 = vadd.f32 %v3648_v4, %v3636_v17 }
 0x238   :  { %4273 = vmatpush.bf16.msrb.mxu3 %v6869_v50  ;;  %4298 = vmatpush.bf16.msra.mxu0 %v6886_v9 }
 0x23c   :  { %4274 = vmatpush.bf16.msrb.mxu3 %v6868_v52  ;;  %v3650_v57 = vpop.f32.mrf.mxu2  ;;  %4299 = vmatpush.bf16.msra.mxu0 %v6885_v11 }
 0x23f   :  { %v3726_v55 = vpop.f32.mrf.mxu1 }
 0x240   :  { %4275 = vmatpush.bf16.msrb.mxu3 %v6867_v40  ;;  %v3596_v58 = vpop.f32.mrf.mxu3  ;;  %v3727_v43 = vadd.f32 %v3726_v55, %v1359_v41 }
 0x241   :  { %v3597_v59 = vadd.f32 %v3596_v58, %v3584_v31 }
 0x243   :  { %4276 = vmatmul.bf16.vlgmr.msrb.gmra.mxu3 %v3818_v49  ;;  %v3610_v3 = vadd.f32 %v9928_v51, %v3597_v59  ;;  %v6884_v51 = vld [vmem:[%s10073_s5 + $0x148] sm:$0xff] }
 0x244   :  { %4300 = vmatpush.bf16.msra.mxu0 %v6884_v51 }
 0x245   :  { %v3623_v8 = vadd.f32 %v3622_v30, %v3610_v3 }
 0x247   :  { %v3728_v6 = vpop.f32.mrf.mxu1  ;;  %v3812_v38 = vmax.f32 %v3623_v8, 0.0  ;;  %v3752_v19 = vpop.f32.mrf.mxu0 }
 0x248   :  { %v3598_v56 = vpop.f32.mrf.mxu3  ;;  %4301 = vmatpush.bf16.msra.mxu0 %v6883_v12 }
 0x249   :  { %v3819_v10 = vpack.c.bf16 %v3812_v38, %v3812_v38 }
 0x24b   :  { %4289 = vmatmul.bf16.vlgmr.msra.gmra.mxu2 %v3819_v10 }
 0x24f   :  { %v3754_v13 = vpop.f32.mrf.mxu0 }
 0x254   :  { %v3700_v37 = vpop.f32.mrf.mxu2 }
 0x257   :  { %v3804_v61 = vpop.f32.mrf.mxu0 }
 0x25c   :  { %v3702_v53 = vpop.f32.mrf.mxu2 }
 0x25f   :  { %v3778_v15 = vpop.f32.mrf.mxu1  ;;  %v3806_v23 = vpop.f32.mrf.mxu0 }
 0x260   :  { %v3661_v22 = vpop.f32.mrf.mxu3 }
 0x261   :  { %v3662_v5 = vadd.f32 %v3661_v22, %v3649_v18 }
 0x263   :  { %v3675_v24 = vadd.f32 %v9996_v60, %v3662_v5 }
 0x265   :  { %v3688_v26 = vadd.f32 %v3687_v7, %v3675_v24 }
 0x267   :  { %v3780_v21 = vpop.f32.mrf.mxu1  ;;  %v3701_v39 = vadd.f32 %v3700_v37, %v3688_v26 }
 0x268   :  { %v3663_v34 = vpop.f32.mrf.mxu3 }
 0x26f   :  { %v4251_v27 = vpop.f32.mrf.mxu0 }
 0x270   :  { %v3713_v28 = vpop.f32.mrf.mxu3 }
 0x271   :  { %v3714_v29 = vadd.f32 %v3713_v28, %v3701_v39 }
 0x273   :  { %v3813_v62 = vmax.f32 %v3714_v29, 0.0 }
 0x274   :  { %v3765_v32 = vpop.f32.mrf.mxu2 }
 0x275   :  { %v3820_v36 = vpack.c.bf16 %v3813_v62, %v3813_v62 }
 0x277   :  { %v4253_v35 = vpop.f32.mrf.mxu0  ;;  %4302 = vmatmul.bf16.vlgmr.msra.gmra.mxu0 %v3820_v36 }
 0x278   :  { %v3715_v30 = vpop.f32.mrf.mxu3 }
 0x27c   :  { %v3767_v60 = vpop.f32.mrf.mxu2 }
 0x27f   :  { %v4264_v0 = vpop.f32.mrf.mxu1 }
 0x286   :  { %v3739_v44 = vpop.f32.mrf.mxu3 }
 0x287   :  { %v4266_v42 = vpop.f32.mrf.mxu1  ;;  %v3740_v50 = vadd.f32 %v3739_v44, %v3727_v43 }
 0x289   :  { %v3753_v1 = vadd.f32 %v3752_v19, %v3740_v50 }
 0x28b   :  { %v3766_v31 = vadd.f32 %v3765_v32, %v3753_v1 }
 0x28d   :  { %v3779_v7 = vadd.f32 %v3778_v15, %v3766_v31 }
 0x28e   :  { %v3741_v46 = vpop.f32.mrf.mxu3 }
 0x294   :  { %v4238_v52 = vpop.f32.mrf.mxu2 }
 0x295   :  { %v4239_v40 = vadd.f32 %v6893_v20, %v4238_v52 }
 0x297   :  { %v4252_v63 = vadd.f32 %v4251_v27, %v4239_v40 }
 0x299   :  { %v4265_v47 = vadd.f32 %v4264_v0, %v4252_v63 }
 0x29c   :  { %v4240_v48 = vpop.f32.mrf.mxu2 }
 0x2a6   :  { %v3791_v25 = vpop.f32.mrf.mxu3 }
 0x2a7   :  { %v3792_v49 = vadd.f32 %v3791_v25, %v3779_v7 }
 0x2a9   :  { %v3805_v4 = vadd.f32 %v3804_v61, %v3792_v49 }
 0x2ab   :  { %v3814_v54 = vmax.f32 %v3805_v4, 0.0 }
 0x2ad   :  { %v3821_v55 = vpack.c.bf16 %v3814_v54, %v3814_v54 }
 0x2ae   :  { %v3793_v33 = vpop.f32.mrf.mxu3 }
 0x2af   :  { %6380 = vmatmul.msk.bf16.vlgmr.msrb.gmra.mxu1 %vm3167_vm0, %v3821_v55 }
 0x2c6   :  { %v4277_v57 = vpop.f32.mrf.mxu3 }
 0x2c7   :  { %v4278_v58 = vadd.f32 %v4277_v57, %v4265_v47 }
 0x2ce   :  { %v4279_v59 = vpop.f32.mrf.mxu3  ;;  %v4290_v2 = vpop.f32.mrf.mxu2 }
 0x2cf   :  { %v4291_v3 = vadd.f32 %v4290_v2, %v4278_v58 }
 0x2d6   :  { %v4292_v6 = vpop.f32.mrf.mxu2 }
 0x2f4   :  { %v4303_v8 = vpop.f32.mrf.mxu0 }
 0x2f5   :  { %v4304_v38 = vadd.f32 %v4303_v8, %v4291_v3 }
 0x2fc   :  { %v4305_v9 = vpop.f32.mrf.mxu0 }
 0x32c   :  { %v4316_v19 = vpop.f32.mrf.mxu1 }
 0x32d   :  { %v4317_v56 = vadd.f32 %v4316_v19, %v4304_v38 }
 0x32f   :  { %4320 = vst [vmem:[%s10075_s7] sm:$0xff] %v4317_v56 }
 0x334   :  { %v4318_v10 = vpop.f32.mrf.mxu1 }

</bundles_post_ra>
